<compile_context>
chip_gen: v7x
topology: tpu7x:2x2x1
jax: 0.10.0
libtpu: 0.0.40
codegen_flags: <defaults>
</compile_context>

<pallas_src>
import jax
import jax.numpy as jnp
from jax.experimental import pallas as pl
from jax.experimental.pallas import tpu as pltpu

# ----------------------------- model sizes ---------------------------------
INPUT_SIZE = 8
HIDDEN_SIZE = 64
LATENT_SIZE = 16
ENC_SEQ_LEN = 8
DEC_SEQ_LEN = 15        # `seq_length` in the reference script


# ----------------------------- gate math ------------------------------------
def _gate_update(gates, c, H):
    """LSTM cell update. gates:(B,4H) laid out [i|f|o|g], c:(B,H). All f32."""
    sg = jax.nn.sigmoid(gates[:, :3 * H])    # i, f, o  (contiguous lanes)
    g = jnp.tanh(gates[:, 3 * H:])           # g only
    i = sg[:, 0 * H:1 * H]
    f = sg[:, 1 * H:2 * H]
    o = sg[:, 2 * H:3 * H]
    c_new = f * c + i * g
    h_new = o * jnp.tanh(c_new)
    return h_new, c_new


# ----------------------------- fused kernel ---------------------------------
def lstm_ae_kernel(x_ref, enc_wih_ref, enc_whh_ref, enc_b_ref,
                   wmulv_ref, bmulv_ref,
                   dec_wih_ref, dec_whh_ref, dec_b_ref,
                   wout_ref, bout_ref, eps_ref,
                   recon_ref, mulv_ref):
    f32, bf16 = jnp.float32, jnp.bfloat16

    B = eps_ref.shape[0]
    H = enc_whh_ref.shape[0]
    I = wout_ref.shape[1]
    L = dec_wih_ref.shape[0]
    T_enc = x_ref.shape[1] // I
    T_dec = recon_ref.shape[1] // I

    # ------------------------ encoder LSTM ------------------------
    x2d = x_ref[...]                                   # (B, T_enc*I), batch-first
    enc_wih = enc_wih_ref[...]
    enc_b = enc_b_ref[...]
    # Per-timestep input projections are independent of the recurrence ->
    # the scheduler can overlap them with the serial loop.
    gates_in = [
        jnp.dot(x2d[:, t * I:(t + 1) * I], enc_wih,
                preferred_element_type=f32) + enc_b
        for t in range(T_enc)
    ]

    enc_whh = enc_whh_ref[...].astype(bf16)            # one-time cast, bf16 MXU path
    h = jnp.zeros((B, H), f32)
    c = jnp.zeros((B, H), f32)
    for t in range(T_enc):                             # unrolled (static T)
        gates = gates_in[t] + jnp.dot(h.astype(bf16), enc_whh,
                                      preferred_element_type=f32)
        h, c = _gate_update(gates, c, H)
    # h is now h_n[-1]

    # ------------------------ VAE head -----------------------------
    # fc_mu and fc_logvar fused into one (H, 2L) weight, single MXU pass.
    mulv = jnp.dot(h, wmulv_ref[...], preferred_element_type=f32) + bmulv_ref[...]
    mulv_ref[...] = mulv
    mu = mulv[:, :L]
    lv = mulv[:, L:]
    z = mu + eps_ref[...] * jnp.exp(0.5 * lv)          # reparameterize

    # ------------------------ decoder LSTM -------------------------
    # Decoder input is the same z every timestep -> input projection hoisted.
    gates_in_dec = (jnp.dot(z, dec_wih_ref[...], preferred_element_type=f32)
                    + dec_b_ref[...])                  # (B, 4H)
    dec_whh = dec_whh_ref[...].astype(bf16)
    wout = wout_ref[...]
    bout = bout_ref[...]

    h = jnp.zeros((B, H), f32)
    c = jnp.zeros((B, H), f32)
    recon_pieces = []
    for t in range(T_dec):                             # unrolled (static T)
        gates = gates_in_dec + jnp.dot(h.astype(bf16), dec_whh,
                                       preferred_element_type=f32)
        h, c = _gate_update(gates, c, H)
        # fc_decoder for this step; independent of the recurrence once h_t exists.
        recon_pieces.append(jnp.dot(h, wout, preferred_element_type=f32) + bout)

    # Single lane-dense store of the whole reconstruction: (B, T_dec*I).
    recon_ref[...] = jnp.concatenate(recon_pieces, axis=1)


# ----------------------------- wrapper ---------------------------------------
def lstm_ae_forward(x, params, eps):
    """x: (B, T, input_size) batch_first, like PyTorch. Returns (recon_x, mu, logvar)."""
    B, T_enc, I = x.shape
    H, L, T_dec = HIDDEN_SIZE, LATENT_SIZE, DEC_SEQ_LEN

    # Pad batch to a full sublane tile (8); padded rows are zero and sliced off.
    B_pad = max(8, ((B + 7) // 8) * 8)
    if B_pad != B:
        x = jnp.pad(x, ((0, B_pad - B), (0, 0), (0, 0)))
        eps = jnp.pad(eps, ((0, B_pad - B), (0, 0)))
    # Batch-first contiguous flatten -> no device transpose, lane-dense input slab.
    x2d = x.reshape(B_pad, T_enc * I)

    def full(shp):
        return pl.BlockSpec(shp, lambda i: (0,) * len(shp))

    recon_slab, mulv = pl.pallas_call(
        lstm_ae_kernel,
        out_shape=(jax.ShapeDtypeStruct((B_pad, T_dec * I), jnp.float32),
                   jax.ShapeDtypeStruct((B_pad, 2 * L), jnp.float32)),
        grid=(1,),
        in_specs=[
            full((B_pad, T_enc * I)),
            full((I, 4 * H)), full((H, 4 * H)), full((1, 4 * H)),
            full((H, 2 * L)), full((1, 2 * L)),
            full((L, 4 * H)), full((H, 4 * H)), full((1, 4 * H)),
            full((H, I)), full((1, I)),
            full((B_pad, L)),
        ],
        out_specs=(full((B_pad, T_dec * I)), full((B_pad, 2 * L))),
        compiler_params=pltpu.CompilerParams(
            dimension_semantics=("arbitrary",)),
    )(x2d,
      params["enc_wih"], params["enc_whh"], params["enc_b"],
      params["wmulv"], params["bmulv"],
      params["dec_wih"], params["dec_whh"], params["dec_b"],
      params["wout"], params["bout"], eps)

    recon_x = recon_slab[:B].reshape(B, T_dec, I)      # (B, T_dec, I)
    mu = mulv[:B, :L]
    logvar = mulv[:B, L:]
    return recon_x, mu, logvar


# ----------------------------- param init ------------------------------------
def init_params(key):
    """Deterministic synthetic weights, (in, out) layout, gate columns [i|f|o|g],
    LSTM biases folded (b = b_ih + b_hh), fc_mu/fc_logvar fused into one (H, 2L)."""
    ks = jax.random.split(key, 10)
    H, I, L = HIDDEN_SIZE, INPUT_SIZE, LATENT_SIZE
    u = lambda k, shp, bound: jax.random.uniform(k, shp, jnp.float32, -bound, bound)
    kH = 1.0 / (H ** 0.5)
    return {
        # encoder LSTM
        "enc_wih": u(ks[0], (I, 4 * H), kH),
        "enc_whh": u(ks[1], (H, 4 * H), kH),
        "enc_b":   u(ks[2], (1, 4 * H), kH),
        # fused fc_mu | fc_logvar
        "wmulv": u(ks[3], (H, 2 * L), kH),
        "bmulv": u(ks[4], (1, 2 * L), kH),
        # decoder LSTM
        "dec_wih": u(ks[5], (L, 4 * H), kH),
        "dec_whh": u(ks[6], (H, 4 * H), kH),
        "dec_b":   u(ks[7], (1, 4 * H), kH),
        # fc_decoder
        "wout": u(ks[8], (H, I), kH),
        "bout": u(ks[9], (1, I), kH),
    }


# ----------------------------- main -------------------------------------------
if __name__ == "__main__":
    key = jax.random.PRNGKey(0)
    k_param, k_x, k_eps = jax.random.split(key, 3)

    B = 2
    x = jax.random.normal(k_x, (B, ENC_SEQ_LEN, INPUT_SIZE), jnp.float32)
    # torch.randn_like reparameterization noise, drawn deterministically here.
    eps = jax.random.normal(k_eps, (B, LATENT_SIZE), jnp.float32)

    params = init_params(k_param)

    recon_x, mu, logvar = jax.jit(lstm_ae_forward)(x, params, eps)
    jax.block_until_ready((recon_x, mu, logvar))

    assert recon_x.shape == (B, DEC_SEQ_LEN, INPUT_SIZE)
    assert mu.shape == (B, LATENT_SIZE)
    assert logvar.shape == (B, LATENT_SIZE)
    assert bool(jnp.all(jnp.isfinite(recon_x)))
    assert bool(jnp.all(jnp.isfinite(mu))) and bool(jnp.all(jnp.isfinite(logvar)))
    print("KERNEL_OK")
</pallas_src>

<mosaic_0001>
module attributes {stable_mosaic.version = 11 : i64} {
  func.func @lstm_ae_kernel(%arg0: i32, %arg1: memref<8x64xf32, #tpu.memory_space<vmem>>, %arg2: memref<8x256xf32, #tpu.memory_space<vmem>>, %arg3: memref<64x256xf32, #tpu.memory_space<vmem>>, %arg4: memref<1x256xf32, #tpu.memory_space<vmem>>, %arg5: memref<64x32xf32, #tpu.memory_space<vmem>>, %arg6: memref<1x32xf32, #tpu.memory_space<vmem>>, %arg7: memref<16x256xf32, #tpu.memory_space<vmem>>, %arg8: memref<64x256xf32, #tpu.memory_space<vmem>>, %arg9: memref<1x256xf32, #tpu.memory_space<vmem>>, %arg10: memref<64x8xf32, #tpu.memory_space<vmem>>, %arg11: memref<1x8xf32, #tpu.memory_space<vmem>>, %arg12: memref<8x16xf32, #tpu.memory_space<vmem>>, %arg13: memref<8x120xf32, #tpu.memory_space<vmem>>, %arg14: memref<8x32xf32, #tpu.memory_space<vmem>>) attributes {dimension_semantics = [#tpu.dimension_semantics<arbitrary>], iteration_bounds = array<i64: 1>, scalar_prefetch = 0 : i64, scratch_operands = 0 : i64, tpu.core_type = #tpu.core_type<tc>, window_params = [{pipeline_mode = #tpu.pipeline_mode<synchronous>, transform_indices = @transform_0, window_bounds = array<i64: 8, 64>}, {pipeline_mode = #tpu.pipeline_mode<synchronous>, transform_indices = @transform_1, window_bounds = array<i64: 8, 256>}, {pipeline_mode = #tpu.pipeline_mode<synchronous>, transform_indices = @transform_2, window_bounds = array<i64: 64, 256>}, {pipeline_mode = #tpu.pipeline_mode<synchronous>, transform_indices = @transform_3, window_bounds = array<i64: 1, 256>}, {pipeline_mode = #tpu.pipeline_mode<synchronous>, transform_indices = @transform_4, window_bounds = array<i64: 64, 32>}, {pipeline_mode = #tpu.pipeline_mode<synchronous>, transform_indices = @transform_5, window_bounds = array<i64: 1, 32>}, {pipeline_mode = #tpu.pipeline_mode<synchronous>, transform_indices = @transform_6, window_bounds = array<i64: 16, 256>}, {pipeline_mode = #tpu.pipeline_mode<synchronous>, transform_indices = @transform_7, window_bounds = array<i64: 64, 256>}, {pipeline_mode = #tpu.pipeline_mode<synchronous>, transform_indices = @transform_8, window_bounds = array<i64: 1, 256>}, {pipeline_mode = #tpu.pipeline_mode<synchronous>, transform_indices = @transform_9, window_bounds = array<i64: 64, 8>}, {pipeline_mode = #tpu.pipeline_mode<synchronous>, transform_indices = @transform_10, window_bounds = array<i64: 1, 8>}, {pipeline_mode = #tpu.pipeline_mode<synchronous>, transform_indices = @transform_11, window_bounds = array<i64: 8, 16>}, {pipeline_mode = #tpu.pipeline_mode<synchronous>, transform_indices = @transform_12, window_bounds = array<i64: 8, 120>}, {pipeline_mode = #tpu.pipeline_mode<synchronous>, transform_indices = @transform_13, window_bounds = array<i64: 8, 32>}]} {
    %c0 = arith.constant 0 : index
    %c0_0 = arith.constant 0 : index
    %0 = vector.load %arg1[%c0, %c0_0] : memref<8x64xf32, #tpu.memory_space<vmem>>, vector<8x64xf32>
    %c0_1 = arith.constant 0 : index
    %c0_2 = arith.constant 0 : index
    %1 = vector.load %arg2[%c0_1, %c0_2] : memref<8x256xf32, #tpu.memory_space<vmem>>, vector<8x256xf32>
    %c0_3 = arith.constant 0 : index
    %c0_4 = arith.constant 0 : index
    %2 = vector.load %arg4[%c0_3, %c0_4] : memref<1x256xf32, #tpu.memory_space<vmem>>, vector<1x256xf32>
    %3 = vector.extract_strided_slice %0 {offsets = [0, 0], sizes = [8, 8], strides = [1, 1]} : vector<8x64xf32> to vector<8x8xf32>
    %cst = arith.constant dense<0.000000e+00> : vector<8x256xf32>
    %4 = tpu.matmul %3, %1, %cst {dimension_numbers = #tpu.dot_dimension_numbers<[1], [0], [0], [1], [0, 0, 1, 1], [], []>} : vector<8x8xf32>, vector<8x256xf32>, vector<8x256xf32> -> vector<8x256xf32>
    %5 = vector.broadcast %2 : vector<1x256xf32> to vector<8x256xf32>
    %6 = arith.addf %4, %5 : vector<8x256xf32>
    %7 = vector.extract_strided_slice %0 {offsets = [0, 8], sizes = [8, 8], strides = [1, 1]} : vector<8x64xf32> to vector<8x8xf32>
    %cst_5 = arith.constant dense<0.000000e+00> : vector<8x256xf32>
    %8 = tpu.matmul %7, %1, %cst_5 {dimension_numbers = #tpu.dot_dimension_numbers<[1], [0], [0], [1], [0, 0, 1, 1], [], []>} : vector<8x8xf32>, vector<8x256xf32>, vector<8x256xf32> -> vector<8x256xf32>
    %9 = vector.broadcast %2 : vector<1x256xf32> to vector<8x256xf32>
    %10 = arith.addf %8, %9 : vector<8x256xf32>
    %11 = vector.extract_strided_slice %0 {offsets = [0, 16], sizes = [8, 8], strides = [1, 1]} : vector<8x64xf32> to vector<8x8xf32>
    %cst_6 = arith.constant dense<0.000000e+00> : vector<8x256xf32>
    %12 = tpu.matmul %11, %1, %cst_6 {dimension_numbers = #tpu.dot_dimension_numbers<[1], [0], [0], [1], [0, 0, 1, 1], [], []>} : vector<8x8xf32>, vector<8x256xf32>, vector<8x256xf32> -> vector<8x256xf32>
    %13 = vector.broadcast %2 : vector<1x256xf32> to vector<8x256xf32>
    %14 = arith.addf %12, %13 : vector<8x256xf32>
    %15 = vector.extract_strided_slice %0 {offsets = [0, 24], sizes = [8, 8], strides = [1, 1]} : vector<8x64xf32> to vector<8x8xf32>
    %cst_7 = arith.constant dense<0.000000e+00> : vector<8x256xf32>
    %16 = tpu.matmul %15, %1, %cst_7 {dimension_numbers = #tpu.dot_dimension_numbers<[1], [0], [0], [1], [0, 0, 1, 1], [], []>} : vector<8x8xf32>, vector<8x256xf32>, vector<8x256xf32> -> vector<8x256xf32>
    %17 = vector.broadcast %2 : vector<1x256xf32> to vector<8x256xf32>
    %18 = arith.addf %16, %17 : vector<8x256xf32>
    %19 = vector.extract_strided_slice %0 {offsets = [0, 32], sizes = [8, 8], strides = [1, 1]} : vector<8x64xf32> to vector<8x8xf32>
    %cst_8 = arith.constant dense<0.000000e+00> : vector<8x256xf32>
    %20 = tpu.matmul %19, %1, %cst_8 {dimension_numbers = #tpu.dot_dimension_numbers<[1], [0], [0], [1], [0, 0, 1, 1], [], []>} : vector<8x8xf32>, vector<8x256xf32>, vector<8x256xf32> -> vector<8x256xf32>
    %21 = vector.broadcast %2 : vector<1x256xf32> to vector<8x256xf32>
    %22 = arith.addf %20, %21 : vector<8x256xf32>
    %23 = vector.extract_strided_slice %0 {offsets = [0, 40], sizes = [8, 8], strides = [1, 1]} : vector<8x64xf32> to vector<8x8xf32>
    %cst_9 = arith.constant dense<0.000000e+00> : vector<8x256xf32>
    %24 = tpu.matmul %23, %1, %cst_9 {dimension_numbers = #tpu.dot_dimension_numbers<[1], [0], [0], [1], [0, 0, 1, 1], [], []>} : vector<8x8xf32>, vector<8x256xf32>, vector<8x256xf32> -> vector<8x256xf32>
    %25 = vector.broadcast %2 : vector<1x256xf32> to vector<8x256xf32>
    %26 = arith.addf %24, %25 : vector<8x256xf32>
    %27 = vector.extract_strided_slice %0 {offsets = [0, 48], sizes = [8, 8], strides = [1, 1]} : vector<8x64xf32> to vector<8x8xf32>
    %cst_10 = arith.constant dense<0.000000e+00> : vector<8x256xf32>
    %28 = tpu.matmul %27, %1, %cst_10 {dimension_numbers = #tpu.dot_dimension_numbers<[1], [0], [0], [1], [0, 0, 1, 1], [], []>} : vector<8x8xf32>, vector<8x256xf32>, vector<8x256xf32> -> vector<8x256xf32>
    %29 = vector.broadcast %2 : vector<1x256xf32> to vector<8x256xf32>
    %30 = arith.addf %28, %29 : vector<8x256xf32>
    %31 = vector.extract_strided_slice %0 {offsets = [0, 56], sizes = [8, 8], strides = [1, 1]} : vector<8x64xf32> to vector<8x8xf32>
    %cst_11 = arith.constant dense<0.000000e+00> : vector<8x256xf32>
    %32 = tpu.matmul %31, %1, %cst_11 {dimension_numbers = #tpu.dot_dimension_numbers<[1], [0], [0], [1], [0, 0, 1, 1], [], []>} : vector<8x8xf32>, vector<8x256xf32>, vector<8x256xf32> -> vector<8x256xf32>
    %33 = vector.broadcast %2 : vector<1x256xf32> to vector<8x256xf32>
    %34 = arith.addf %32, %33 : vector<8x256xf32>
    %c0_12 = arith.constant 0 : index
    %c0_13 = arith.constant 0 : index
    %35 = vector.load %arg3[%c0_12, %c0_13] : memref<64x256xf32, #tpu.memory_space<vmem>>, vector<64x256xf32>
    %36 = arith.truncf %35 : vector<64x256xf32> to vector<64x256xbf16>
    %cst_14 = arith.constant 0.000000e+00 : f32
    %37 = vector.broadcast %cst_14 : f32 to vector<8x64xf32>
    %cst_15 = arith.constant 0.000000e+00 : f32
    %38 = vector.broadcast %cst_15 : f32 to vector<8x64xf32>
    %39 = arith.truncf %37 : vector<8x64xf32> to vector<8x64xbf16>
    %cst_16 = arith.constant dense<0.000000e+00> : vector<8x256xf32>
    %40 = tpu.matmul %39, %36, %cst_16 {dimension_numbers = #tpu.dot_dimension_numbers<[1], [0], [0], [1], [0, 0, 1, 1], [], []>} : vector<8x64xbf16>, vector<64x256xbf16>, vector<8x256xf32> -> vector<8x256xf32>
    %41 = arith.addf %6, %40 : vector<8x256xf32>
    %42 = vector.extract_strided_slice %41 {offsets = [0, 0], sizes = [8, 192], strides = [1, 1]} : vector<8x256xf32> to vector<8x192xf32>
    %43 = arith.negf %42 : vector<8x192xf32>
    %44 = math.exp %43 : vector<8x192xf32>
    %cst_17 = arith.constant 1.000000e+00 : f32
    %45 = vector.broadcast %cst_17 : f32 to vector<8x192xf32>
    %46 = arith.addf %45, %44 : vector<8x192xf32>
    %47 = arith.divf %45, %46 : vector<8x192xf32>
    %48 = vector.extract_strided_slice %41 {offsets = [0, 192], sizes = [8, 64], strides = [1, 1]} : vector<8x256xf32> to vector<8x64xf32>
    %49 = math.tanh %48 : vector<8x64xf32>
    %50 = vector.extract_strided_slice %47 {offsets = [0, 0], sizes = [8, 64], strides = [1, 1]} : vector<8x192xf32> to vector<8x64xf32>
    %51 = vector.extract_strided_slice %47 {offsets = [0, 64], sizes = [8, 64], strides = [1, 1]} : vector<8x192xf32> to vector<8x64xf32>
    %52 = vector.extract_strided_slice %47 {offsets = [0, 128], sizes = [8, 64], strides = [1, 1]} : vector<8x192xf32> to vector<8x64xf32>
    %53 = arith.mulf %51, %38 : vector<8x64xf32>
    %54 = arith.mulf %50, %49 : vector<8x64xf32>
    %55 = arith.addf %53, %54 : vector<8x64xf32>
    %56 = math.tanh %55 : vector<8x64xf32>
    %57 = arith.mulf %52, %56 : vector<8x64xf32>
    %58 = arith.truncf %57 : vector<8x64xf32> to vector<8x64xbf16>
    %cst_18 = arith.constant dense<0.000000e+00> : vector<8x256xf32>
    %59 = tpu.matmul %58, %36, %cst_18 {dimension_numbers = #tpu.dot_dimension_numbers<[1], [0], [0], [1], [0, 0, 1, 1], [], []>} : vector<8x64xbf16>, vector<64x256xbf16>, vector<8x256xf32> -> vector<8x256xf32>
    %60 = arith.addf %10, %59 : vector<8x256xf32>
    %61 = vector.extract_strided_slice %60 {offsets = [0, 0], sizes = [8, 192], strides = [1, 1]} : vector<8x256xf32> to vector<8x192xf32>
    %62 = arith.negf %61 : vector<8x192xf32>
    %63 = math.exp %62 : vector<8x192xf32>
    %cst_19 = arith.constant 1.000000e+00 : f32
    %64 = vector.broadcast %cst_19 : f32 to vector<8x192xf32>
    %65 = arith.addf %64, %63 : vector<8x192xf32>
    %66 = arith.divf %64, %65 : vector<8x192xf32>
    %67 = vector.extract_strided_slice %60 {offsets = [0, 192], sizes = [8, 64], strides = [1, 1]} : vector<8x256xf32> to vector<8x64xf32>
    %68 = math.tanh %67 : vector<8x64xf32>
    %69 = vector.extract_strided_slice %66 {offsets = [0, 0], sizes = [8, 64], strides = [1, 1]} : vector<8x192xf32> to vector<8x64xf32>
    %70 = vector.extract_strided_slice %66 {offsets = [0, 64], sizes = [8, 64], strides = [1, 1]} : vector<8x192xf32> to vector<8x64xf32>
    %71 = vector.extract_strided_slice %66 {offsets = [0, 128], sizes = [8, 64], strides = [1, 1]} : vector<8x192xf32> to vector<8x64xf32>
    %72 = arith.mulf %70, %55 : vector<8x64xf32>
    %73 = arith.mulf %69, %68 : vector<8x64xf32>
    %74 = arith.addf %72, %73 : vector<8x64xf32>
    %75 = math.tanh %74 : vector<8x64xf32>
    %76 = arith.mulf %71, %75 : vector<8x64xf32>
    %77 = arith.truncf %76 : vector<8x64xf32> to vector<8x64xbf16>
    %cst_20 = arith.constant dense<0.000000e+00> : vector<8x256xf32>
    %78 = tpu.matmul %77, %36, %cst_20 {dimension_numbers = #tpu.dot_dimension_numbers<[1], [0], [0], [1], [0, 0, 1, 1], [], []>} : vector<8x64xbf16>, vector<64x256xbf16>, vector<8x256xf32> -> vector<8x256xf32>
    %79 = arith.addf %14, %78 : vector<8x256xf32>
    %80 = vector.extract_strided_slice %79 {offsets = [0, 0], sizes = [8, 192], strides = [1, 1]} : vector<8x256xf32> to vector<8x192xf32>
    %81 = arith.negf %80 : vector<8x192xf32>
    %82 = math.exp %81 : vector<8x192xf32>
    %cst_21 = arith.constant 1.000000e+00 : f32
    %83 = vector.broadcast %cst_21 : f32 to vector<8x192xf32>
    %84 = arith.addf %83, %82 : vector<8x192xf32>
    %85 = arith.divf %83, %84 : vector<8x192xf32>
    %86 = vector.extract_strided_slice %79 {offsets = [0, 192], sizes = [8, 64], strides = [1, 1]} : vector<8x256xf32> to vector<8x64xf32>
    %87 = math.tanh %86 : vector<8x64xf32>
    %88 = vector.extract_strided_slice %85 {offsets = [0, 0], sizes = [8, 64], strides = [1, 1]} : vector<8x192xf32> to vector<8x64xf32>
    %89 = vector.extract_strided_slice %85 {offsets = [0, 64], sizes = [8, 64], strides = [1, 1]} : vector<8x192xf32> to vector<8x64xf32>
    %90 = vector.extract_strided_slice %85 {offsets = [0, 128], sizes = [8, 64], strides = [1, 1]} : vector<8x192xf32> to vector<8x64xf32>
    %91 = arith.mulf %89, %74 : vector<8x64xf32>
    %92 = arith.mulf %88, %87 : vector<8x64xf32>
    %93 = arith.addf %91, %92 : vector<8x64xf32>
    %94 = math.tanh %93 : vector<8x64xf32>
    %95 = arith.mulf %90, %94 : vector<8x64xf32>
    %96 = arith.truncf %95 : vector<8x64xf32> to vector<8x64xbf16>
    %cst_22 = arith.constant dense<0.000000e+00> : vector<8x256xf32>
    %97 = tpu.matmul %96, %36, %cst_22 {dimension_numbers = #tpu.dot_dimension_numbers<[1], [0], [0], [1], [0, 0, 1, 1], [], []>} : vector<8x64xbf16>, vector<64x256xbf16>, vector<8x256xf32> -> vector<8x256xf32>
    %98 = arith.addf %18, %97 : vector<8x256xf32>
    %99 = vector.extract_strided_slice %98 {offsets = [0, 0], sizes = [8, 192], strides = [1, 1]} : vector<8x256xf32> to vector<8x192xf32>
    %100 = arith.negf %99 : vector<8x192xf32>
    %101 = math.exp %100 : vector<8x192xf32>
    %cst_23 = arith.constant 1.000000e+00 : f32
    %102 = vector.broadcast %cst_23 : f32 to vector<8x192xf32>
    %103 = arith.addf %102, %101 : vector<8x192xf32>
    %104 = arith.divf %102, %103 : vector<8x192xf32>
    %105 = vector.extract_strided_slice %98 {offsets = [0, 192], sizes = [8, 64], strides = [1, 1]} : vector<8x256xf32> to vector<8x64xf32>
    %106 = math.tanh %105 : vector<8x64xf32>
    %107 = vector.extract_strided_slice %104 {offsets = [0, 0], sizes = [8, 64], strides = [1, 1]} : vector<8x192xf32> to vector<8x64xf32>
    %108 = vector.extract_strided_slice %104 {offsets = [0, 64], sizes = [8, 64], strides = [1, 1]} : vector<8x192xf32> to vector<8x64xf32>
    %109 = vector.extract_strided_slice %104 {offsets = [0, 128], sizes = [8, 64], strides = [1, 1]} : vector<8x192xf32> to vector<8x64xf32>
    %110 = arith.mulf %108, %93 : vector<8x64xf32>
    %111 = arith.mulf %107, %106 : vector<8x64xf32>
    %112 = arith.addf %110, %111 : vector<8x64xf32>
    %113 = math.tanh %112 : vector<8x64xf32>
    %114 = arith.mulf %109, %113 : vector<8x64xf32>
    %115 = arith.truncf %114 : vector<8x64xf32> to vector<8x64xbf16>
    %cst_24 = arith.constant dense<0.000000e+00> : vector<8x256xf32>
    %116 = tpu.matmul %115, %36, %cst_24 {dimension_numbers = #tpu.dot_dimension_numbers<[1], [0], [0], [1], [0, 0, 1, 1], [], []>} : vector<8x64xbf16>, vector<64x256xbf16>, vector<8x256xf32> -> vector<8x256xf32>
    %117 = arith.addf %22, %116 : vector<8x256xf32>
    %118 = vector.extract_strided_slice %117 {offsets = [0, 0], sizes = [8, 192], strides = [1, 1]} : vector<8x256xf32> to vector<8x192xf32>
    %119 = arith.negf %118 : vector<8x192xf32>
    %120 = math.exp %119 : vector<8x192xf32>
    %cst_25 = arith.constant 1.000000e+00 : f32
    %121 = vector.broadcast %cst_25 : f32 to vector<8x192xf32>
    %122 = arith.addf %121, %120 : vector<8x192xf32>
    %123 = arith.divf %121, %122 : vector<8x192xf32>
    %124 = vector.extract_strided_slice %117 {offsets = [0, 192], sizes = [8, 64], strides = [1, 1]} : vector<8x256xf32> to vector<8x64xf32>
    %125 = math.tanh %124 : vector<8x64xf32>
    %126 = vector.extract_strided_slice %123 {offsets = [0, 0], sizes = [8, 64], strides = [1, 1]} : vector<8x192xf32> to vector<8x64xf32>
    %127 = vector.extract_strided_slice %123 {offsets = [0, 64], sizes = [8, 64], strides = [1, 1]} : vector<8x192xf32> to vector<8x64xf32>
    %128 = vector.extract_strided_slice %123 {offsets = [0, 128], sizes = [8, 64], strides = [1, 1]} : vector<8x192xf32> to vector<8x64xf32>
    %129 = arith.mulf %127, %112 : vector<8x64xf32>
    %130 = arith.mulf %126, %125 : vector<8x64xf32>
    %131 = arith.addf %129, %130 : vector<8x64xf32>
    %132 = math.tanh %131 : vector<8x64xf32>
    %133 = arith.mulf %128, %132 : vector<8x64xf32>
    %134 = arith.truncf %133 : vector<8x64xf32> to vector<8x64xbf16>
    %cst_26 = arith.constant dense<0.000000e+00> : vector<8x256xf32>
    %135 = tpu.matmul %134, %36, %cst_26 {dimension_numbers = #tpu.dot_dimension_numbers<[1], [0], [0], [1], [0, 0, 1, 1], [], []>} : vector<8x64xbf16>, vector<64x256xbf16>, vector<8x256xf32> -> vector<8x256xf32>
    %136 = arith.addf %26, %135 : vector<8x256xf32>
    %137 = vector.extract_strided_slice %136 {offsets = [0, 0], sizes = [8, 192], strides = [1, 1]} : vector<8x256xf32> to vector<8x192xf32>
    %138 = arith.negf %137 : vector<8x192xf32>
    %139 = math.exp %138 : vector<8x192xf32>
    %cst_27 = arith.constant 1.000000e+00 : f32
    %140 = vector.broadcast %cst_27 : f32 to vector<8x192xf32>
    %141 = arith.addf %140, %139 : vector<8x192xf32>
    %142 = arith.divf %140, %141 : vector<8x192xf32>
    %143 = vector.extract_strided_slice %136 {offsets = [0, 192], sizes = [8, 64], strides = [1, 1]} : vector<8x256xf32> to vector<8x64xf32>
    %144 = math.tanh %143 : vector<8x64xf32>
    %145 = vector.extract_strided_slice %142 {offsets = [0, 0], sizes = [8, 64], strides = [1, 1]} : vector<8x192xf32> to vector<8x64xf32>
    %146 = vector.extract_strided_slice %142 {offsets = [0, 64], sizes = [8, 64], strides = [1, 1]} : vector<8x192xf32> to vector<8x64xf32>
    %147 = vector.extract_strided_slice %142 {offsets = [0, 128], sizes = [8, 64], strides = [1, 1]} : vector<8x192xf32> to vector<8x64xf32>
    %148 = arith.mulf %146, %131 : vector<8x64xf32>
    %149 = arith.mulf %145, %144 : vector<8x64xf32>
    %150 = arith.addf %148, %149 : vector<8x64xf32>
    %151 = math.tanh %150 : vector<8x64xf32>
    %152 = arith.mulf %147, %151 : vector<8x64xf32>
    %153 = arith.truncf %152 : vector<8x64xf32> to vector<8x64xbf16>
    %cst_28 = arith.constant dense<0.000000e+00> : vector<8x256xf32>
    %154 = tpu.matmul %153, %36, %cst_28 {dimension_numbers = #tpu.dot_dimension_numbers<[1], [0], [0], [1], [0, 0, 1, 1], [], []>} : vector<8x64xbf16>, vector<64x256xbf16>, vector<8x256xf32> -> vector<8x256xf32>
    %155 = arith.addf %30, %154 : vector<8x256xf32>
    %156 = vector.extract_strided_slice %155 {offsets = [0, 0], sizes = [8, 192], strides = [1, 1]} : vector<8x256xf32> to vector<8x192xf32>
    %157 = arith.negf %156 : vector<8x192xf32>
    %158 = math.exp %157 : vector<8x192xf32>
    %cst_29 = arith.constant 1.000000e+00 : f32
    %159 = vector.broadcast %cst_29 : f32 to vector<8x192xf32>
    %160 = arith.addf %159, %158 : vector<8x192xf32>
    %161 = arith.divf %159, %160 : vector<8x192xf32>
    %162 = vector.extract_strided_slice %155 {offsets = [0, 192], sizes = [8, 64], strides = [1, 1]} : vector<8x256xf32> to vector<8x64xf32>
    %163 = math.tanh %162 : vector<8x64xf32>
    %164 = vector.extract_strided_slice %161 {offsets = [0, 0], sizes = [8, 64], strides = [1, 1]} : vector<8x192xf32> to vector<8x64xf32>
    %165 = vector.extract_strided_slice %161 {offsets = [0, 64], sizes = [8, 64], strides = [1, 1]} : vector<8x192xf32> to vector<8x64xf32>
    %166 = vector.extract_strided_slice %161 {offsets = [0, 128], sizes = [8, 64], strides = [1, 1]} : vector<8x192xf32> to vector<8x64xf32>
    %167 = arith.mulf %165, %150 : vector<8x64xf32>
    %168 = arith.mulf %164, %163 : vector<8x64xf32>
    %169 = arith.addf %167, %168 : vector<8x64xf32>
    %170 = math.tanh %169 : vector<8x64xf32>
    %171 = arith.mulf %166, %170 : vector<8x64xf32>
    %172 = arith.truncf %171 : vector<8x64xf32> to vector<8x64xbf16>
    %cst_30 = arith.constant dense<0.000000e+00> : vector<8x256xf32>
    %173 = tpu.matmul %172, %36, %cst_30 {dimension_numbers = #tpu.dot_dimension_numbers<[1], [0], [0], [1], [0, 0, 1, 1], [], []>} : vector<8x64xbf16>, vector<64x256xbf16>, vector<8x256xf32> -> vector<8x256xf32>
    %174 = arith.addf %34, %173 : vector<8x256xf32>
    %175 = vector.extract_strided_slice %174 {offsets = [0, 0], sizes = [8, 192], strides = [1, 1]} : vector<8x256xf32> to vector<8x192xf32>
    %176 = arith.negf %175 : vector<8x192xf32>
    %177 = math.exp %176 : vector<8x192xf32>
    %cst_31 = arith.constant 1.000000e+00 : f32
    %178 = vector.broadcast %cst_31 : f32 to vector<8x192xf32>
    %179 = arith.addf %178, %177 : vector<8x192xf32>
    %180 = arith.divf %178, %179 : vector<8x192xf32>
    %181 = vector.extract_strided_slice %174 {offsets = [0, 192], sizes = [8, 64], strides = [1, 1]} : vector<8x256xf32> to vector<8x64xf32>
    %182 = math.tanh %181 : vector<8x64xf32>
    %183 = vector.extract_strided_slice %180 {offsets = [0, 0], sizes = [8, 64], strides = [1, 1]} : vector<8x192xf32> to vector<8x64xf32>
    %184 = vector.extract_strided_slice %180 {offsets = [0, 64], sizes = [8, 64], strides = [1, 1]} : vector<8x192xf32> to vector<8x64xf32>
    %185 = vector.extract_strided_slice %180 {offsets = [0, 128], sizes = [8, 64], strides = [1, 1]} : vector<8x192xf32> to vector<8x64xf32>
    %186 = arith.mulf %184, %169 : vector<8x64xf32>
    %187 = arith.mulf %183, %182 : vector<8x64xf32>
    %188 = arith.addf %186, %187 : vector<8x64xf32>
    %189 = math.tanh %188 : vector<8x64xf32>
    %190 = arith.mulf %185, %189 : vector<8x64xf32>
    %c0_32 = arith.constant 0 : index
    %c0_33 = arith.constant 0 : index
    %191 = vector.load %arg5[%c0_32, %c0_33] : memref<64x32xf32, #tpu.memory_space<vmem>>, vector<64x32xf32>
    %cst_34 = arith.constant dense<0.000000e+00> : vector<8x32xf32>
    %192 = tpu.matmul %190, %191, %cst_34 {dimension_numbers = #tpu.dot_dimension_numbers<[1], [0], [0], [1], [0, 0, 1, 1], [], []>} : vector<8x64xf32>, vector<64x32xf32>, vector<8x32xf32> -> vector<8x32xf32>
    %c0_35 = arith.constant 0 : index
    %c0_36 = arith.constant 0 : index
    %193 = vector.load %arg6[%c0_35, %c0_36] : memref<1x32xf32, #tpu.memory_space<vmem>>, vector<1x32xf32>
    %194 = vector.broadcast %193 : vector<1x32xf32> to vector<8x32xf32>
    %195 = arith.addf %192, %194 : vector<8x32xf32>
    %c0_37 = arith.constant 0 : index
    %c0_38 = arith.constant 0 : index
    %196 = vector.load %arg14[%c0_37, %c0_38] : memref<8x32xf32, #tpu.memory_space<vmem>>, vector<8x32xf32>
    tpu.vector_store %arg14[%c0_37, %c0_38], %195 {strides = array<i32>} : memref<8x32xf32, #tpu.memory_space<vmem>>, vector<8x32xf32>,
    %197 = vector.extract_strided_slice %195 {offsets = [0, 0], sizes = [8, 16], strides = [1, 1]} : vector<8x32xf32> to vector<8x16xf32>
    %198 = vector.extract_strided_slice %195 {offsets = [0, 16], sizes = [8, 16], strides = [1, 1]} : vector<8x32xf32> to vector<8x16xf32>
    %c0_39 = arith.constant 0 : index
    %c0_40 = arith.constant 0 : index
    %199 = vector.load %arg12[%c0_39, %c0_40] : memref<8x16xf32, #tpu.memory_space<vmem>>, vector<8x16xf32>
    %cst_41 = arith.constant 5.000000e-01 : f32
    %200 = vector.broadcast %cst_41 : f32 to vector<8x16xf32>
    %201 = arith.mulf %200, %198 : vector<8x16xf32>
    %202 = math.exp %201 : vector<8x16xf32>
    %203 = arith.mulf %199, %202 : vector<8x16xf32>
    %204 = arith.addf %197, %203 : vector<8x16xf32>
    %c0_42 = arith.constant 0 : index
    %c0_43 = arith.constant 0 : index
    %205 = vector.load %arg7[%c0_42, %c0_43] : memref<16x256xf32, #tpu.memory_space<vmem>>, vector<16x256xf32>
    %cst_44 = arith.constant dense<0.000000e+00> : vector<8x256xf32>
    %206 = tpu.matmul %204, %205, %cst_44 {dimension_numbers = #tpu.dot_dimension_numbers<[1], [0], [0], [1], [0, 0, 1, 1], [], []>} : vector<8x16xf32>, vector<16x256xf32>, vector<8x256xf32> -> vector<8x256xf32>
    %c0_45 = arith.constant 0 : index
    %c0_46 = arith.constant 0 : index
    %207 = vector.load %arg9[%c0_45, %c0_46] : memref<1x256xf32, #tpu.memory_space<vmem>>, vector<1x256xf32>
    %208 = vector.broadcast %207 : vector<1x256xf32> to vector<8x256xf32>
    %209 = arith.addf %206, %208 : vector<8x256xf32>
    %c0_47 = arith.constant 0 : index
    %c0_48 = arith.constant 0 : index
    %210 = vector.load %arg8[%c0_47, %c0_48] : memref<64x256xf32, #tpu.memory_space<vmem>>, vector<64x256xf32>
    %211 = arith.truncf %210 : vector<64x256xf32> to vector<64x256xbf16>
    %c0_49 = arith.constant 0 : index
    %c0_50 = arith.constant 0 : index
    %212 = vector.load %arg10[%c0_49, %c0_50] : memref<64x8xf32, #tpu.memory_space<vmem>>, vector<64x8xf32>
    %c0_51 = arith.constant 0 : index
    %c0_52 = arith.constant 0 : index
    %213 = vector.load %arg11[%c0_51, %c0_52] : memref<1x8xf32, #tpu.memory_space<vmem>>, vector<1x8xf32>
    %cst_53 = arith.constant 0.000000e+00 : f32
    %214 = vector.broadcast %cst_53 : f32 to vector<8x64xf32>
    %cst_54 = arith.constant 0.000000e+00 : f32
    %215 = vector.broadcast %cst_54 : f32 to vector<8x64xf32>
    %216 = arith.truncf %214 : vector<8x64xf32> to vector<8x64xbf16>
    %cst_55 = arith.constant dense<0.000000e+00> : vector<8x256xf32>
    %217 = tpu.matmul %216, %211, %cst_55 {dimension_numbers = #tpu.dot_dimension_numbers<[1], [0], [0], [1], [0, 0, 1, 1], [], []>} : vector<8x64xbf16>, vector<64x256xbf16>, vector<8x256xf32> -> vector<8x256xf32>
    %218 = arith.addf %209, %217 : vector<8x256xf32>
    %219 = vector.extract_strided_slice %218 {offsets = [0, 0], sizes = [8, 192], strides = [1, 1]} : vector<8x256xf32> to vector<8x192xf32>
    %220 = arith.negf %219 : vector<8x192xf32>
    %221 = math.exp %220 : vector<8x192xf32>
    %cst_56 = arith.constant 1.000000e+00 : f32
    %222 = vector.broadcast %cst_56 : f32 to vector<8x192xf32>
    %223 = arith.addf %222, %221 : vector<8x192xf32>
    %224 = arith.divf %222, %223 : vector<8x192xf32>
    %225 = vector.extract_strided_slice %218 {offsets = [0, 192], sizes = [8, 64], strides = [1, 1]} : vector<8x256xf32> to vector<8x64xf32>
    %226 = math.tanh %225 : vector<8x64xf32>
    %227 = vector.extract_strided_slice %224 {offsets = [0, 0], sizes = [8, 64], strides = [1, 1]} : vector<8x192xf32> to vector<8x64xf32>
    %228 = vector.extract_strided_slice %224 {offsets = [0, 64], sizes = [8, 64], strides = [1, 1]} : vector<8x192xf32> to vector<8x64xf32>
    %229 = vector.extract_strided_slice %224 {offsets = [0, 128], sizes = [8, 64], strides = [1, 1]} : vector<8x192xf32> to vector<8x64xf32>
    %230 = arith.mulf %228, %215 : vector<8x64xf32>
    %231 = arith.mulf %227, %226 : vector<8x64xf32>
    %232 = arith.addf %230, %231 : vector<8x64xf32>
    %233 = math.tanh %232 : vector<8x64xf32>
    %234 = arith.mulf %229, %233 : vector<8x64xf32>
    %cst_57 = arith.constant dense<0.000000e+00> : vector<8x8xf32>
    %235 = tpu.matmul %234, %212, %cst_57 {dimension_numbers = #tpu.dot_dimension_numbers<[1], [0], [0], [1], [0, 0, 1, 1], [], []>} : vector<8x64xf32>, vector<64x8xf32>, vector<8x8xf32> -> vector<8x8xf32>
    %236 = vector.broadcast %213 : vector<1x8xf32> to vector<8x8xf32>
    %237 = arith.addf %235, %236 : vector<8x8xf32>
    %238 = arith.truncf %234 : vector<8x64xf32> to vector<8x64xbf16>
    %cst_58 = arith.constant dense<0.000000e+00> : vector<8x256xf32>
    %239 = tpu.matmul %238, %211, %cst_58 {dimension_numbers = #tpu.dot_dimension_numbers<[1], [0], [0], [1], [0, 0, 1, 1], [], []>} : vector<8x64xbf16>, vector<64x256xbf16>, vector<8x256xf32> -> vector<8x256xf32>
    %240 = arith.addf %209, %239 : vector<8x256xf32>
    %241 = vector.extract_strided_slice %240 {offsets = [0, 0], sizes = [8, 192], strides = [1, 1]} : vector<8x256xf32> to vector<8x192xf32>
    %242 = arith.negf %241 : vector<8x192xf32>
    %243 = math.exp %242 : vector<8x192xf32>
    %cst_59 = arith.constant 1.000000e+00 : f32
    %244 = vector.broadcast %cst_59 : f32 to vector<8x192xf32>
    %245 = arith.addf %244, %243 : vector<8x192xf32>
    %246 = arith.divf %244, %245 : vector<8x192xf32>
    %247 = vector.extract_strided_slice %240 {offsets = [0, 192], sizes = [8, 64], strides = [1, 1]} : vector<8x256xf32> to vector<8x64xf32>
    %248 = math.tanh %247 : vector<8x64xf32>
    %249 = vector.extract_strided_slice %246 {offsets = [0, 0], sizes = [8, 64], strides = [1, 1]} : vector<8x192xf32> to vector<8x64xf32>
    %250 = vector.extract_strided_slice %246 {offsets = [0, 64], sizes = [8, 64], strides = [1, 1]} : vector<8x192xf32> to vector<8x64xf32>
    %251 = vector.extract_strided_slice %246 {offsets = [0, 128], sizes = [8, 64], strides = [1, 1]} : vector<8x192xf32> to vector<8x64xf32>
    %252 = arith.mulf %250, %232 : vector<8x64xf32>
    %253 = arith.mulf %249, %248 : vector<8x64xf32>
    %254 = arith.addf %252, %253 : vector<8x64xf32>
    %255 = math.tanh %254 : vector<8x64xf32>
    %256 = arith.mulf %251, %255 : vector<8x64xf32>
    %cst_60 = arith.constant dense<0.000000e+00> : vector<8x8xf32>
    %257 = tpu.matmul %256, %212, %cst_60 {dimension_numbers = #tpu.dot_dimension_numbers<[1], [0], [0], [1], [0, 0, 1, 1], [], []>} : vector<8x64xf32>, vector<64x8xf32>, vector<8x8xf32> -> vector<8x8xf32>
    %258 = vector.broadcast %213 : vector<1x8xf32> to vector<8x8xf32>
    %259 = arith.addf %257, %258 : vector<8x8xf32>
    %260 = arith.truncf %256 : vector<8x64xf32> to vector<8x64xbf16>
    %cst_61 = arith.constant dense<0.000000e+00> : vector<8x256xf32>
    %261 = tpu.matmul %260, %211, %cst_61 {dimension_numbers = #tpu.dot_dimension_numbers<[1], [0], [0], [1], [0, 0, 1, 1], [], []>} : vector<8x64xbf16>, vector<64x256xbf16>, vector<8x256xf32> -> vector<8x256xf32>
    %262 = arith.addf %209, %261 : vector<8x256xf32>
    %263 = vector.extract_strided_slice %262 {offsets = [0, 0], sizes = [8, 192], strides = [1, 1]} : vector<8x256xf32> to vector<8x192xf32>
    %264 = arith.negf %263 : vector<8x192xf32>
    %265 = math.exp %264 : vector<8x192xf32>
    %cst_62 = arith.constant 1.000000e+00 : f32
    %266 = vector.broadcast %cst_62 : f32 to vector<8x192xf32>
    %267 = arith.addf %266, %265 : vector<8x192xf32>
    %268 = arith.divf %266, %267 : vector<8x192xf32>
    %269 = vector.extract_strided_slice %262 {offsets = [0, 192], sizes = [8, 64], strides = [1, 1]} : vector<8x256xf32> to vector<8x64xf32>
    %270 = math.tanh %269 : vector<8x64xf32>
    %271 = vector.extract_strided_slice %268 {offsets = [0, 0], sizes = [8, 64], strides = [1, 1]} : vector<8x192xf32> to vector<8x64xf32>
    %272 = vector.extract_strided_slice %268 {offsets = [0, 64], sizes = [8, 64], strides = [1, 1]} : vector<8x192xf32> to vector<8x64xf32>
    %273 = vector.extract_strided_slice %268 {offsets = [0, 128], sizes = [8, 64], strides = [1, 1]} : vector<8x192xf32> to vector<8x64xf32>
    %274 = arith.mulf %272, %254 : vector<8x64xf32>
    %275 = arith.mulf %271, %270 : vector<8x64xf32>
    %276 = arith.addf %274, %275 : vector<8x64xf32>
    %277 = math.tanh %276 : vector<8x64xf32>
    %278 = arith.mulf %273, %277 : vector<8x64xf32>
    %cst_63 = arith.constant dense<0.000000e+00> : vector<8x8xf32>
    %279 = tpu.matmul %278, %212, %cst_63 {dimension_numbers = #tpu.dot_dimension_numbers<[1], [0], [0], [1], [0, 0, 1, 1], [], []>} : vector<8x64xf32>, vector<64x8xf32>, vector<8x8xf32> -> vector<8x8xf32>
    %280 = vector.broadcast %213 : vector<1x8xf32> to vector<8x8xf32>
    %281 = arith.addf %279, %280 : vector<8x8xf32>
    %282 = arith.truncf %278 : vector<8x64xf32> to vector<8x64xbf16>
    %cst_64 = arith.constant dense<0.000000e+00> : vector<8x256xf32>
    %283 = tpu.matmul %282, %211, %cst_64 {dimension_numbers = #tpu.dot_dimension_numbers<[1], [0], [0], [1], [0, 0, 1, 1], [], []>} : vector<8x64xbf16>, vector<64x256xbf16>, vector<8x256xf32> -> vector<8x256xf32>
    %284 = arith.addf %209, %283 : vector<8x256xf32>
    %285 = vector.extract_strided_slice %284 {offsets = [0, 0], sizes = [8, 192], strides = [1, 1]} : vector<8x256xf32> to vector<8x192xf32>
    %286 = arith.negf %285 : vector<8x192xf32>
    %287 = math.exp %286 : vector<8x192xf32>
    %cst_65 = arith.constant 1.000000e+00 : f32
    %288 = vector.broadcast %cst_65 : f32 to vector<8x192xf32>
    %289 = arith.addf %288, %287 : vector<8x192xf32>
    %290 = arith.divf %288, %289 : vector<8x192xf32>
    %291 = vector.extract_strided_slice %284 {offsets = [0, 192], sizes = [8, 64], strides = [1, 1]} : vector<8x256xf32> to vector<8x64xf32>
    %292 = math.tanh %291 : vector<8x64xf32>
    %293 = vector.extract_strided_slice %290 {offsets = [0, 0], sizes = [8, 64], strides = [1, 1]} : vector<8x192xf32> to vector<8x64xf32>
    %294 = vector.extract_strided_slice %290 {offsets = [0, 64], sizes = [8, 64], strides = [1, 1]} : vector<8x192xf32> to vector<8x64xf32>
    %295 = vector.extract_strided_slice %290 {offsets = [0, 128], sizes = [8, 64], strides = [1, 1]} : vector<8x192xf32> to vector<8x64xf32>
    %296 = arith.mulf %294, %276 : vector<8x64xf32>
    %297 = arith.mulf %293, %292 : vector<8x64xf32>
    %298 = arith.addf %296, %297 : vector<8x64xf32>
    %299 = math.tanh %298 : vector<8x64xf32>
    %300 = arith.mulf %295, %299 : vector<8x64xf32>
    %cst_66 = arith.constant dense<0.000000e+00> : vector<8x8xf32>
    %301 = tpu.matmul %300, %212, %cst_66 {dimension_numbers = #tpu.dot_dimension_numbers<[1], [0], [0], [1], [0, 0, 1, 1], [], []>} : vector<8x64xf32>, vector<64x8xf32>, vector<8x8xf32> -> vector<8x8xf32>
    %302 = vector.broadcast %213 : vector<1x8xf32> to vector<8x8xf32>
    %303 = arith.addf %301, %302 : vector<8x8xf32>
    %304 = arith.truncf %300 : vector<8x64xf32> to vector<8x64xbf16>
    %cst_67 = arith.constant dense<0.000000e+00> : vector<8x256xf32>
    %305 = tpu.matmul %304, %211, %cst_67 {dimension_numbers = #tpu.dot_dimension_numbers<[1], [0], [0], [1], [0, 0, 1, 1], [], []>} : vector<8x64xbf16>, vector<64x256xbf16>, vector<8x256xf32> -> vector<8x256xf32>
    %306 = arith.addf %209, %305 : vector<8x256xf32>
    %307 = vector.extract_strided_slice %306 {offsets = [0, 0], sizes = [8, 192], strides = [1, 1]} : vector<8x256xf32> to vector<8x192xf32>
    %308 = arith.negf %307 : vector<8x192xf32>
    %309 = math.exp %308 : vector<8x192xf32>
    %cst_68 = arith.constant 1.000000e+00 : f32
    %310 = vector.broadcast %cst_68 : f32 to vector<8x192xf32>
    %311 = arith.addf %310, %309 : vector<8x192xf32>
    %312 = arith.divf %310, %311 : vector<8x192xf32>
    %313 = vector.extract_strided_slice %306 {offsets = [0, 192], sizes = [8, 64], strides = [1, 1]} : vector<8x256xf32> to vector<8x64xf32>
    %314 = math.tanh %313 : vector<8x64xf32>
    %315 = vector.extract_strided_slice %312 {offsets = [0, 0], sizes = [8, 64], strides = [1, 1]} : vector<8x192xf32> to vector<8x64xf32>
    %316 = vector.extract_strided_slice %312 {offsets = [0, 64], sizes = [8, 64], strides = [1, 1]} : vector<8x192xf32> to vector<8x64xf32>
    %317 = vector.extract_strided_slice %312 {offsets = [0, 128], sizes = [8, 64], strides = [1, 1]} : vector<8x192xf32> to vector<8x64xf32>
    %318 = arith.mulf %316, %298 : vector<8x64xf32>
    %319 = arith.mulf %315, %314 : vector<8x64xf32>
    %320 = arith.addf %318, %319 : vector<8x64xf32>
    %321 = math.tanh %320 : vector<8x64xf32>
    %322 = arith.mulf %317, %321 : vector<8x64xf32>
    %cst_69 = arith.constant dense<0.000000e+00> : vector<8x8xf32>
    %323 = tpu.matmul %322, %212, %cst_69 {dimension_numbers = #tpu.dot_dimension_numbers<[1], [0], [0], [1], [0, 0, 1, 1], [], []>} : vector<8x64xf32>, vector<64x8xf32>, vector<8x8xf32> -> vector<8x8xf32>
    %324 = vector.broadcast %213 : vector<1x8xf32> to vector<8x8xf32>
    %325 = arith.addf %323, %324 : vector<8x8xf32>
    %326 = arith.truncf %322 : vector<8x64xf32> to vector<8x64xbf16>
    %cst_70 = arith.constant dense<0.000000e+00> : vector<8x256xf32>
    %327 = tpu.matmul %326, %211, %cst_70 {dimension_numbers = #tpu.dot_dimension_numbers<[1], [0], [0], [1], [0, 0, 1, 1], [], []>} : vector<8x64xbf16>, vector<64x256xbf16>, vector<8x256xf32> -> vector<8x256xf32>
    %328 = arith.addf %209, %327 : vector<8x256xf32>
    %329 = vector.extract_strided_slice %328 {offsets = [0, 0], sizes = [8, 192], strides = [1, 1]} : vector<8x256xf32> to vector<8x192xf32>
    %330 = arith.negf %329 : vector<8x192xf32>
    %331 = math.exp %330 : vector<8x192xf32>
    %cst_71 = arith.constant 1.000000e+00 : f32
    %332 = vector.broadcast %cst_71 : f32 to vector<8x192xf32>
    %333 = arith.addf %332, %331 : vector<8x192xf32>
    %334 = arith.divf %332, %333 : vector<8x192xf32>
    %335 = vector.extract_strided_slice %328 {offsets = [0, 192], sizes = [8, 64], strides = [1, 1]} : vector<8x256xf32> to vector<8x64xf32>
    %336 = math.tanh %335 : vector<8x64xf32>
    %337 = vector.extract_strided_slice %334 {offsets = [0, 0], sizes = [8, 64], strides = [1, 1]} : vector<8x192xf32> to vector<8x64xf32>
    %338 = vector.extract_strided_slice %334 {offsets = [0, 64], sizes = [8, 64], strides = [1, 1]} : vector<8x192xf32> to vector<8x64xf32>
    %339 = vector.extract_strided_slice %334 {offsets = [0, 128], sizes = [8, 64], strides = [1, 1]} : vector<8x192xf32> to vector<8x64xf32>
    %340 = arith.mulf %338, %320 : vector<8x64xf32>
    %341 = arith.mulf %337, %336 : vector<8x64xf32>
    %342 = arith.addf %340, %341 : vector<8x64xf32>
    %343 = math.tanh %342 : vector<8x64xf32>
    %344 = arith.mulf %339, %343 : vector<8x64xf32>
    %cst_72 = arith.constant dense<0.000000e+00> : vector<8x8xf32>
    %345 = tpu.matmul %344, %212, %cst_72 {dimension_numbers = #tpu.dot_dimension_numbers<[1], [0], [0], [1], [0, 0, 1, 1], [], []>} : vector<8x64xf32>, vector<64x8xf32>, vector<8x8xf32> -> vector<8x8xf32>
    %346 = vector.broadcast %213 : vector<1x8xf32> to vector<8x8xf32>
    %347 = arith.addf %345, %346 : vector<8x8xf32>
    %348 = arith.truncf %344 : vector<8x64xf32> to vector<8x64xbf16>
    %cst_73 = arith.constant dense<0.000000e+00> : vector<8x256xf32>
    %349 = tpu.matmul %348, %211, %cst_73 {dimension_numbers = #tpu.dot_dimension_numbers<[1], [0], [0], [1], [0, 0, 1, 1], [], []>} : vector<8x64xbf16>, vector<64x256xbf16>, vector<8x256xf32> -> vector<8x256xf32>
    %350 = arith.addf %209, %349 : vector<8x256xf32>
    %351 = vector.extract_strided_slice %350 {offsets = [0, 0], sizes = [8, 192], strides = [1, 1]} : vector<8x256xf32> to vector<8x192xf32>
    %352 = arith.negf %351 : vector<8x192xf32>
    %353 = math.exp %352 : vector<8x192xf32>
    %cst_74 = arith.constant 1.000000e+00 : f32
    %354 = vector.broadcast %cst_74 : f32 to vector<8x192xf32>
    %355 = arith.addf %354, %353 : vector<8x192xf32>
    %356 = arith.divf %354, %355 : vector<8x192xf32>
    %357 = vector.extract_strided_slice %350 {offsets = [0, 192], sizes = [8, 64], strides = [1, 1]} : vector<8x256xf32> to vector<8x64xf32>
    %358 = math.tanh %357 : vector<8x64xf32>
    %359 = vector.extract_strided_slice %356 {offsets = [0, 0], sizes = [8, 64], strides = [1, 1]} : vector<8x192xf32> to vector<8x64xf32>
    %360 = vector.extract_strided_slice %356 {offsets = [0, 64], sizes = [8, 64], strides = [1, 1]} : vector<8x192xf32> to vector<8x64xf32>
    %361 = vector.extract_strided_slice %356 {offsets = [0, 128], sizes = [8, 64], strides = [1, 1]} : vector<8x192xf32> to vector<8x64xf32>
    %362 = arith.mulf %360, %342 : vector<8x64xf32>
    %363 = arith.mulf %359, %358 : vector<8x64xf32>
    %364 = arith.addf %362, %363 : vector<8x64xf32>
    %365 = math.tanh %364 : vector<8x64xf32>
    %366 = arith.mulf %361, %365 : vector<8x64xf32>
    %cst_75 = arith.constant dense<0.000000e+00> : vector<8x8xf32>
    %367 = tpu.matmul %366, %212, %cst_75 {dimension_numbers = #tpu.dot_dimension_numbers<[1], [0], [0], [1], [0, 0, 1, 1], [], []>} : vector<8x64xf32>, vector<64x8xf32>, vector<8x8xf32> -> vector<8x8xf32>
    %368 = vector.broadcast %213 : vector<1x8xf32> to vector<8x8xf32>
    %369 = arith.addf %367, %368 : vector<8x8xf32>
    %370 = arith.truncf %366 : vector<8x64xf32> to vector<8x64xbf16>
    %cst_76 = arith.constant dense<0.000000e+00> : vector<8x256xf32>
    %371 = tpu.matmul %370, %211, %cst_76 {dimension_numbers = #tpu.dot_dimension_numbers<[1], [0], [0], [1], [0, 0, 1, 1], [], []>} : vector<8x64xbf16>, vector<64x256xbf16>, vector<8x256xf32> -> vector<8x256xf32>
    %372 = arith.addf %209, %371 : vector<8x256xf32>
    %373 = vector.extract_strided_slice %372 {offsets = [0, 0], sizes = [8, 192], strides = [1, 1]} : vector<8x256xf32> to vector<8x192xf32>
    %374 = arith.negf %373 : vector<8x192xf32>
    %375 = math.exp %374 : vector<8x192xf32>
    %cst_77 = arith.constant 1.000000e+00 : f32
    %376 = vector.broadcast %cst_77 : f32 to vector<8x192xf32>
    %377 = arith.addf %376, %375 : vector<8x192xf32>
    %378 = arith.divf %376, %377 : vector<8x192xf32>
    %379 = vector.extract_strided_slice %372 {offsets = [0, 192], sizes = [8, 64], strides = [1, 1]} : vector<8x256xf32> to vector<8x64xf32>
    %380 = math.tanh %379 : vector<8x64xf32>
    %381 = vector.extract_strided_slice %378 {offsets = [0, 0], sizes = [8, 64], strides = [1, 1]} : vector<8x192xf32> to vector<8x64xf32>
    %382 = vector.extract_strided_slice %378 {offsets = [0, 64], sizes = [8, 64], strides = [1, 1]} : vector<8x192xf32> to vector<8x64xf32>
    %383 = vector.extract_strided_slice %378 {offsets = [0, 128], sizes = [8, 64], strides = [1, 1]} : vector<8x192xf32> to vector<8x64xf32>
    %384 = arith.mulf %382, %364 : vector<8x64xf32>
    %385 = arith.mulf %381, %380 : vector<8x64xf32>
    %386 = arith.addf %384, %385 : vector<8x64xf32>
    %387 = math.tanh %386 : vector<8x64xf32>
    %388 = arith.mulf %383, %387 : vector<8x64xf32>
    %cst_78 = arith.constant dense<0.000000e+00> : vector<8x8xf32>
    %389 = tpu.matmul %388, %212, %cst_78 {dimension_numbers = #tpu.dot_dimension_numbers<[1], [0], [0], [1], [0, 0, 1, 1], [], []>} : vector<8x64xf32>, vector<64x8xf32>, vector<8x8xf32> -> vector<8x8xf32>
    %390 = vector.broadcast %213 : vector<1x8xf32> to vector<8x8xf32>
    %391 = arith.addf %389, %390 : vector<8x8xf32>
    %392 = arith.truncf %388 : vector<8x64xf32> to vector<8x64xbf16>
    %cst_79 = arith.constant dense<0.000000e+00> : vector<8x256xf32>
    %393 = tpu.matmul %392, %211, %cst_79 {dimension_numbers = #tpu.dot_dimension_numbers<[1], [0], [0], [1], [0, 0, 1, 1], [], []>} : vector<8x64xbf16>, vector<64x256xbf16>, vector<8x256xf32> -> vector<8x256xf32>
    %394 = arith.addf %209, %393 : vector<8x256xf32>
    %395 = vector.extract_strided_slice %394 {offsets = [0, 0], sizes = [8, 192], strides = [1, 1]} : vector<8x256xf32> to vector<8x192xf32>
    %396 = arith.negf %395 : vector<8x192xf32>
    %397 = math.exp %396 : vector<8x192xf32>
    %cst_80 = arith.constant 1.000000e+00 : f32
    %398 = vector.broadcast %cst_80 : f32 to vector<8x192xf32>
    %399 = arith.addf %398, %397 : vector<8x192xf32>
    %400 = arith.divf %398, %399 : vector<8x192xf32>
    %401 = vector.extract_strided_slice %394 {offsets = [0, 192], sizes = [8, 64], strides = [1, 1]} : vector<8x256xf32> to vector<8x64xf32>
    %402 = math.tanh %401 : vector<8x64xf32>
    %403 = vector.extract_strided_slice %400 {offsets = [0, 0], sizes = [8, 64], strides = [1, 1]} : vector<8x192xf32> to vector<8x64xf32>
    %404 = vector.extract_strided_slice %400 {offsets = [0, 64], sizes = [8, 64], strides = [1, 1]} : vector<8x192xf32> to vector<8x64xf32>
    %405 = vector.extract_strided_slice %400 {offsets = [0, 128], sizes = [8, 64], strides = [1, 1]} : vector<8x192xf32> to vector<8x64xf32>
    %406 = arith.mulf %404, %386 : vector<8x64xf32>
    %407 = arith.mulf %403, %402 : vector<8x64xf32>
    %408 = arith.addf %406, %407 : vector<8x64xf32>
    %409 = math.tanh %408 : vector<8x64xf32>
    %410 = arith.mulf %405, %409 : vector<8x64xf32>
    %cst_81 = arith.constant dense<0.000000e+00> : vector<8x8xf32>
    %411 = tpu.matmul %410, %212, %cst_81 {dimension_numbers = #tpu.dot_dimension_numbers<[1], [0], [0], [1], [0, 0, 1, 1], [], []>} : vector<8x64xf32>, vector<64x8xf32>, vector<8x8xf32> -> vector<8x8xf32>
    %412 = vector.broadcast %213 : vector<1x8xf32> to vector<8x8xf32>
    %413 = arith.addf %411, %412 : vector<8x8xf32>
    %414 = arith.truncf %410 : vector<8x64xf32> to vector<8x64xbf16>
    %cst_82 = arith.constant dense<0.000000e+00> : vector<8x256xf32>
    %415 = tpu.matmul %414, %211, %cst_82 {dimension_numbers = #tpu.dot_dimension_numbers<[1], [0], [0], [1], [0, 0, 1, 1], [], []>} : vector<8x64xbf16>, vector<64x256xbf16>, vector<8x256xf32> -> vector<8x256xf32>
    %416 = arith.addf %209, %415 : vector<8x256xf32>
    %417 = vector.extract_strided_slice %416 {offsets = [0, 0], sizes = [8, 192], strides = [1, 1]} : vector<8x256xf32> to vector<8x192xf32>
    %418 = arith.negf %417 : vector<8x192xf32>
    %419 = math.exp %418 : vector<8x192xf32>
    %cst_83 = arith.constant 1.000000e+00 : f32
    %420 = vector.broadcast %cst_83 : f32 to vector<8x192xf32>
    %421 = arith.addf %420, %419 : vector<8x192xf32>
    %422 = arith.divf %420, %421 : vector<8x192xf32>
    %423 = vector.extract_strided_slice %416 {offsets = [0, 192], sizes = [8, 64], strides = [1, 1]} : vector<8x256xf32> to vector<8x64xf32>
    %424 = math.tanh %423 : vector<8x64xf32>
    %425 = vector.extract_strided_slice %422 {offsets = [0, 0], sizes = [8, 64], strides = [1, 1]} : vector<8x192xf32> to vector<8x64xf32>
    %426 = vector.extract_strided_slice %422 {offsets = [0, 64], sizes = [8, 64], strides = [1, 1]} : vector<8x192xf32> to vector<8x64xf32>
    %427 = vector.extract_strided_slice %422 {offsets = [0, 128], sizes = [8, 64], strides = [1, 1]} : vector<8x192xf32> to vector<8x64xf32>
    %428 = arith.mulf %426, %408 : vector<8x64xf32>
    %429 = arith.mulf %425, %424 : vector<8x64xf32>
    %430 = arith.addf %428, %429 : vector<8x64xf32>
    %431 = math.tanh %430 : vector<8x64xf32>
    %432 = arith.mulf %427, %431 : vector<8x64xf32>
    %cst_84 = arith.constant dense<0.000000e+00> : vector<8x8xf32>
    %433 = tpu.matmul %432, %212, %cst_84 {dimension_numbers = #tpu.dot_dimension_numbers<[1], [0], [0], [1], [0, 0, 1, 1], [], []>} : vector<8x64xf32>, vector<64x8xf32>, vector<8x8xf32> -> vector<8x8xf32>
    %434 = vector.broadcast %213 : vector<1x8xf32> to vector<8x8xf32>
    %435 = arith.addf %433, %434 : vector<8x8xf32>
    %436 = arith.truncf %432 : vector<8x64xf32> to vector<8x64xbf16>
    %cst_85 = arith.constant dense<0.000000e+00> : vector<8x256xf32>
    %437 = tpu.matmul %436, %211, %cst_85 {dimension_numbers = #tpu.dot_dimension_numbers<[1], [0], [0], [1], [0, 0, 1, 1], [], []>} : vector<8x64xbf16>, vector<64x256xbf16>, vector<8x256xf32> -> vector<8x256xf32>
    %438 = arith.addf %209, %437 : vector<8x256xf32>
    %439 = vector.extract_strided_slice %438 {offsets = [0, 0], sizes = [8, 192], strides = [1, 1]} : vector<8x256xf32> to vector<8x192xf32>
    %440 = arith.negf %439 : vector<8x192xf32>
    %441 = math.exp %440 : vector<8x192xf32>
    %cst_86 = arith.constant 1.000000e+00 : f32
    %442 = vector.broadcast %cst_86 : f32 to vector<8x192xf32>
    %443 = arith.addf %442, %441 : vector<8x192xf32>
    %444 = arith.divf %442, %443 : vector<8x192xf32>
    %445 = vector.extract_strided_slice %438 {offsets = [0, 192], sizes = [8, 64], strides = [1, 1]} : vector<8x256xf32> to vector<8x64xf32>
    %446 = math.tanh %445 : vector<8x64xf32>
    %447 = vector.extract_strided_slice %444 {offsets = [0, 0], sizes = [8, 64], strides = [1, 1]} : vector<8x192xf32> to vector<8x64xf32>
    %448 = vector.extract_strided_slice %444 {offsets = [0, 64], sizes = [8, 64], strides = [1, 1]} : vector<8x192xf32> to vector<8x64xf32>
    %449 = vector.extract_strided_slice %444 {offsets = [0, 128], sizes = [8, 64], strides = [1, 1]} : vector<8x192xf32> to vector<8x64xf32>
    %450 = arith.mulf %448, %430 : vector<8x64xf32>
    %451 = arith.mulf %447, %446 : vector<8x64xf32>
    %452 = arith.addf %450, %451 : vector<8x64xf32>
    %453 = math.tanh %452 : vector<8x64xf32>
    %454 = arith.mulf %449, %453 : vector<8x64xf32>
    %cst_87 = arith.constant dense<0.000000e+00> : vector<8x8xf32>
    %455 = tpu.matmul %454, %212, %cst_87 {dimension_numbers = #tpu.dot_dimension_numbers<[1], [0], [0], [1], [0, 0, 1, 1], [], []>} : vector<8x64xf32>, vector<64x8xf32>, vector<8x8xf32> -> vector<8x8xf32>
    %456 = vector.broadcast %213 : vector<1x8xf32> to vector<8x8xf32>
    %457 = arith.addf %455, %456 : vector<8x8xf32>
    %458 = arith.truncf %454 : vector<8x64xf32> to vector<8x64xbf16>
    %cst_88 = arith.constant dense<0.000000e+00> : vector<8x256xf32>
    %459 = tpu.matmul %458, %211, %cst_88 {dimension_numbers = #tpu.dot_dimension_numbers<[1], [0], [0], [1], [0, 0, 1, 1], [], []>} : vector<8x64xbf16>, vector<64x256xbf16>, vector<8x256xf32> -> vector<8x256xf32>
    %460 = arith.addf %209, %459 : vector<8x256xf32>
    %461 = vector.extract_strided_slice %460 {offsets = [0, 0], sizes = [8, 192], strides = [1, 1]} : vector<8x256xf32> to vector<8x192xf32>
    %462 = arith.negf %461 : vector<8x192xf32>
    %463 = math.exp %462 : vector<8x192xf32>
    %cst_89 = arith.constant 1.000000e+00 : f32
    %464 = vector.broadcast %cst_89 : f32 to vector<8x192xf32>
    %465 = arith.addf %464, %463 : vector<8x192xf32>
    %466 = arith.divf %464, %465 : vector<8x192xf32>
    %467 = vector.extract_strided_slice %460 {offsets = [0, 192], sizes = [8, 64], strides = [1, 1]} : vector<8x256xf32> to vector<8x64xf32>
    %468 = math.tanh %467 : vector<8x64xf32>
    %469 = vector.extract_strided_slice %466 {offsets = [0, 0], sizes = [8, 64], strides = [1, 1]} : vector<8x192xf32> to vector<8x64xf32>
    %470 = vector.extract_strided_slice %466 {offsets = [0, 64], sizes = [8, 64], strides = [1, 1]} : vector<8x192xf32> to vector<8x64xf32>
    %471 = vector.extract_strided_slice %466 {offsets = [0, 128], sizes = [8, 64], strides = [1, 1]} : vector<8x192xf32> to vector<8x64xf32>
    %472 = arith.mulf %470, %452 : vector<8x64xf32>
    %473 = arith.mulf %469, %468 : vector<8x64xf32>
    %474 = arith.addf %472, %473 : vector<8x64xf32>
    %475 = math.tanh %474 : vector<8x64xf32>
    %476 = arith.mulf %471, %475 : vector<8x64xf32>
    %cst_90 = arith.constant dense<0.000000e+00> : vector<8x8xf32>
    %477 = tpu.matmul %476, %212, %cst_90 {dimension_numbers = #tpu.dot_dimension_numbers<[1], [0], [0], [1], [0, 0, 1, 1], [], []>} : vector<8x64xf32>, vector<64x8xf32>, vector<8x8xf32> -> vector<8x8xf32>
    %478 = vector.broadcast %213 : vector<1x8xf32> to vector<8x8xf32>
    %479 = arith.addf %477, %478 : vector<8x8xf32>
    %480 = arith.truncf %476 : vector<8x64xf32> to vector<8x64xbf16>
    %cst_91 = arith.constant dense<0.000000e+00> : vector<8x256xf32>
    %481 = tpu.matmul %480, %211, %cst_91 {dimension_numbers = #tpu.dot_dimension_numbers<[1], [0], [0], [1], [0, 0, 1, 1], [], []>} : vector<8x64xbf16>, vector<64x256xbf16>, vector<8x256xf32> -> vector<8x256xf32>
    %482 = arith.addf %209, %481 : vector<8x256xf32>
    %483 = vector.extract_strided_slice %482 {offsets = [0, 0], sizes = [8, 192], strides = [1, 1]} : vector<8x256xf32> to vector<8x192xf32>
    %484 = arith.negf %483 : vector<8x192xf32>
    %485 = math.exp %484 : vector<8x192xf32>
    %cst_92 = arith.constant 1.000000e+00 : f32
    %486 = vector.broadcast %cst_92 : f32 to vector<8x192xf32>
    %487 = arith.addf %486, %485 : vector<8x192xf32>
    %488 = arith.divf %486, %487 : vector<8x192xf32>
    %489 = vector.extract_strided_slice %482 {offsets = [0, 192], sizes = [8, 64], strides = [1, 1]} : vector<8x256xf32> to vector<8x64xf32>
    %490 = math.tanh %489 : vector<8x64xf32>
    %491 = vector.extract_strided_slice %488 {offsets = [0, 0], sizes = [8, 64], strides = [1, 1]} : vector<8x192xf32> to vector<8x64xf32>
    %492 = vector.extract_strided_slice %488 {offsets = [0, 64], sizes = [8, 64], strides = [1, 1]} : vector<8x192xf32> to vector<8x64xf32>
    %493 = vector.extract_strided_slice %488 {offsets = [0, 128], sizes = [8, 64], strides = [1, 1]} : vector<8x192xf32> to vector<8x64xf32>
    %494 = arith.mulf %492, %474 : vector<8x64xf32>
    %495 = arith.mulf %491, %490 : vector<8x64xf32>
    %496 = arith.addf %494, %495 : vector<8x64xf32>
    %497 = math.tanh %496 : vector<8x64xf32>
    %498 = arith.mulf %493, %497 : vector<8x64xf32>
    %cst_93 = arith.constant dense<0.000000e+00> : vector<8x8xf32>
    %499 = tpu.matmul %498, %212, %cst_93 {dimension_numbers = #tpu.dot_dimension_numbers<[1], [0], [0], [1], [0, 0, 1, 1], [], []>} : vector<8x64xf32>, vector<64x8xf32>, vector<8x8xf32> -> vector<8x8xf32>
    %500 = vector.broadcast %213 : vector<1x8xf32> to vector<8x8xf32>
    %501 = arith.addf %499, %500 : vector<8x8xf32>
    %502 = arith.truncf %498 : vector<8x64xf32> to vector<8x64xbf16>
    %cst_94 = arith.constant dense<0.000000e+00> : vector<8x256xf32>
    %503 = tpu.matmul %502, %211, %cst_94 {dimension_numbers = #tpu.dot_dimension_numbers<[1], [0], [0], [1], [0, 0, 1, 1], [], []>} : vector<8x64xbf16>, vector<64x256xbf16>, vector<8x256xf32> -> vector<8x256xf32>
    %504 = arith.addf %209, %503 : vector<8x256xf32>
    %505 = vector.extract_strided_slice %504 {offsets = [0, 0], sizes = [8, 192], strides = [1, 1]} : vector<8x256xf32> to vector<8x192xf32>
    %506 = arith.negf %505 : vector<8x192xf32>
    %507 = math.exp %506 : vector<8x192xf32>
    %cst_95 = arith.constant 1.000000e+00 : f32
    %508 = vector.broadcast %cst_95 : f32 to vector<8x192xf32>
    %509 = arith.addf %508, %507 : vector<8x192xf32>
    %510 = arith.divf %508, %509 : vector<8x192xf32>
    %511 = vector.extract_strided_slice %504 {offsets = [0, 192], sizes = [8, 64], strides = [1, 1]} : vector<8x256xf32> to vector<8x64xf32>
    %512 = math.tanh %511 : vector<8x64xf32>
    %513 = vector.extract_strided_slice %510 {offsets = [0, 0], sizes = [8, 64], strides = [1, 1]} : vector<8x192xf32> to vector<8x64xf32>
    %514 = vector.extract_strided_slice %510 {offsets = [0, 64], sizes = [8, 64], strides = [1, 1]} : vector<8x192xf32> to vector<8x64xf32>
    %515 = vector.extract_strided_slice %510 {offsets = [0, 128], sizes = [8, 64], strides = [1, 1]} : vector<8x192xf32> to vector<8x64xf32>
    %516 = arith.mulf %514, %496 : vector<8x64xf32>
    %517 = arith.mulf %513, %512 : vector<8x64xf32>
    %518 = arith.addf %516, %517 : vector<8x64xf32>
    %519 = math.tanh %518 : vector<8x64xf32>
    %520 = arith.mulf %515, %519 : vector<8x64xf32>
    %cst_96 = arith.constant dense<0.000000e+00> : vector<8x8xf32>
    %521 = tpu.matmul %520, %212, %cst_96 {dimension_numbers = #tpu.dot_dimension_numbers<[1], [0], [0], [1], [0, 0, 1, 1], [], []>} : vector<8x64xf32>, vector<64x8xf32>, vector<8x8xf32> -> vector<8x8xf32>
    %522 = vector.broadcast %213 : vector<1x8xf32> to vector<8x8xf32>
    %523 = arith.addf %521, %522 : vector<8x8xf32>
    %524 = arith.truncf %520 : vector<8x64xf32> to vector<8x64xbf16>
    %cst_97 = arith.constant dense<0.000000e+00> : vector<8x256xf32>
    %525 = tpu.matmul %524, %211, %cst_97 {dimension_numbers = #tpu.dot_dimension_numbers<[1], [0], [0], [1], [0, 0, 1, 1], [], []>} : vector<8x64xbf16>, vector<64x256xbf16>, vector<8x256xf32> -> vector<8x256xf32>
    %526 = arith.addf %209, %525 : vector<8x256xf32>
    %527 = vector.extract_strided_slice %526 {offsets = [0, 0], sizes = [8, 192], strides = [1, 1]} : vector<8x256xf32> to vector<8x192xf32>
    %528 = arith.negf %527 : vector<8x192xf32>
    %529 = math.exp %528 : vector<8x192xf32>
    %cst_98 = arith.constant 1.000000e+00 : f32
    %530 = vector.broadcast %cst_98 : f32 to vector<8x192xf32>
    %531 = arith.addf %530, %529 : vector<8x192xf32>
    %532 = arith.divf %530, %531 : vector<8x192xf32>
    %533 = vector.extract_strided_slice %526 {offsets = [0, 192], sizes = [8, 64], strides = [1, 1]} : vector<8x256xf32> to vector<8x64xf32>
    %534 = math.tanh %533 : vector<8x64xf32>
    %535 = vector.extract_strided_slice %532 {offsets = [0, 0], sizes = [8, 64], strides = [1, 1]} : vector<8x192xf32> to vector<8x64xf32>
    %536 = vector.extract_strided_slice %532 {offsets = [0, 64], sizes = [8, 64], strides = [1, 1]} : vector<8x192xf32> to vector<8x64xf32>
    %537 = vector.extract_strided_slice %532 {offsets = [0, 128], sizes = [8, 64], strides = [1, 1]} : vector<8x192xf32> to vector<8x64xf32>
    %538 = arith.mulf %536, %518 : vector<8x64xf32>
    %539 = arith.mulf %535, %534 : vector<8x64xf32>
    %540 = arith.addf %538, %539 : vector<8x64xf32>
    %541 = math.tanh %540 : vector<8x64xf32>
    %542 = arith.mulf %537, %541 : vector<8x64xf32>
    %cst_99 = arith.constant dense<0.000000e+00> : vector<8x8xf32>
    %543 = tpu.matmul %542, %212, %cst_99 {dimension_numbers = #tpu.dot_dimension_numbers<[1], [0], [0], [1], [0, 0, 1, 1], [], []>} : vector<8x64xf32>, vector<64x8xf32>, vector<8x8xf32> -> vector<8x8xf32>
    %544 = vector.broadcast %213 : vector<1x8xf32> to vector<8x8xf32>
    %545 = arith.addf %543, %544 : vector<8x8xf32>
    %546 = tpu.concatenate %237, %259, %281, %303, %325, %347, %369, %391, %413, %435, %457, %479, %501, %523, %545 in 1 : vector<8x8xf32>, vector<8x8xf32>, vector<8x8xf32>, vector<8x8xf32>, vector<8x8xf32>, vector<8x8xf32>, vector<8x8xf32>, vector<8x8xf32>, vector<8x8xf32>, vector<8x8xf32>, vector<8x8xf32>, vector<8x8xf32>, vector<8x8xf32>, vector<8x8xf32>, vector<8x8xf32> -> vector<8x120xf32>
    %c0_100 = arith.constant 0 : index
    %c0_101 = arith.constant 0 : index
    %547 = vector.load %arg13[%c0_100, %c0_101] : memref<8x120xf32, #tpu.memory_space<vmem>>, vector<8x120xf32>
    tpu.vector_store %arg13[%c0_100, %c0_101], %546 {strides = array<i32>} : memref<8x120xf32, #tpu.memory_space<vmem>>, vector<8x120xf32>,
    return
  }
  func.func @transform_0(%arg0: i32) -> (i32, i32) {
    %c0_i32 = arith.constant 0 : i32
    %c0_i32_0 = arith.constant 0 : i32
    %c0_i32_1 = arith.constant 0 : i32
    return %c0_i32, %c0_i32_0 : i32, i32
  }
  func.func @transform_1(%arg0: i32) -> (i32, i32) {
    %c0_i32 = arith.constant 0 : i32
    %c0_i32_0 = arith.constant 0 : i32
    %c0_i32_1 = arith.constant 0 : i32
    return %c0_i32, %c0_i32_0 : i32, i32
  }
  func.func @transform_2(%arg0: i32) -> (i32, i32) {
    %c0_i32 = arith.constant 0 : i32
    %c0_i32_0 = arith.constant 0 : i32
    %c0_i32_1 = arith.constant 0 : i32
    return %c0_i32, %c0_i32_0 : i32, i32
  }
  func.func @transform_3(%arg0: i32) -> (i32, i32) {
    %c0_i32 = arith.constant 0 : i32
    %c0_i32_0 = arith.constant 0 : i32
    %c0_i32_1 = arith.constant 0 : i32
    return %c0_i32, %c0_i32_0 : i32, i32
  }
  func.func @transform_4(%arg0: i32) -> (i32, i32) {
    %c0_i32 = arith.constant 0 : i32
    %c0_i32_0 = arith.constant 0 : i32
    %c0_i32_1 = arith.constant 0 : i32
    return %c0_i32, %c0_i32_0 : i32, i32
  }
  func.func @transform_5(%arg0: i32) -> (i32, i32) {
    %c0_i32 = arith.constant 0 : i32
    %c0_i32_0 = arith.constant 0 : i32
    %c0_i32_1 = arith.constant 0 : i32
    return %c0_i32, %c0_i32_0 : i32, i32
  }
  func.func @transform_6(%arg0: i32) -> (i32, i32) {
    %c0_i32 = arith.constant 0 : i32
    %c0_i32_0 = arith.constant 0 : i32
    %c0_i32_1 = arith.constant 0 : i32
    return %c0_i32, %c0_i32_0 : i32, i32
  }
  func.func @transform_7(%arg0: i32) -> (i32, i32) {
    %c0_i32 = arith.constant 0 : i32
    %c0_i32_0 = arith.constant 0 : i32
    %c0_i32_1 = arith.constant 0 : i32
    return %c0_i32, %c0_i32_0 : i32, i32
  }
  func.func @transform_8(%arg0: i32) -> (i32, i32) {
    %c0_i32 = arith.constant 0 : i32
    %c0_i32_0 = arith.constant 0 : i32
    %c0_i32_1 = arith.constant 0 : i32
    return %c0_i32, %c0_i32_0 : i32, i32
  }
  func.func @transform_9(%arg0: i32) -> (i32, i32) {
    %c0_i32 = arith.constant 0 : i32
    %c0_i32_0 = arith.constant 0 : i32
    %c0_i32_1 = arith.constant 0 : i32
    return %c0_i32, %c0_i32_0 : i32, i32
  }
  func.func @transform_10(%arg0: i32) -> (i32, i32) {
    %c0_i32 = arith.constant 0 : i32
    %c0_i32_0 = arith.constant 0 : i32
    %c0_i32_1 = arith.constant 0 : i32
    return %c0_i32, %c0_i32_0 : i32, i32
  }
  func.func @transform_11(%arg0: i32) -> (i32, i32) {
    %c0_i32 = arith.constant 0 : i32
    %c0_i32_0 = arith.constant 0 : i32
    %c0_i32_1 = arith.constant 0 : i32
    return %c0_i32, %c0_i32_0 : i32, i32
  }
  func.func @transform_12(%arg0: i32) -> (i32, i32) {
    %c0_i32 = arith.constant 0 : i32
    %c0_i32_0 = arith.constant 0 : i32
    %c0_i32_1 = arith.constant 0 : i32
    return %c0_i32, %c0_i32_0 : i32, i32
  }
  func.func @transform_13(%arg0: i32) -> (i32, i32) {
    %c0_i32 = arith.constant 0 : i32
    %c0_i32_0 = arith.constant 0 : i32
    %c0_i32_1 = arith.constant 0 : i32
    return %c0_i32, %c0_i32_0 : i32, i32
  }
}

</mosaic_0001>

<bundles_post_ra>
// kernel: lstm_ae_forward.1
= control target key start
LH: loop header
LB: loop body
LE: loop exit
PB: predicated region body
PF: predicated region fallthrough
CT: control target
= control target key end

     0   :  { %19 = vsyncpa [#allocation3], 0  ;;  %s5994_s0 = inlined_call_operand.vmem [shape: f32[8,64], index: 0, kind: input, shape index: {}]   ;;  %s5995_s1 = inlined_call_operand.vmem [shape: f32[8,256], index: 1, kind: input, shape index: {}]   ;;  %s5996_s2 = inlined_call_operand.vmem [shape: f32[64,256], index: 2, kind: input, shape index: {}]   ;;  %s5997_s3 = inlined_call_operand.vmem [shape: f32[1,256], index: 3, kind: input, shape index: {}]   ;;  %s5998_s4 = inlined_call_operand.vmem [shape: f32[64,32], index: 4, kind: input, shape index: {}]   ;;  %s5999_s5 = inlined_call_operand.vmem [shape: f32[1,32], index: 5, kind: input, shape index: {}]   ;;  %s6000_s6 = inlined_call_operand.vmem [shape: f32[16,256], index: 6, kind: input, shape index: {}]   ;;  %s6001_s7 = inlined_call_operand.vmem [shape: f32[64,256], index: 7, kind: input, shape index: {}]   ;;  %s6002_s8 = inlined_call_operand.hbm [shape: f32[1,256], index: 8, kind: input, shape index: {}]   ;;  %s6003_s9 = inlined_call_operand.vmem [shape: f32[64,8], index: 9, kind: input, shape index: {}]   ;;  %s6004_s10 = inlined_call_operand.hbm [shape: f32[1,8], index: 10, kind: input, shape index: {}]   ;;  %s6005_s11 = inlined_call_operand.vmem [shape: f32[8,16], index: 11, kind: input, shape index: {}]   ;;  %s6006_s12 = inlined_call_operand.vmem [shape: f32[8,120], index: 12, kind: output, shape index: {0}]   ;;  %s6007_s13 = inlined_call_operand.vmem [shape: f32[8,32], index: 13, kind: output, shape index: {1}]  }
   0x1   :  { %20 = vsyncpa [#allocation5], 0  ;;  %s4976_s25 = smov [#allocation2]   ;;  %s4977_s27 = smov [#allocation4]  }
   0x2   :  { %s43_s26 = sshll.u32 %s4976_s25, 4  ;;  %s55_s28 = sshll.u32 %s4977_s27, 4  ;;  %s44_s26 = int_to_ptr.vmem [resolvable:$true] %s43_s26  ;;  %s56_s28 = int_to_ptr.vmem [resolvable:$true] %s55_s28 }
   0x3   :  { %s4928_s14 = scalar_lea.hbm %s6002_s8, 32 }
   0x4   :  { %p4929_p0 = scmp.ne.s32.totalorder %s6002_s8, %s4928_s14  ;;  %p4932_p1 = scmp.lt.u32.totalorder %s4928_s14, %s6002_s8 }
   0x6   :  { %p4934_p2 = pnand %p4932_p1, %p4929_p0 }
   0x8   :  { %4937 = shalt.err (!%p4934_p2)
}
   0x9   :  { %s4938_s19 = scalar_lea.vmem %s44_s26, 32  ;;  %p4943_p4 = scmp.lt.s32.totalorder %s44_s26, %s44_s26 }
   0xa   :  { %p4939_p3 = scmp.ne.s32.totalorder %s44_s26, %s4938_s19  ;;  %p4944_p5 = scmp.lt.s32.totalorder %s4938_s19, %s4938_s19 }
   0xc   :  { %p4945_p6 = por %p4944_p5, %p4943_p4 }
   0xe   :  { %p4946_p7 = pnand %p4945_p6, %p4939_p3 }
  0x10   :  { %4949 = shalt.err (!%p4946_p7)
}
  0x11   :  { %46 = dma.hbm_to_vmem [thread:$0]  %s6002_s8, 32, %s44_s26, [#allocation3]  }
  0x12   :  { %s4950_s24 = scalar_lea.hbm %s6004_s10, 16 }
  0x13   :  { %p4951_p8 = scmp.ne.s32.totalorder %s6004_s10, %s4950_s24  ;;  %p4954_p9 = scmp.lt.u32.totalorder %s4950_s24, %s6004_s10 }
  0x15   :  { %p4956_p10 = pnand %p4954_p9, %p4951_p8 }
  0x17   :  { %4959 = shalt.err (!%p4956_p10)
}
  0x18   :  { %s4960_s14 = scalar_lea.vmem %s56_s28, 16  ;;  %s4964_s15 = scalar_lea.vmem %s56_s28, 32 }
  0x19   :  { %p4961_p11 = scmp.ne.s32.totalorder %s56_s28, %s4960_s14  ;;  %p4965_p12 = scmp.lt.s32.totalorder %s56_s28, %s56_s28 }
  0x1a   :  { %p4966_p13 = scmp.lt.s32.totalorder %s4964_s15, %s4960_s14 }
  0x1c   :  { %p4967_p0 = por %p4966_p13, %p4965_p12 }
  0x1e   :  { %p4968_p1 = pnand %p4967_p0, %p4961_p11 }
  0x20   :  { %4971 = shalt.err (!%p4968_p1)
}
  0x21   :  { %58 = dma.hbm_to_vmem [thread:$0]  %s6004_s10, 16, %s56_s28, [#allocation5]  }
  0x22   :  { %4972 = dma.done.wait [#allocation3], 32  }
  0x23   :  { %4973 = vsyncadd [#allocation3], 4294967264 }
  0x24   :  { %4974 = dma.done.wait [#allocation5], 16  }
  0x25   :  { %4975 = vsyncadd [#allocation5], 4294967280  ;;  %v4978_v0 = vmov 0.0   ;;  %v5096_v1 = vld [vmem:[%s5994_s0] sm:$0xff]  ;;  %v5101_v2 = vld [vmem:[%s5995_s1 + $0x8] sm:$0xff]  ;;  %s4979_s20 = smov 112   ;;  %v73_v38 = vlaneseq }
  0x26   :  { %151 = vmatprep.mubr.f32.mxu0 %v4978_v0  ;;  %226 = vmatprep.mubr.f32.mxu1 %v4978_v0  ;;  %v5106_v3 = vld [vmem:[%s5995_s1] sm:$0xff]  ;;  %s4980_s21 = smov 80   ;;  %vm83_vm0 = vcmask 64512   ;;  %s4981_s0 = smov 96   ;;  %v684_v5 = vld [vmem:[%s5996_s2 + $0x8] sm:$0xff]  ;;  %v686_v6 = vld [vmem:[%s5996_s2 + $0x18] sm:$0xff] }
  0x27   :  { %233 = vrot.lane.b32.xlu0 %v5096_v1, %s4979_s20  ;;  %533 = vrot.lane.b32.xlu1 %v5096_v1, %s4980_s21  ;;  %v5135_v7 = vpack.c.bf16 %v686_v6, %v684_v5  ;;  %v683_v8 = vld [vmem:[%s5996_s2] sm:$0xff]  ;;  %v685_v9 = vld [vmem:[%s5996_s2 + $0x10] sm:$0xff]  ;;  %v4982_v21 = vmov 0   ;;  %v5229_v41 = vshrl.u32 %v73_v38, 7  ;;  %s4984_s19 = smov 120   ;;  %s4985_s10 = smov 88  }
  0x28   :  { %87 = vmatprep.subr.mxu0 %v5101_v2  ;;  %162 = vmatprep.subr.mxu1 %v5101_v2  ;;  %v688_v11 = vld [vmem:[%s5996_s2 + $0x28] sm:$0xff]  ;;  %v690_v12 = vld [vmem:[%s5996_s2 + $0x38] sm:$0xff]  ;;  %v5152_v14 = vpack.c.bf16 %v685_v9, %v683_v8  ;;  %v687_v16 = vld [vmem:[%s5996_s2 + $0x20] sm:$0xff]  ;;  %s4986_s28 = smov 104   ;;  %s4987_s1 = smov 72   ;;  %vm707_vm1 = vcmask 523264  }
  0x29   :  { %88 = vmatpush1.msra.mxu0 %v5106_v3  ;;  %163 = vmatpush1.msra.mxu1 %v5106_v3  ;;  %v5155_v15 = vpack.c.bf16 %v690_v12, %v688_v11  ;;  %v689_v17 = vld [vmem:[%s5996_s2 + $0x30] sm:$0xff]  ;;  %v692_v18 = vld [vmem:[%s5996_s2 + $0x48] sm:$0xff]  ;;  %v694_v19 = vld [vmem:[%s5996_s2 + $0x58] sm:$0xff]  ;;  %v75_v42 = vsub.s32 0, %v5229_v41  ;;  %v79_v44 = vsub.s32 1, %v5229_v41  ;;  %vm4989_vm2 = vmmov 0  }
  0x2a   :  { %3891 = vmatmul.mubr.msk.f32.vlgmr.msra.gmra.mrb[0].mxu0 %vm83_vm0, %v5096_v1  ;;  %237 = vmatprep.subr.mxu0 %v5101_v2  ;;  %v5171_v20 = vpack.c.bf16 %v689_v17, %v687_v16  ;;  %v5175_v22 = vpack.c.bf16 %v694_v19, %v692_v18  ;;  %v691_v23 = vld [vmem:[%s5996_s2 + $0x40] sm:$0xff]  ;;  %v693_v24 = vld [vmem:[%s5996_s2 + $0x50] sm:$0xff]  ;;  %v696_v25 = vld [vmem:[%s5996_s2 + $0x68] sm:$0xff]  ;;  %vm1411_vm3 = vcmask 261120   ;;  %vm1439_vm4 = vcmask 130048   ;;  %s4993_s22 = smov 56  }
  0x2b   :  { %383 = vrot.lane.b32.xlu0 %v5096_v1, %s4981_s0  ;;  %238 = vmatpush1.msra.mxu0 %v5106_v3  ;;  %v698_v26 = vld [vmem:[%s5996_s2 + $0x78] sm:$0xff]  ;;  %v5190_v27 = vpack.c.bf16 %v693_v24, %v691_v23  ;;  %v695_v29 = vld [vmem:[%s5996_s2 + $0x60] sm:$0xff]  ;;  %v697_v30 = vld [vmem:[%s5996_s2 + $0x70] sm:$0xff]  ;;  %s4994_s23 = smov 16   ;;  %vm3857_vm5 = vcmask 195584   ;;  %vm3860_vm6 = vcmask 326656  }
  0x2c   :  { %301 = vmatprep.mubr.f32.mxu0 %v4978_v0  ;;  %387 = vmatprep.subr.mxu0 %v5101_v2  ;;  %v5193_v28 = vpack.c.bf16 %v698_v26, %v696_v25  ;;  %v5202_v31 = vpack.c.bf16 %v697_v30, %v695_v29  ;;  %v71_v43 = vld [vmem:[%s5997_s3] sm:$0x3]  ;;  %s4983_s3 = smov 64   ;;  %v1539_v41 = vld [vmem:[%s6003_s9 + $0x8] sm:$0xff]  ;;  %vm3862_vm7 = vcmask 392192   ;;  %vm3864_vm8 = vcmask 457728  }
  0x2d   :  { %312 = vmatprep.subr.mxu1 %v5101_v2  ;;  %v5238_v45 = vrot.slane %v71_v43, %v75_v42  ;;  %v5242_v46 = vrot.slane %v71_v43, %v79_v44  ;;  %vm3867_vm9 = vcmask 588800   ;;  %vm3869_vm10 = vcmask 654336  }
  0x2e   :  { %vm3871_vm11 = vcmask 719872   ;;  %vm3873_vm12 = vcmask 785408   ;;  %vm3875_vm13 = vcmask 850944   ;;  %vm3877_vm14 = vcmask 916480  }
  0x2f   :  { %vm3879_vm15 = vcmask 982016  }
  0x99   :  { %v234_v4 = vpop.permute.xlu0 %233  ;;  %v534_v13 = vpop.permute.xlu1 %533 }
  0x9a   :  { %3893 = vmatmul.mubr.msk.f32.vlgmr.msra.gmra.mrb[2].mxu0 %vm83_vm0, %v234_v4 }
  0x9b   :  { %388 = vmatpush1.msra.mxu0 %v5106_v3  ;;  %451 = vmatprep.mubr.f32.mxu0 %v4978_v0 }
  0x9c   :  { %537 = vmatprep.subr.mxu0 %v5101_v2 }
  0x9d   :  { %v384_v10 = vpop.permute.xlu0 %383 }
  0x9e   :  { %3895 = vmatmul.mubr.msk.f32.vlgmr.msra.gmra.mrb[4].mxu0 %vm83_vm0, %v384_v10 }
  0x9f   :  { %538 = vmatpush1.msra.mxu0 %v5106_v3  ;;  %601 = vmatprep.mubr.f32.mxu0 %v4978_v0 }
  0xa0   :  { %711 = vmatprep.subr.bf16.mxu0 %v5135_v7 }
  0xa2   :  { %3897 = vmatmul.mubr.msk.f32.vlgmr.msra.gmra.mrb[6].mxu0 %vm83_vm0, %v534_v13 }
  0xa3   :  { %712 = vmatpush1.bf16.msra.mxu0 %v5152_v14  ;;  %743 = vmatprep.mubr.bf16.mxu0 %v4982_v21 }
  0xa4   :  { %713 = vmatprep.subr.bf16.mxu0 %v5155_v15 }
  0xa7   :  { %714 = vmatpush1.bf16.msra.mxu0 %v5171_v20 }
  0xa8   :  { %715 = vmatprep.subr.bf16.mxu0 %v5175_v22 }
  0xab   :  { %716 = vmatpush1.bf16.msra.mxu0 %v5190_v27 }
  0xac   :  { %717 = vmatprep.subr.bf16.mxu0 %v5193_v28 }
  0xaf   :  { %718 = vmatpush1.bf16.msra.mxu0 %v5202_v31 }
  0xb0   :  { %865 = vmatprep.subr.bf16.mxu0 %v5135_v7 }
  0xb2   :  { %744 = vmatmul.mubr.bf16.vlgmr.msra.gmra.mrb[8].mxu0 %v4982_v21 }
  0xb3   :  { %866 = vmatpush1.bf16.msra.mxu0 %v5152_v14  ;;  %897 = vmatprep.mubr.bf16.mxu0 %v4982_v21 }
  0xb4   :  { %867 = vmatprep.subr.bf16.mxu0 %v5155_v15 }
  0xb7   :  { %868 = vmatpush1.bf16.msra.mxu0 %v5171_v20 }
  0xb8   :  { %869 = vmatprep.subr.bf16.mxu0 %v5175_v22 }
  0xbb   :  { %870 = vmatpush1.bf16.msra.mxu0 %v5190_v27 }
  0xbc   :  { %871 = vmatprep.subr.bf16.mxu0 %v5193_v28 }
  0xbf   :  { %872 = vmatpush1.bf16.msra.mxu0 %v5202_v31 }
  0xc0   :  { %1019 = vmatprep.subr.bf16.mxu0 %v5135_v7 }
  0xfd   :  { %v153_v32 = vpop.f32.mrb[0].mxu0 }
  0xfe   :  { %v155_v33 = vpop.f32.mrb[1].mxu0  ;;  %v154_v47 = vadd.f32 %v153_v32, %v5238_v45 }
  0xff   :  { %v156_v48 = vadd.f32 %v155_v33, %v5242_v46 }
 0x16d   :  { %v5217_v34 = vpop.f32.mrb[2].mxu0 }
 0x16e   :  { %v5219_v35 = vpop.f32.mrb[3].mxu0 }
 0x171   :  { %v5221_v36 = vpop.f32.mrb[4].mxu0 }
 0x172   :  { %v5223_v37 = vpop.f32.mrb[5].mxu0 }
 0x175   :  { %v5225_v39 = vpop.f32.mrb[6].mxu0 }
 0x176   :  { %v5227_v40 = vpop.f32.mrb[7].mxu0 }
 0x185   :  { %v745_v49 = vpop.f32.mrb[8].mxu0 }
 0x186   :  { %v752_v50 = vadd.f32 %v745_v49, %v154_v47  ;;  %v747_v51 = vpop.f32.mrb[9].mxu0 }
 0x187   :  { %v753_v52 = vadd.f32 %v747_v51, %v156_v48  ;;  %v749_v53 = vpop.f32.mrb[10].mxu0 }
 0x188   :  { %v750_v54 = vpop.f32.mrb[11].mxu0  ;;  %v3899_v56 = vmul.f32 -1.442695, %v752_v50 }
 0x189   :  { %4650 = vtanh.f32 %v753_v52 }
 0x18a   :  { %4652 = vpow2.f32 %v3899_v56 }
 0x193   :  { %v4651_v55 = vpop.eup %4650 }
 0x194   :  { %769 = vrot.lane.b32.xlu1 %v4651_v55, %s4983_s3  ;;  %v4653_v57 = vpop.eup %4652 }
 0x195   :  { %v760_v58 = vadd.f32 1.0, %v4653_v57 }
 0x197   :  { %4654 = vrcp.f32 %v760_v58 }
 0x198   :  { %158 = vrot.lane.b32.xlu1 %v5096_v1, %s4984_s19  ;;  %s4991_s19 = smov 24  }
 0x19c   :  { %458 = vrot.lane.b32.xlu1 %v5096_v1, %s4985_s10 }
 0x1a1   :  { %v4655_v59 = vpop.eup %4654 }
 0x1a2   :  { %v767_v63 = vmul.f32 0.0, %v4655_v59 }
 0x206   :  { %v770_v60 = vpop.permute.xlu1 %769 }
 0x207   :  { %v772_v61 = vmul.f32 %v4655_v59, %v770_v60 }
 0x209   :  { %774 = vrot.lane.b32.xlu0 %v772_v61, %s4983_s3 }
 0x20a   :  { %v159_v62 = vpop.permute.xlu1 %158 }
 0x20b   :  { %3892 = vmatmul.mubr.msk.f32.vlgmr.msra.gmra.mrb[0].mxu1 %vm83_vm0, %v159_v62 }
 0x20c   :  { %313 = vmatpush1.msra.mxu1 %v5106_v3  ;;  %376 = vmatprep.mubr.f32.mxu1 %v4978_v0 }
 0x20d   :  { %308 = vrot.lane.b32.xlu0 %v5096_v1, %s4986_s28  ;;  %462 = vmatprep.subr.mxu1 %v5101_v2 }
 0x20e   :  { %v459_v8 = vpop.permute.xlu1 %458 }
 0x211   :  { %608 = vrot.lane.b32.xlu0 %v5096_v1, %s4987_s1 }
 0x27b   :  { %v775_v4 = vpop.permute.xlu0 %774 }
 0x27c   :  { %v5259_v5 = vadd.f32 %v775_v4, %v767_v63 }
 0x27e   :  { %4656 = vtanh.f32 %v5259_v5 }
 0x27f   :  { %v309_v6 = vpop.permute.xlu0 %308 }
 0x280   :  { %3894 = vmatmul.mubr.msk.f32.vlgmr.msra.gmra.mrb[2].mxu1 %vm83_vm0, %v309_v6 }
 0x281   :  { %463 = vmatpush1.msra.mxu1 %v5106_v3  ;;  %526 = vmatprep.mubr.f32.mxu1 %v4978_v0 }
 0x282   :  { %612 = vmatprep.subr.mxu1 %v5101_v2  ;;  %v3900_v2 = vmul.f32 -1.442695, %v753_v52 }
 0x283   :  { %v609_v1 = vpop.permute.xlu0 %608 }
 0x284   :  { %3896 = vmatmul.mubr.msk.f32.vlgmr.msra.gmra.mrb[4].mxu1 %vm83_vm0, %v459_v8  ;;  %4658 = vpow2.f32 %v3900_v2 }
 0x285   :  { %613 = vmatpush1.msra.mxu1 %v5106_v3  ;;  %676 = vmatprep.mubr.f32.mxu1 %v4978_v0 }
 0x286   :  { %788 = vmatprep.subr.bf16.mxu1 %v5135_v7 }
 0x288   :  { %v4657_v9 = vpop.eup %4656  ;;  %3898 = vmatmul.mubr.msk.f32.vlgmr.msra.gmra.mrb[6].mxu1 %vm83_vm0, %v609_v1 }
 0x289   :  { %780 = vrot.lane.b32.xlu1 %v4657_v9, %s4983_s3  ;;  %789 = vmatpush1.bf16.msra.mxu1 %v5152_v14  ;;  %v306_v9 = vadd.f32 %v5219_v35, %v5242_v46 }
 0x28a   :  { %790 = vmatprep.subr.bf16.mxu1 %v5155_v15  ;;  %820 = vmatprep.mubr.bf16.mxu1 %v4982_v21 }
 0x28d   :  { %791 = vmatpush1.bf16.msra.mxu1 %v5171_v20 }
 0x28e   :  { %792 = vmatprep.subr.bf16.mxu1 %v5175_v22  ;;  %v4659_v11 = vpop.eup %4658 }
 0x28f   :  { %v761_v12 = vadd.f32 1.0, %v4659_v11 }
 0x291   :  { %793 = vmatpush1.bf16.msra.mxu1 %v5190_v27  ;;  %4660 = vrcp.f32 %v761_v12 }
 0x292   :  { %794 = vmatprep.subr.bf16.mxu1 %v5193_v28 }
 0x295   :  { %795 = vmatpush1.bf16.msra.mxu1 %v5202_v31 }
 0x296   :  { %942 = vmatprep.subr.bf16.mxu1 %v5135_v7 }
 0x29b   :  { %v4661_v13 = vpop.eup %4660 }
 0x2de   :  { %v228_v3 = vpop.f32.mrb[0].mxu1 }
 0x2df   :  { %v230_v10 = vpop.f32.mrb[1].mxu1  ;;  %v229_v30 = vadd.f32 %v228_v3, %v5238_v45 }
 0x2e0   :  { %v231_v32 = vadd.f32 %v230_v10, %v5242_v46 }
 0x2fb   :  { %v781_v16 = vpop.permute.xlu1 %780 }
 0x2fc   :  { %v783_v17 = vmul.f32 %v4661_v13, %v781_v16 }
 0x2fe   :  { %v784_v18 = vpack.c.bf16 %v783_v17, %v783_v17 }
 0x300   :  { %3901 = vmatmul.mubr.msk.bf16.vlgmr.msra.gmra.mrb[8].mxu1 %vm707_vm1, %v784_v18 }
 0x301   :  { %943 = vmatpush1.bf16.msra.mxu1 %v5152_v14  ;;  %974 = vmatprep.mubr.bf16.mxu1 %v4982_v21 }
 0x302   :  { %944 = vmatprep.subr.bf16.mxu1 %v5155_v15 }
 0x305   :  { %945 = vmatpush1.bf16.msra.mxu1 %v5171_v20 }
 0x306   :  { %946 = vmatprep.subr.bf16.mxu1 %v5175_v22 }
 0x309   :  { %947 = vmatpush1.bf16.msra.mxu1 %v5190_v27 }
 0x30a   :  { %948 = vmatprep.subr.bf16.mxu1 %v5193_v28 }
 0x30d   :  { %949 = vmatpush1.bf16.msra.mxu1 %v5202_v31 }
 0x30e   :  { %1096 = vmatprep.subr.bf16.mxu1 %v5135_v7 }
 0x353   :  { %v5291_v19 = vpop.f32.mrb[2].mxu1 }
 0x354   :  { %v5293_v23 = vpop.f32.mrb[3].mxu1 }
 0x357   :  { %v5295_v24 = vpop.f32.mrb[4].mxu1 }
 0x358   :  { %v5297_v25 = vpop.f32.mrb[5].mxu1 }
 0x35b   :  { %v5299_v26 = vpop.f32.mrb[6].mxu1 }
 0x35c   :  { %v5301_v29 = vpop.f32.mrb[7].mxu1 }
 0x3d3   :  { %v822_v33 = vpop.f32.mrb[8].mxu1 }
 0x3d4   :  { %v829_v38 = vadd.f32 %v822_v33, %v229_v30  ;;  %v824_v43 = vpop.f32.mrb[9].mxu1 }
 0x3d5   :  { %v830_v47 = vadd.f32 %v824_v43, %v231_v32  ;;  %v826_v48 = vpop.f32.mrb[10].mxu1 }
 0x3d6   :  { %v827_v49 = vpop.f32.mrb[11].mxu1  ;;  %v3902_v51 = vmul.f32 -1.442695, %v829_v38 }
 0x3d7   :  { %4662 = vtanh.f32 %v830_v47  ;;  %v3903_v61 = vmul.f32 -1.442695, %v830_v47 }
 0x3d8   :  { %4664 = vpow2.f32 %v3902_v51 }
 0x3e1   :  { %v4663_v50 = vpop.eup %4662 }
 0x3e2   :  { %846 = vrot.lane.b32.xlu0 %v4663_v50, %s4983_s3  ;;  %v4665_v52 = vpop.eup %4664 }
 0x3e3   :  { %v837_v53 = vadd.f32 1.0, %v4665_v52 }
 0x3e5   :  { %4666 = vrcp.f32 %v837_v53 }
 0x3ef   :  { %v4667_v54 = vpop.eup %4666 }
 0x3f0   :  { %v844_v57 = vmul.f32 %v4667_v54, %v5259_v5  ;;  %v304_v5 = vadd.f32 %v5217_v34, %v5238_v45 }
 0x454   :  { %v847_v55 = vpop.permute.xlu0 %846 }
 0x455   :  { %v849_v56 = vmul.f32 %v4667_v54, %v847_v55  ;;  %v379_v55 = vadd.f32 %v5291_v19, %v5238_v45 }
 0x457   :  { %851 = vrot.lane.b32.xlu1 %v849_v56, %s4983_s3  ;;  %v381_v56 = vadd.f32 %v5293_v23, %v5242_v46 }
 0x4c9   :  { %v852_v58 = vpop.permute.xlu1 %851 }
 0x4ca   :  { %v854_v59 = vadd.f32 %v852_v58, %v844_v57 }
 0x4cc   :  { %4668 = vtanh.f32 %v854_v59 }
 0x4cd   :  { %4670 = vpow2.f32 %v3903_v61 }
 0x4d6   :  { %v4669_v60 = vpop.eup %4668 }
 0x4d7   :  { %857 = vrot.lane.b32.xlu0 %v4669_v60, %s4983_s3  ;;  %v4671_v62 = vpop.eup %4670 }
 0x4d8   :  { %v838_v63 = vadd.f32 1.0, %v4671_v62 }
 0x4da   :  { %4672 = vrcp.f32 %v838_v63 }
 0x4e4   :  { %v4673_v4 = vpop.eup %4672 }
 0x549   :  { %v858_v6 = vpop.permute.xlu0 %857 }
 0x54a   :  { %v860_v8 = vmul.f32 %v4673_v4, %v858_v6 }
 0x54c   :  { %v861_v1 = vpack.c.bf16 %v860_v8, %v860_v8 }
 0x54e   :  { %3904 = vmatmul.mubr.msk.bf16.vlgmr.msra.gmra.mrb[12].mxu0 %vm707_vm1, %v861_v1 }
 0x54f   :  { %1020 = vmatpush1.bf16.msra.mxu0 %v5152_v14  ;;  %1051 = vmatprep.mubr.bf16.mxu0 %v4982_v21 }
 0x550   :  { %1021 = vmatprep.subr.bf16.mxu0 %v5155_v15 }
 0x553   :  { %1022 = vmatpush1.bf16.msra.mxu0 %v5171_v20 }
 0x554   :  { %1023 = vmatprep.subr.bf16.mxu0 %v5175_v22 }
 0x557   :  { %1024 = vmatpush1.bf16.msra.mxu0 %v5190_v27 }
 0x558   :  { %1025 = vmatprep.subr.bf16.mxu0 %v5193_v28 }
 0x55b   :  { %1026 = vmatpush1.bf16.msra.mxu0 %v5202_v31 }
 0x55c   :  { %1173 = vmatprep.subr.bf16.mxu0 %v5135_v7 }
 0x621   :  { %v899_v2 = vpop.f32.mrb[12].mxu0 }
 0x622   :  { %v906_v3 = vadd.f32 %v899_v2, %v304_v5  ;;  %v901_v10 = vpop.f32.mrb[13].mxu0 }
 0x623   :  { %v907_v11 = vadd.f32 %v901_v10, %v306_v9  ;;  %v903_v12 = vpop.f32.mrb[14].mxu0 }
 0x624   :  { %v904_v13 = vpop.f32.mrb[15].mxu0  ;;  %v3905_v17 = vmul.f32 -1.442695, %v906_v3 }
 0x625   :  { %4674 = vtanh.f32 %v907_v11  ;;  %v3906_v48 = vmul.f32 -1.442695, %v907_v11 }
 0x626   :  { %4676 = vpow2.f32 %v3905_v17 }
 0x62f   :  { %v4675_v16 = vpop.eup %4674 }
 0x630   :  { %923 = vrot.lane.b32.xlu1 %v4675_v16, %s4983_s3  ;;  %v4677_v18 = vpop.eup %4676 }
 0x631   :  { %v914_v30 = vadd.f32 1.0, %v4677_v18  ;;  %v454_v18 = vadd.f32 %v5221_v36, %v5238_v45 }
 0x633   :  { %4678 = vrcp.f32 %v914_v30  ;;  %v456_v30 = vadd.f32 %v5223_v37, %v5242_v46 }
 0x63d   :  { %v4679_v32 = vpop.eup %4678 }
 0x63e   :  { %v921_v35 = vmul.f32 %v4679_v32, %v854_v59 }
 0x6a2   :  { %v924_v34 = vpop.permute.xlu1 %923 }
 0x6a3   :  { %v926_v33 = vmul.f32 %v4679_v32, %v924_v34 }
 0x6a5   :  { %928 = vrot.lane.b32.xlu0 %v926_v33, %s4983_s3 }
 0x717   :  { %v929_v38 = vpop.permute.xlu0 %928 }
 0x718   :  { %v931_v43 = vadd.f32 %v929_v38, %v921_v35 }
 0x71a   :  { %4680 = vtanh.f32 %v931_v43 }
 0x71b   :  { %4682 = vpow2.f32 %v3906_v48 }
 0x724   :  { %v4681_v47 = vpop.eup %4680 }
 0x725   :  { %934 = vrot.lane.b32.xlu1 %v4681_v47, %s4983_s3  ;;  %v4683_v49 = vpop.eup %4682 }
 0x726   :  { %v915_v50 = vadd.f32 1.0, %v4683_v49 }
 0x728   :  { %4684 = vrcp.f32 %v915_v50 }
 0x732   :  { %v4685_v51 = vpop.eup %4684 }
 0x797   :  { %v935_v52 = vpop.permute.xlu1 %934 }
 0x798   :  { %v937_v53 = vmul.f32 %v4685_v51, %v935_v52 }
 0x79a   :  { %v938_v54 = vpack.c.bf16 %v937_v53, %v937_v53 }
 0x79c   :  { %3907 = vmatmul.mubr.msk.bf16.vlgmr.msra.gmra.mrb[12].mxu1 %vm707_vm1, %v938_v54 }
 0x79d   :  { %1097 = vmatpush1.bf16.msra.mxu1 %v5152_v14  ;;  %1128 = vmatprep.mubr.bf16.mxu1 %v4982_v21 }
 0x79e   :  { %1098 = vmatprep.subr.bf16.mxu1 %v5155_v15 }
 0x7a1   :  { %1099 = vmatpush1.bf16.msra.mxu1 %v5171_v20 }
 0x7a2   :  { %1100 = vmatprep.subr.bf16.mxu1 %v5175_v22 }
 0x7a5   :  { %1101 = vmatpush1.bf16.msra.mxu1 %v5190_v27 }
 0x7a6   :  { %1102 = vmatprep.subr.bf16.mxu1 %v5193_v28 }
 0x7a9   :  { %1103 = vmatpush1.bf16.msra.mxu1 %v5202_v31 }
 0x7aa   :  { %1250 = vmatprep.subr.bf16.mxu1 %v5135_v7 }
 0x86f   :  { %v976_v57 = vpop.f32.mrb[12].mxu1 }
 0x870   :  { %v983_v58 = vadd.f32 %v976_v57, %v379_v55  ;;  %v978_v59 = vpop.f32.mrb[13].mxu1 }
 0x871   :  { %v984_v60 = vadd.f32 %v978_v59, %v381_v56  ;;  %v980_v61 = vpop.f32.mrb[14].mxu1 }
 0x872   :  { %v981_v62 = vpop.f32.mrb[15].mxu1  ;;  %v3908_v4 = vmul.f32 -1.442695, %v983_v58 }
 0x873   :  { %4686 = vtanh.f32 %v984_v60  ;;  %v3909_v3 = vmul.f32 -1.442695, %v984_v60 }
 0x874   :  { %4688 = vpow2.f32 %v3908_v4 }
 0x87d   :  { %v4687_v63 = vpop.eup %4686 }
 0x87e   :  { %1000 = vrot.lane.b32.xlu0 %v4687_v63, %s4983_s3  ;;  %v4689_v6 = vpop.eup %4688  ;;  %v529_v63 = vadd.f32 %v5295_v24, %v5238_v45 }
 0x87f   :  { %v991_v7 = vadd.f32 1.0, %v4689_v6 }
 0x881   :  { %4690 = vrcp.f32 %v991_v7 }
 0x88b   :  { %v4691_v8 = vpop.eup %4690 }
 0x88c   :  { %v998_v23 = vmul.f32 %v4691_v8, %v931_v43 }
 0x8f0   :  { %v1001_v19 = vpop.permute.xlu0 %1000 }
 0x8f1   :  { %v1003_v1 = vmul.f32 %v4691_v8, %v1001_v19 }
 0x8f3   :  { %1005 = vrot.lane.b32.xlu1 %v1003_v1, %s4983_s3 }
 0x965   :  { %v1006_v5 = vpop.permute.xlu1 %1005 }
 0x966   :  { %v1008_v9 = vadd.f32 %v1006_v5, %v998_v23 }
 0x968   :  { %4692 = vtanh.f32 %v1008_v9 }
 0x969   :  { %4694 = vpow2.f32 %v3909_v3 }
 0x972   :  { %v4693_v2 = vpop.eup %4692 }
 0x973   :  { %1011 = vrot.lane.b32.xlu0 %v4693_v2, %s4983_s3  ;;  %v4695_v10 = vpop.eup %4694 }
 0x974   :  { %v992_v11 = vadd.f32 1.0, %v4695_v10 }
 0x976   :  { %4696 = vrcp.f32 %v992_v11 }
 0x980   :  { %v4697_v12 = vpop.eup %4696 }
 0x9e5   :  { %v1012_v13 = vpop.permute.xlu0 %1011 }
 0x9e6   :  { %v1014_v16 = vmul.f32 %v4697_v12, %v1012_v13 }
 0x9e8   :  { %v1015_v17 = vpack.c.bf16 %v1014_v16, %v1014_v16 }
 0x9ea   :  { %3910 = vmatmul.mubr.msk.bf16.vlgmr.msra.gmra.mrb[16].mxu0 %vm707_vm1, %v1015_v17  ;;  %v604_v17 = vadd.f32 %v5225_v39, %v5238_v45 }
 0x9eb   :  { %1174 = vmatpush1.bf16.msra.mxu0 %v5152_v14  ;;  %1205 = vmatprep.mubr.bf16.mxu0 %v4982_v21 }
 0x9ec   :  { %1175 = vmatprep.subr.bf16.mxu0 %v5155_v15 }
 0x9ef   :  { %1176 = vmatpush1.bf16.msra.mxu0 %v5171_v20 }
 0x9f0   :  { %1177 = vmatprep.subr.bf16.mxu0 %v5175_v22 }
 0x9f3   :  { %1178 = vmatpush1.bf16.msra.mxu0 %v5190_v27 }
 0x9f4   :  { %1179 = vmatprep.subr.bf16.mxu0 %v5193_v28 }
 0x9f7   :  { %1180 = vmatpush1.bf16.msra.mxu0 %v5202_v31 }
 0xabd   :  { %v1053_v32 = vpop.f32.mrb[16].mxu0 }
 0xabe   :  { %v1060_v34 = vadd.f32 %v1053_v32, %v454_v18  ;;  %v1055_v33 = vpop.f32.mrb[17].mxu0  ;;  %v606_v18 = vadd.f32 %v5227_v40, %v5242_v46 }
 0xabf   :  { %v1061_v35 = vadd.f32 %v1055_v33, %v456_v30  ;;  %v1057_v38 = vpop.f32.mrb[18].mxu0 }
 0xac0   :  { %v1058_v43 = vpop.f32.mrb[19].mxu0  ;;  %v3911_v48 = vmul.f32 -1.442695, %v1060_v34 }
 0xac1   :  { %4698 = vtanh.f32 %v1061_v35  ;;  %v3912_v56 = vmul.f32 -1.442695, %v1061_v35 }
 0xac2   :  { %4700 = vpow2.f32 %v3911_v48 }
 0xacb   :  { %v4699_v47 = vpop.eup %4698 }
 0xacc   :  { %1077 = vrot.lane.b32.xlu1 %v4699_v47, %s4983_s3  ;;  %v4701_v49 = vpop.eup %4700 }
 0xacd   :  { %v1068_v50 = vadd.f32 1.0, %v4701_v49 }
 0xacf   :  { %4702 = vrcp.f32 %v1068_v50 }
 0xad9   :  { %v4703_v51 = vpop.eup %4702 }
 0xada   :  { %v1075_v37 = vmul.f32 %v4703_v51, %v1008_v9 }
 0xb3e   :  { %v1078_v36 = vpop.permute.xlu1 %1077 }
 0xb3f   :  { %v1080_v52 = vmul.f32 %v4703_v51, %v1078_v36 }
 0xb41   :  { %1082 = vrot.lane.b32.xlu0 %v1080_v52, %s4983_s3 }
 0xbb3   :  { %v1083_v53 = vpop.permute.xlu0 %1082 }
 0xbb4   :  { %v1085_v54 = vadd.f32 %v1083_v53, %v1075_v37 }
 0xbb6   :  { %4704 = vtanh.f32 %v1085_v54 }
 0xbb7   :  { %4706 = vpow2.f32 %v3912_v56 }
 0xbc0   :  { %v4705_v55 = vpop.eup %4704 }
 0xbc1   :  { %1088 = vrot.lane.b32.xlu1 %v4705_v55, %s4983_s3  ;;  %v4707_v57 = vpop.eup %4706 }
 0xbc2   :  { %v1069_v58 = vadd.f32 1.0, %v4707_v57 }
 0xbc4   :  { %4708 = vrcp.f32 %v1069_v58 }
 0xbce   :  { %v4709_v59 = vpop.eup %4708 }
 0xc33   :  { %v1089_v60 = vpop.permute.xlu1 %1088 }
 0xc34   :  { %v1091_v61 = vmul.f32 %v4709_v59, %v1089_v60  ;;  %v679_v60 = vadd.f32 %v5299_v26, %v5238_v45 }
 0xc36   :  { %v1092_v62 = vpack.c.bf16 %v1091_v61, %v1091_v61  ;;  %v681_v61 = vadd.f32 %v5301_v29, %v5242_v46  ;;  %v1324_v29 = vld [vmem:[%s5998_s4 + $0x8] sm:$0xff] }
 0xc38   :  { %3913 = vmatmul.mubr.msk.bf16.vlgmr.msra.gmra.mrb[16].mxu1 %vm707_vm1, %v1092_v62 }
 0xc39   :  { %1251 = vmatpush1.bf16.msra.mxu1 %v5152_v14  ;;  %1282 = vmatprep.mubr.bf16.mxu1 %v4982_v21  ;;  %v531_v14 = vadd.f32 %v5297_v25, %v5242_v46  ;;  %v1323_v46 = vld [vmem:[%s5998_s4] sm:$0xff] }
 0xc3a   :  { %1252 = vmatprep.subr.bf16.mxu1 %v5155_v15 }
 0xc3d   :  { %1253 = vmatpush1.bf16.msra.mxu1 %v5171_v20 }
 0xc3e   :  { %1254 = vmatprep.subr.bf16.mxu1 %v5175_v22 }
 0xc41   :  { %1255 = vmatpush1.bf16.msra.mxu1 %v5190_v27 }
 0xc42   :  { %1256 = vmatprep.subr.bf16.mxu1 %v5193_v28 }
 0xc45   :  { %1257 = vmatpush1.bf16.msra.mxu1 %v5202_v31 }
 0xd0b   :  { %v1130_v4 = vpop.f32.mrb[16].mxu1 }
 0xd0c   :  { %v1137_v6 = vadd.f32 %v1130_v4, %v529_v63  ;;  %v1132_v7 = vpop.f32.mrb[17].mxu1 }
 0xd0d   :  { %v1138_v15 = vadd.f32 %v1132_v7, %v531_v14  ;;  %v1134_v8 = vpop.f32.mrb[18].mxu1 }
 0xd0e   :  { %v1135_v20 = vpop.f32.mrb[19].mxu1  ;;  %v3914_v27 = vmul.f32 -1.442695, %v1137_v6 }
 0xd0f   :  { %4710 = vtanh.f32 %v1138_v15  ;;  %v3915_v2 = vmul.f32 -1.442695, %v1138_v15 }
 0xd10   :  { %4712 = vpow2.f32 %v3914_v27 }
 0xd19   :  { %v4711_v22 = vpop.eup %4710 }
 0xd1a   :  { %1154 = vrot.lane.b32.xlu0 %v4711_v22, %s4983_s3  ;;  %v4713_v28 = vpop.eup %4712 }
 0xd1b   :  { %v1145_v31 = vadd.f32 1.0, %v4713_v28  ;;  %v1325_v28 = vld [vmem:[%s5998_s4 + $0x10] sm:$0xff] }
 0xd1d   :  { %4714 = vrcp.f32 %v1145_v31  ;;  %v4988_v31 = vmov 0.0|0.0  }
 0xd1e   :  { %4433 = vmatprep.subr.bf16.mxu0 %v4988_v31 }
 0xd27   :  { %v4715_v19 = vpop.eup %4714 }
 0xd28   :  { %v1152_v25 = vmul.f32 %v4715_v19, %v1085_v54 }
 0xd8c   :  { %v1155_v24 = vpop.permute.xlu0 %1154 }
 0xd8d   :  { %v1157_v1 = vmul.f32 %v4715_v19, %v1155_v24  ;;  %v4434_v19 = vpack.c.bf16 %v1324_v29, %v1323_v46  ;;  %v1326_v24 = vld [vmem:[%s5998_s4 + $0x18] sm:$0xff] }
 0xd8f   :  { %1159 = vrot.lane.b32.xlu1 %v1157_v1, %s4983_s3  ;;  %v4437_v1 = vpack.c.bf16 %v1326_v24, %v1325_v28  ;;  %v1526_v28 = vld [vmem:[%s6001_s7 + $0x60] sm:$0xff] }
 0xe01   :  { %v1160_v23 = vpop.permute.xlu1 %1159 }
 0xe02   :  { %v1162_v5 = vadd.f32 %v1160_v23, %v1152_v25  ;;  %v1327_v25 = vld [vmem:[%s5998_s4 + $0x20] sm:$0xff]  ;;  %v1328_v23 = vld [vmem:[%s5998_s4 + $0x28] sm:$0xff] }
 0xe04   :  { %4716 = vtanh.f32 %v1162_v5 }
 0xe05   :  { %4718 = vpow2.f32 %v3915_v2  ;;  %v1330_v2 = vld [vmem:[%s5998_s4 + $0x38] sm:$0xff] }
 0xe0e   :  { %v4717_v9 = vpop.eup %4716 }
 0xe0f   :  { %1165 = vrot.lane.b32.xlu0 %v4717_v9, %s4983_s3  ;;  %v4719_v3 = vpop.eup %4718  ;;  %v1329_v9 = vld [vmem:[%s5998_s4 + $0x30] sm:$0xff]  ;;  %s4992_s4 = smov 40  }
 0xe10   :  { %v1146_v10 = vadd.f32 1.0, %v4719_v3  ;;  %v4443_v3 = vpack.c.bf16 %v1330_v2, %v1329_v9 }
 0xe12   :  { %4720 = vrcp.f32 %v1146_v10 }
 0xe1c   :  { %v4721_v11 = vpop.eup %4720 }
 0xe81   :  { %v1166_v12 = vpop.permute.xlu0 %1165 }
 0xe82   :  { %v1168_v13 = vmul.f32 %v4721_v11, %v1166_v12 }
 0xe84   :  { %v1169_v16 = vpack.c.bf16 %v1168_v13, %v1168_v13 }
 0xe86   :  { %3916 = vmatmul.mubr.msk.bf16.vlgmr.msra.gmra.mrb[20].mxu0 %vm707_vm1, %v1169_v16 }
 0xe87   :  { %4435 = vmatpush3.bf16.msra.mxu0 %v4434_v19  ;;  %4145 = vmatprep.mubr.msk.f32.mxu0 %vm4989_vm2, %v4978_v0  ;;  %v1528_v19 = vld [vmem:[%s6001_s7 + $0x70] sm:$0xff] }
 0xe88   :  { %4436 = vmatprep.subr.bf16.mxu0 %v4988_v31  ;;  %v5519_v24 = vpack.c.bf16 %v1528_v19, %v1526_v28 }
 0xe8b   :  { %4438 = vmatpush3.bf16.msra.mxu0 %v4437_v1  ;;  %v1427_v1 = vld [vmem:[#allocation2] sm:$0x3] }
 0xe8c   :  { %4439 = vmatprep.subr.bf16.mxu0 %v4988_v31 }
 0xf59   :  { %v1207_v30 = vpop.f32.mrb[20].mxu0 }
 0xf5a   :  { %v1214_v32 = vadd.f32 %v1207_v30, %v604_v17  ;;  %v1209_v34 = vpop.f32.mrb[21].mxu0 }
 0xf5b   :  { %v1215_v33 = vadd.f32 %v1209_v34, %v606_v18  ;;  %v1211_v35 = vpop.f32.mrb[22].mxu0 }
 0xf5c   :  { %v1212_v38 = vpop.f32.mrb[23].mxu0  ;;  %v3917_v47 = vmul.f32 -1.442695, %v1214_v32  ;;  %v1426_v35 = vld [vmem:[%s6000_s6 + $0x18] sm:$0xff] }
 0xf5d   :  { %4722 = vtanh.f32 %v1215_v33  ;;  %v3918_v53 = vmul.f32 -1.442695, %v1215_v33  ;;  %v1424_v33 = vld [vmem:[%s6000_s6 + $0x8] sm:$0xff]  ;;  %v1423_v38 = vld [vmem:[%s6000_s6] sm:$0xff] }
 0xf5e   :  { %4724 = vpow2.f32 %v3917_v47  ;;  %v1425_v47 = vld [vmem:[%s6000_s6 + $0x10] sm:$0xff] }
 0xf67   :  { %v4723_v43 = vpop.eup %4722 }
 0xf68   :  { %1231 = vrot.lane.b32.xlu1 %v4723_v43, %s4983_s3  ;;  %v4725_v48 = vpop.eup %4724  ;;  %v4445_v43 = vpack.c.bf16 %v1426_v35, %v1424_v33 }
 0xf69   :  { %v1222_v49 = vadd.f32 1.0, %v4725_v48  ;;  %v4447_v48 = vpack.c.bf16 %v1425_v47, %v1423_v38  ;;  %v1538_v38 = vld [vmem:[%s6003_s9] sm:$0xff]  ;;  %v1541_v47 = vld [vmem:[%s6003_s9 + $0x18] sm:$0xff] }
 0xf6a   :  { %4446 = vmatprep.subr.bf16.mxu1 %v4445_v43  ;;  %v5555_v43 = vpack.c.bf16 %v1539_v41, %v1538_v38 }
 0xf6b   :  { %4726 = vrcp.f32 %v1222_v49  ;;  %v3922_v49 = vld [vmem:[%s5999_s5] ss:$0 sm:$0xff] }
 0xf75   :  { %v4727_v50 = vpop.eup %4726 }
 0xf76   :  { %v1229_v40 = vmul.f32 %v4727_v50, %v1162_v5  ;;  %v4440_v5 = vpack.c.bf16 %v1328_v23, %v1327_v25  ;;  %v1436_v25 = vrot.slane %v1427_v1, %v79_v44 }
 0xf78   :  { %4441 = vmatpush3.bf16.msra.mxu0 %v4440_v5 }
 0xf79   :  { %4442 = vmatprep.subr.bf16.mxu0 %v4988_v31 }
 0xf7c   :  { %4444 = vmatpush3.bf16.msra.mxu0 %v4443_v3 }
 0xf7d   :  { %4449 = vmatprep.subr.bf16.mxu0 %v4988_v31 }
 0xfda   :  { %v1232_v39 = vpop.permute.xlu1 %1231 }
 0xfdb   :  { %v1234_v51 = vmul.f32 %v4727_v50, %v1232_v39 }
 0xfdd   :  { %1236 = vrot.lane.b32.xlu0 %v1234_v51, %s4983_s3 }
0x104f   :  { %v1237_v36 = vpop.permute.xlu0 %1236 }
0x1050   :  { %v1239_v52 = vadd.f32 %v1237_v36, %v1229_v40 }
0x1052   :  { %4728 = vtanh.f32 %v1239_v52 }
0x1053   :  { %4730 = vpow2.f32 %v3918_v53 }
0x105c   :  { %v4729_v37 = vpop.eup %4728 }
0x105d   :  { %1242 = vrot.lane.b32.xlu1 %v4729_v37, %s4983_s3  ;;  %v4731_v54 = vpop.eup %4730  ;;  %v1517_v37 = vld [vmem:[%s6001_s7 + $0x18] sm:$0xff] }
0x105e   :  { %v1223_v55 = vadd.f32 1.0, %v4731_v54 }
0x1060   :  { %4732 = vrcp.f32 %v1223_v55  ;;  %v1413_v55 = vld [vmem:[%s6005_s11] sm:$0xff] }
0x106a   :  { %v4733_v56 = vpop.eup %4732 }
0x10cf   :  { %v1243_v57 = vpop.permute.xlu1 %1242 }
0x10d0   :  { %v1245_v58 = vmul.f32 %v4733_v56, %v1243_v57  ;;  %v1514_v56 = vld [vmem:[%s6001_s7] sm:$0xff]  ;;  %v1516_v57 = vld [vmem:[%s6001_s7 + $0x10] sm:$0xff] }
0x10d2   :  { %v1246_v59 = vpack.c.bf16 %v1245_v58, %v1245_v58 }
0x10d4   :  { %3919 = vmatmul.mubr.msk.bf16.vlgmr.msra.gmra.mrb[20].mxu1 %vm707_vm1, %v1246_v59  ;;  %v1519_v59 = vld [vmem:[%s6001_s7 + $0x28] sm:$0xff] }
0x10d5   :  { %1507 = vmatprep.mubr.f32.mxu1 %v4978_v0  ;;  %4448 = vmatpush1.bf16.msra.mxu1 %v4447_v48 }
0x11a7   :  { %v1284_v62 = vpop.f32.mrb[20].mxu1 }
0x11a8   :  { %v1291_v63 = vadd.f32 %v1284_v62, %v679_v60  ;;  %v1286_v14 = vpop.f32.mrb[21].mxu1  ;;  %v1521_v60 = vld [vmem:[%s6001_s7 + $0x38] sm:$0xff]  ;;  %v5470_v62 = vpack.c.bf16 %v1516_v57, %v1514_v56 }
0x11a9   :  { %v1292_v4 = vadd.f32 %v1286_v14, %v681_v61  ;;  %v1288_v6 = vpop.f32.mrb[22].mxu1  ;;  %v5472_v14 = vpack.c.bf16 %v1521_v60, %v1519_v59 }
0x11aa   :  { %v1289_v7 = vpop.f32.mrb[23].mxu1  ;;  %v3920_v8 = vmul.f32 -1.442695, %v1291_v63  ;;  %v1520_v6 = vld [vmem:[%s6001_s7 + $0x30] sm:$0xff] }
0x11ab   :  { %4734 = vtanh.f32 %v1292_v4  ;;  %v3921_v16 = vmul.f32 -1.442695, %v1292_v4  ;;  %v1518_v4 = vld [vmem:[%s6001_s7 + $0x20] sm:$0xff]  ;;  %v1523_v7 = vld [vmem:[%s6001_s7 + $0x48] sm:$0xff] }
0x11ac   :  { %4736 = vpow2.f32 %v3920_v8  ;;  %v5488_v8 = vpack.c.bf16 %v1520_v6, %v1518_v4 }
0x11b5   :  { %v4735_v15 = vpop.eup %4734 }
0x11b6   :  { %1308 = vrot.lane.b32.xlu0 %v4735_v15, %s4983_s3  ;;  %v4737_v20 = vpop.eup %4736  ;;  %v1525_v15 = vld [vmem:[%s6001_s7 + $0x58] sm:$0xff] }
0x11b7   :  { %v1299_v22 = vadd.f32 1.0, %v4737_v20  ;;  %v5492_v20 = vpack.c.bf16 %v1525_v15, %v1523_v7 }
0x11b9   :  { %4738 = vrcp.f32 %v1299_v22  ;;  %v1522_v22 = vld [vmem:[%s6001_s7 + $0x40] sm:$0xff] }
0x11c3   :  { %v4739_v27 = vpop.eup %4738 }
0x11c4   :  { %v1306_v10 = vmul.f32 %v4739_v27, %v1239_v52  ;;  %v1515_v52 = vld [vmem:[%s6001_s7 + $0x8] sm:$0xff] }
0x11c5   :  { %v5451_v53 = vpack.c.bf16 %v1517_v37, %v1515_v52 }
0x11c7   :  { %1547 = vmatprep.subr.bf16.mxu1 %v5451_v53 }
0x1228   :  { %v1309_v45 = vpop.permute.xlu0 %1308 }
0x1229   :  { %v1311_v26 = vmul.f32 %v4739_v27, %v1309_v45  ;;  %v1524_v27 = vld [vmem:[%s6001_s7 + $0x50] sm:$0xff]  ;;  %v1527_v45 = vld [vmem:[%s6001_s7 + $0x68] sm:$0xff] }
0x122a   :  { %v5507_v46 = vpack.c.bf16 %v1524_v27, %v1522_v22 }
0x122b   :  { %1313 = vrot.lane.b32.xlu1 %v1311_v26, %s4983_s3  ;;  %v1529_v26 = vld [vmem:[%s6001_s7 + $0x78] sm:$0xff] }
0x122c   :  { %v5510_v29 = vpack.c.bf16 %v1529_v26, %v1527_v45 }
0x129d   :  { %v1314_v11 = vpop.permute.xlu1 %1313 }
0x129e   :  { %v1316_v12 = vadd.f32 %v1314_v11, %v1306_v10 }
0x12a0   :  { %4740 = vtanh.f32 %v1316_v12 }
0x12a1   :  { %4742 = vpow2.f32 %v3921_v16  ;;  %v1432_v16 = vrot.slane %v1427_v1, %v75_v42  ;;  %v1540_v42 = vld [vmem:[%s6003_s9 + $0x10] sm:$0xff] }
0x12a2   :  { %v5561_v48 = vpack.c.bf16 %v1541_v47, %v1540_v42 }
0x12aa   :  { %v4741_v13 = vpop.eup %4740 }
0x12ab   :  { %1319 = vrot.lane.b32.xlu0 %v4741_v13, %s4983_s3  ;;  %v4743_v17 = vpop.eup %4742 }
0x12ac   :  { %v1300_v18 = vadd.f32 1.0, %v4743_v17 }
0x12ae   :  { %4744 = vrcp.f32 %v1300_v18 }
0x12b8   :  { %v4745_v30 = vpop.eup %4744 }
0x131d   :  { %v1320_v32 = vpop.permute.xlu0 %1319 }
0x131e   :  { %v1322_v34 = vmul.f32 %v4745_v30, %v1320_v32 }
0x1320   :  { %4146 = vmatmul.mubr.msk.f32.vlgmr.msra.gmra.mrb[24].mxu0 %vm707_vm1, %v1322_v34 }
0x1321   :  { %4164 = vmatprep.mubr.msk.f32.mxu0 %vm4989_vm2, %v4978_v0  ;;  %4451 = vmatpush3.bf16.msra.mxu0 %v5555_v43 }
0x1322   :  { %4452 = vmatprep.subr.bf16.mxu0 %v4988_v31 }
0x1325   :  { %4454 = vmatpush3.bf16.msra.mxu0 %v5561_v48 }
0x1326   :  { %4455 = vmatprep.subr.bf16.mxu0 %v4988_v31 }
0x13f3   :  { %v1407_v50 = vpop.f32.mrb[24].mxu0 }
0x13f4   :  { %v1408_v39 = vadd.f32 %v3922_v49, %v1407_v50  ;;  %v4147_v51 = vpop.f32.mrb[25].mxu0  ;;  %v1542_v49 = vld [vmem:[%s6003_s9 + $0x20] sm:$0xff]  ;;  %v1543_v50 = vld [vmem:[%s6003_s9 + $0x28] sm:$0xff] }
0x13f5   :  { %v1544_v51 = vld [vmem:[%s6003_s9 + $0x30] sm:$0xff] }
0x13f6   :  { %v1414_v40 = vmul.f32 0.5, %v1408_v39  ;;  %1412 = vst.msk [vmem:[%s6007_s13] sm:$0xff] %vm1411_vm3, %v1408_v39 }
0x13f8   :  { %v1415_v36 = vmul.f32 1.442695, %v1414_v40  ;;  %v1545_v40 = vld [vmem:[%s6003_s9 + $0x38] sm:$0xff]  ;;  %s4990_s9 = smov 8  }
0x13fa   :  { %4746 = vpow2.f32 %v1415_v36  ;;  %v5581_v36 = vpack.c.bf16 %v1545_v40, %v1544_v51 }
0x1404   :  { %v4747_v54 = vpop.eup %4746 }
0x1405   :  { %1418 = vrot.lane.b32.xlu1 %v4747_v54, %s4979_s20 }
0x1477   :  { %v1419_v58 = vpop.permute.xlu1 %1418 }
0x1478   :  { %v1421_v61 = vmul.f32 %v1419_v58, %v1413_v55 }
0x147a   :  { %v1422_v63 = vadd.f32 %v1421_v61, %v1408_v39  ;;  %v5571_v39 = vpack.c.bf16 %v1543_v50, %v1542_v49 }
0x147c   :  { %3924 = vmatmul.mubr.msk.f32.vlgmr.msra.gmra.mrb[24].mxu1 %vm1439_vm4, %v1422_v63  ;;  %4457 = vmatpush3.bf16.msra.mxu0 %v5571_v39 }
0x147d   :  { %1548 = vmatpush1.bf16.msra.mxu1 %v5470_v62  ;;  %1579 = vmatprep.mubr.bf16.mxu1 %v4982_v21 }
0x147e   :  { %1549 = vmatprep.subr.bf16.mxu1 %v5472_v14  ;;  %4458 = vmatprep.subr.bf16.mxu0 %v4988_v31 }
0x1480   :  { %4460 = vmatpush3.bf16.msra.mxu0 %v5581_v36 }
0x1481   :  { %1550 = vmatpush1.bf16.msra.mxu1 %v5488_v8  ;;  %4461 = vmatprep.subr.bf16.mxu0 %v4988_v31 }
0x1482   :  { %1551 = vmatprep.subr.bf16.mxu1 %v5492_v20 }
0x1485   :  { %1552 = vmatpush1.bf16.msra.mxu1 %v5507_v46 }
0x1486   :  { %1553 = vmatprep.subr.bf16.mxu1 %v5510_v29 }
0x1489   :  { %1554 = vmatpush1.bf16.msra.mxu1 %v5519_v24 }
0x148a   :  { %1703 = vmatprep.subr.bf16.mxu1 %v5451_v53 }
0x148c   :  { %1580 = vmatmul.mubr.bf16.vlgmr.msra.gmra.mrb[28].mxu1 %v4982_v21 }
0x148d   :  { %1704 = vmatpush1.bf16.msra.mxu1 %v5470_v62  ;;  %1735 = vmatprep.mubr.bf16.mxu1 %v4982_v21 }
0x148e   :  { %1705 = vmatprep.subr.bf16.mxu1 %v5472_v14 }
0x1491   :  { %1706 = vmatpush1.bf16.msra.mxu1 %v5488_v8 }
0x1492   :  { %1707 = vmatprep.subr.bf16.mxu1 %v5492_v20 }
0x1495   :  { %1708 = vmatpush1.bf16.msra.mxu1 %v5507_v46 }
0x1496   :  { %1709 = vmatprep.subr.bf16.mxu1 %v5510_v29 }
0x1499   :  { %1710 = vmatpush1.bf16.msra.mxu1 %v5519_v24 }
0x149a   :  { %1853 = vmatprep.subr.bf16.mxu1 %v5451_v53 }
0x154f   :  { %v1509_v23 = vpop.f32.mrb[24].mxu1 }
0x1550   :  { %v1511_v5 = vpop.f32.mrb[25].mxu1  ;;  %v5542_v17 = vadd.f32 %v1509_v23, %v1432_v16 }
0x1551   :  { %v5536_v9 = vadd.f32 %v1511_v5, %v1436_v25 }
0x155f   :  { %v1581_v2 = vpop.f32.mrb[28].mxu1 }
0x1560   :  { %v1583_v3 = vpop.f32.mrb[29].mxu1  ;;  %v1588_v44 = vadd.f32 %v1581_v2, %v5542_v17 }
0x1561   :  { %v1589_v10 = vadd.f32 %v1583_v3, %v5536_v9  ;;  %v1585_v11 = vpop.f32.mrb[30].mxu1 }
0x1562   :  { %v1586_v12 = vpop.f32.mrb[31].mxu1  ;;  %v3925_v18 = vmul.f32 -1.442695, %v1588_v44 }
0x1563   :  { %4748 = vtanh.f32 %v1589_v10  ;;  %v3926_v56 = vmul.f32 -1.442695, %v1589_v10 }
0x1564   :  { %4750 = vpow2.f32 %v3925_v18 }
0x156d   :  { %v4749_v13 = vpop.eup %4748 }
0x156e   :  { %1605 = vrot.lane.b32.xlu0 %v4749_v13, %s4983_s3  ;;  %v4751_v30 = vpop.eup %4750 }
0x156f   :  { %v1596_v32 = vadd.f32 1.0, %v4751_v30 }
0x1571   :  { %4752 = vrcp.f32 %v1596_v32 }
0x157b   :  { %v4753_v34 = vpop.eup %4752 }
0x157c   :  { %v1603_v52 = vmul.f32 0.0, %v4753_v34 }
0x15e0   :  { %v1606_v33 = vpop.permute.xlu0 %1605 }
0x15e1   :  { %v1608_v35 = vmul.f32 %v4753_v34, %v1606_v33 }
0x15e3   :  { %1610 = vrot.lane.b32.xlu1 %v1608_v35, %s4983_s3 }
0x1655   :  { %v1611_v37 = vpop.permute.xlu1 %1610 }
0x1656   :  { %v1613_v54 = vadd.f32 %v1611_v37, %v1603_v52 }
0x1658   :  { %4754 = vtanh.f32 %v1613_v54 }
0x1659   :  { %4756 = vpow2.f32 %v3926_v56 }
0x1662   :  { %v4755_v55 = vpop.eup %4754 }
0x1663   :  { %1616 = vrot.lane.b32.xlu0 %v4755_v55, %s4983_s3  ;;  %v4757_v57 = vpop.eup %4756 }
0x1664   :  { %v1597_v58 = vadd.f32 1.0, %v4757_v57 }
0x1666   :  { %4758 = vrcp.f32 %v1597_v58 }
0x1670   :  { %v4759_v59 = vpop.eup %4758 }
0x16d5   :  { %v1617_v60 = vpop.permute.xlu0 %1616 }
0x16d6   :  { %v1619_v61 = vmul.f32 %v4759_v59, %v1617_v60 }
0x16d8   :  { %v1699_v63 = vpack.c.bf16 %v1619_v61, %v1619_v61  ;;  %4165 = vmatmul.mubr.msk.f32.vlgmr.msra.gmra.mrb[26].mxu0 %vm707_vm1, %v1619_v61 }
0x16d9   :  { %4463 = vmatpush3.bf16.msra.mxu0 %v5555_v43  ;;  %4183 = vmatprep.mubr.msk.f32.mxu0 %vm4989_vm2, %v4978_v0 }
0x16da   :  { %3929 = vmatmul.mubr.msk.bf16.vlgmr.msra.gmra.mrb[32].mxu1 %vm707_vm1, %v1699_v63  ;;  %4464 = vmatprep.subr.bf16.mxu0 %v4988_v31 }
0x16db   :  { %1854 = vmatpush1.bf16.msra.mxu1 %v5470_v62  ;;  %1885 = vmatprep.mubr.bf16.mxu1 %v4982_v21 }
0x16dc   :  { %1855 = vmatprep.subr.bf16.mxu1 %v5472_v14 }
0x16dd   :  { %4466 = vmatpush3.bf16.msra.mxu0 %v5561_v48 }
0x16de   :  { %4467 = vmatprep.subr.bf16.mxu0 %v4988_v31 }
0x16df   :  { %1856 = vmatpush1.bf16.msra.mxu1 %v5488_v8 }
0x16e0   :  { %1857 = vmatprep.subr.bf16.mxu1 %v5492_v20 }
0x16e1   :  { %4469 = vmatpush3.bf16.msra.mxu0 %v5571_v39 }
0x16e2   :  { %4470 = vmatprep.subr.bf16.mxu0 %v4988_v31 }
0x16e3   :  { %1858 = vmatpush1.bf16.msra.mxu1 %v5507_v46 }
0x16e4   :  { %1859 = vmatprep.subr.bf16.mxu1 %v5510_v29 }
0x16e5   :  { %4472 = vmatpush3.bf16.msra.mxu0 %v5581_v36 }
0x16e6   :  { %4473 = vmatprep.subr.bf16.mxu0 %v4988_v31 }
0x16e7   :  { %1860 = vmatpush1.bf16.msra.mxu1 %v5519_v24 }
0x16e8   :  { %2003 = vmatprep.subr.bf16.mxu1 %v5451_v53 }
0x17ab   :  { %v5608_v4 = vpop.f32.mrb[26].mxu0 }
0x17ac   :  { %v4166_v6 = vpop.f32.mrb[27].mxu0 }
0x17ad   :  { %v1737_v7 = vpop.f32.mrb[32].mxu1 }
0x17ae   :  { %v1739_v15 = vpop.f32.mrb[33].mxu1  ;;  %v1744_v28 = vadd.f32 %v1737_v7, %v5542_v17 }
0x17af   :  { %v1745_v22 = vadd.f32 %v1739_v15, %v5536_v9  ;;  %v1741_v27 = vpop.f32.mrb[34].mxu1 }
0x17b0   :  { %v1742_v45 = vpop.f32.mrb[35].mxu1  ;;  %v3930_v19 = vmul.f32 -1.442695, %v1744_v28 }
0x17b1   :  { %4760 = vtanh.f32 %v1745_v22  ;;  %v3931_v13 = vmul.f32 -1.442695, %v1745_v22 }
0x17b2   :  { %4762 = vpow2.f32 %v3930_v19 }
0x17bb   :  { %v4761_v26 = vpop.eup %4760 }
0x17bc   :  { %1761 = vrot.lane.b32.xlu1 %v4761_v26, %s4983_s3  ;;  %v4763_v1 = vpop.eup %4762 }
0x17bd   :  { %v1752_v25 = vadd.f32 1.0, %v4763_v1 }
0x17bf   :  { %4764 = vrcp.f32 %v1752_v25 }
0x17c9   :  { %v4765_v23 = vpop.eup %4764 }
0x17ca   :  { %v1759_v3 = vmul.f32 %v4765_v23, %v1613_v54 }
0x182e   :  { %v1762_v5 = vpop.permute.xlu1 %1761 }
0x182f   :  { %v1764_v2 = vmul.f32 %v4765_v23, %v1762_v5 }
0x1831   :  { %1766 = vrot.lane.b32.xlu0 %v1764_v2, %s4983_s3 }
0x18a3   :  { %v1767_v10 = vpop.permute.xlu0 %1766 }
0x18a4   :  { %v1769_v11 = vadd.f32 %v1767_v10, %v1759_v3 }
0x18a6   :  { %4766 = vtanh.f32 %v1769_v11 }
0x18a7   :  { %4768 = vpow2.f32 %v3931_v13 }
0x18b0   :  { %v4767_v12 = vpop.eup %4766 }
0x18b1   :  { %1772 = vrot.lane.b32.xlu1 %v4767_v12, %s4983_s3  ;;  %v4769_v16 = vpop.eup %4768 }
0x18b2   :  { %v1753_v44 = vadd.f32 1.0, %v4769_v16 }
0x18b4   :  { %4770 = vrcp.f32 %v1753_v44 }
0x18be   :  { %v4771_v18 = vpop.eup %4770 }
0x1923   :  { %v1773_v30 = vpop.permute.xlu1 %1772 }
0x1924   :  { %v1775_v32 = vmul.f32 %v4771_v18, %v1773_v30 }
0x1926   :  { %v1849_v34 = vpack.c.bf16 %v1775_v32, %v1775_v32  ;;  %4184 = vmatmul.mubr.msk.f32.vlgmr.msra.gmra.mrb[28].mxu0 %vm707_vm1, %v1775_v32 }
0x1927   :  { %4475 = vmatpush3.bf16.msra.mxu0 %v5555_v43  ;;  %4202 = vmatprep.mubr.msk.f32.mxu0 %vm4989_vm2, %v4978_v0 }
0x1928   :  { %3933 = vmatmul.mubr.msk.bf16.vlgmr.msra.gmra.mrb[36].mxu1 %vm707_vm1, %v1849_v34  ;;  %4476 = vmatprep.subr.bf16.mxu0 %v4988_v31 }
0x1929   :  { %2004 = vmatpush1.bf16.msra.mxu1 %v5470_v62  ;;  %2035 = vmatprep.mubr.bf16.mxu1 %v4982_v21 }
0x192a   :  { %2005 = vmatprep.subr.bf16.mxu1 %v5472_v14 }
0x192b   :  { %4478 = vmatpush3.bf16.msra.mxu0 %v5561_v48 }
0x192c   :  { %4479 = vmatprep.subr.bf16.mxu0 %v4988_v31 }
0x192d   :  { %2006 = vmatpush1.bf16.msra.mxu1 %v5488_v8 }
0x192e   :  { %2007 = vmatprep.subr.bf16.mxu1 %v5492_v20 }
0x192f   :  { %4481 = vmatpush3.bf16.msra.mxu0 %v5571_v39 }
0x1930   :  { %4482 = vmatprep.subr.bf16.mxu0 %v4988_v31 }
0x1931   :  { %2008 = vmatpush1.bf16.msra.mxu1 %v5507_v46 }
0x1932   :  { %2009 = vmatprep.subr.bf16.mxu1 %v5510_v29 }
0x1933   :  { %4484 = vmatpush3.bf16.msra.mxu0 %v5581_v36 }
0x1934   :  { %4485 = vmatprep.subr.bf16.mxu0 %v4988_v31 }
0x1935   :  { %2010 = vmatpush1.bf16.msra.mxu1 %v5519_v24 }
0x1936   :  { %2153 = vmatprep.subr.bf16.mxu1 %v5451_v53 }
0x19f9   :  { %v5636_v33 = vpop.f32.mrb[28].mxu0 }
0x19fa   :  { %v4185_v35 = vpop.f32.mrb[29].mxu0 }
0x19fb   :  { %v1887_v38 = vpop.f32.mrb[36].mxu1 }
0x19fc   :  { %v1889_v41 = vpop.f32.mrb[37].mxu1  ;;  %v1894_v51 = vadd.f32 %v1887_v38, %v5542_v17 }
0x19fd   :  { %v1895_v42 = vadd.f32 %v1889_v41, %v5536_v9  ;;  %v1891_v47 = vpop.f32.mrb[38].mxu1 }
0x19fe   :  { %v1892_v49 = vpop.f32.mrb[39].mxu1  ;;  %v3934_v40 = vmul.f32 -1.442695, %v1894_v51 }
0x19ff   :  { %4772 = vtanh.f32 %v1895_v42  ;;  %v3935_v61 = vmul.f32 -1.442695, %v1895_v42 }
0x1a00   :  { %4774 = vpow2.f32 %v3934_v40 }
0x1a09   :  { %v4773_v50 = vpop.eup %4772 }
0x1a0a   :  { %1911 = vrot.lane.b32.xlu0 %v4773_v50, %s4983_s3  ;;  %v4775_v52 = vpop.eup %4774 }
0x1a0b   :  { %v1902_v37 = vadd.f32 1.0, %v4775_v52 }
0x1a0d   :  { %4776 = vrcp.f32 %v1902_v37 }
0x1a17   :  { %v4777_v54 = vpop.eup %4776 }
0x1a18   :  { %v1909_v57 = vmul.f32 %v4777_v54, %v1769_v11 }
0x1a7c   :  { %v1912_v55 = vpop.permute.xlu0 %1911 }
0x1a7d   :  { %v1914_v56 = vmul.f32 %v4777_v54, %v1912_v55 }
0x1a7f   :  { %1916 = vrot.lane.b32.xlu1 %v1914_v56, %s4983_s3 }
0x1af1   :  { %v1917_v58 = vpop.permute.xlu1 %1916 }
0x1af2   :  { %v1919_v59 = vadd.f32 %v1917_v58, %v1909_v57 }
0x1af4   :  { %4778 = vtanh.f32 %v1919_v59 }
0x1af5   :  { %4780 = vpow2.f32 %v3935_v61 }
0x1afe   :  { %v4779_v60 = vpop.eup %4778 }
0x1aff   :  { %1922 = vrot.lane.b32.xlu0 %v4779_v60, %s4983_s3  ;;  %v4781_v63 = vpop.eup %4780 }
0x1b00   :  { %v1903_v6 = vadd.f32 1.0, %v4781_v63 }
0x1b02   :  { %4782 = vrcp.f32 %v1903_v6 }
0x1b0c   :  { %v4783_v7 = vpop.eup %4782 }
0x1b71   :  { %v1923_v15 = vpop.permute.xlu0 %1922 }
0x1b72   :  { %v1925_v22 = vmul.f32 %v4783_v7, %v1923_v15 }
0x1b74   :  { %v1999_v27 = vpack.c.bf16 %v1925_v22, %v1925_v22  ;;  %4203 = vmatmul.mubr.msk.f32.vlgmr.msra.gmra.mrb[30].mxu0 %vm707_vm1, %v1925_v22 }
0x1b75   :  { %4487 = vmatpush3.bf16.msra.mxu0 %v5555_v43  ;;  %4221 = vmatprep.mubr.msk.f32.mxu0 %vm4989_vm2, %v4978_v0 }
0x1b76   :  { %3937 = vmatmul.mubr.msk.bf16.vlgmr.msra.gmra.mrb[40].mxu1 %vm707_vm1, %v1999_v27  ;;  %4488 = vmatprep.subr.bf16.mxu0 %v4988_v31 }
0x1b77   :  { %2154 = vmatpush1.bf16.msra.mxu1 %v5470_v62  ;;  %2185 = vmatprep.mubr.bf16.mxu1 %v4982_v21 }
0x1b78   :  { %2155 = vmatprep.subr.bf16.mxu1 %v5472_v14 }
0x1b79   :  { %4490 = vmatpush3.bf16.msra.mxu0 %v5561_v48 }
0x1b7a   :  { %4491 = vmatprep.subr.bf16.mxu0 %v4988_v31 }
0x1b7b   :  { %2156 = vmatpush1.bf16.msra.mxu1 %v5488_v8 }
0x1b7c   :  { %2157 = vmatprep.subr.bf16.mxu1 %v5492_v20 }
0x1b7d   :  { %4493 = vmatpush3.bf16.msra.mxu0 %v5571_v39 }
0x1b7e   :  { %4494 = vmatprep.subr.bf16.mxu0 %v4988_v31 }
0x1b7f   :  { %2158 = vmatpush1.bf16.msra.mxu1 %v5507_v46 }
0x1b80   :  { %2159 = vmatprep.subr.bf16.mxu1 %v5510_v29 }
0x1b81   :  { %4496 = vmatpush3.bf16.msra.mxu0 %v5581_v36 }
0x1b82   :  { %4497 = vmatprep.subr.bf16.mxu0 %v4988_v31 }
0x1b83   :  { %2160 = vmatpush1.bf16.msra.mxu1 %v5519_v24 }
0x1b84   :  { %2303 = vmatprep.subr.bf16.mxu1 %v5451_v53 }
0x1c47   :  { %v5664_v45 = vpop.f32.mrb[30].mxu0 }
0x1c48   :  { %v4204_v26 = vpop.f32.mrb[31].mxu0 }
0x1c49   :  { %v2037_v28 = vpop.f32.mrb[40].mxu1 }
0x1c4a   :  { %v2039_v19 = vpop.f32.mrb[41].mxu1  ;;  %v2044_v2 = vadd.f32 %v2037_v28, %v5542_v17 }
0x1c4b   :  { %v2045_v1 = vadd.f32 %v2039_v19, %v5536_v9  ;;  %v2041_v25 = vpop.f32.mrb[42].mxu1 }
0x1c4c   :  { %v2042_v23 = vpop.f32.mrb[43].mxu1  ;;  %v3938_v3 = vmul.f32 -1.442695, %v2044_v2 }
0x1c4d   :  { %4784 = vtanh.f32 %v2045_v1  ;;  %v3939_v34 = vmul.f32 -1.442695, %v2045_v1 }
0x1c4e   :  { %4786 = vpow2.f32 %v3938_v3 }
0x1c57   :  { %v4785_v5 = vpop.eup %4784 }
0x1c58   :  { %2061 = vrot.lane.b32.xlu1 %v4785_v5, %s4983_s3  ;;  %v4787_v10 = vpop.eup %4786 }
0x1c59   :  { %v2052_v11 = vadd.f32 1.0, %v4787_v10 }
0x1c5b   :  { %4788 = vrcp.f32 %v2052_v11 }
0x1c65   :  { %v4789_v12 = vpop.eup %4788 }
0x1c66   :  { %v2059_v44 = vmul.f32 %v4789_v12, %v1919_v59 }
0x1cca   :  { %v2062_v13 = vpop.permute.xlu1 %2061 }
0x1ccb   :  { %v2064_v16 = vmul.f32 %v4789_v12, %v2062_v13 }
0x1ccd   :  { %2066 = vrot.lane.b32.xlu0 %v2064_v16, %s4983_s3 }
0x1d3f   :  { %v2067_v18 = vpop.permute.xlu0 %2066 }
0x1d40   :  { %v2069_v30 = vadd.f32 %v2067_v18, %v2059_v44 }
0x1d42   :  { %4790 = vtanh.f32 %v2069_v30 }
0x1d43   :  { %4792 = vpow2.f32 %v3939_v34 }
0x1d4c   :  { %v4791_v32 = vpop.eup %4790 }
0x1d4d   :  { %2072 = vrot.lane.b32.xlu1 %v4791_v32, %s4983_s3  ;;  %v4793_v35 = vpop.eup %4792 }
0x1d4e   :  { %v2053_v38 = vadd.f32 1.0, %v4793_v35 }
0x1d50   :  { %4794 = vrcp.f32 %v2053_v38 }
0x1d5a   :  { %v4795_v41 = vpop.eup %4794 }
0x1dbf   :  { %v2073_v42 = vpop.permute.xlu1 %2072 }
0x1dc0   :  { %v2075_v47 = vmul.f32 %v4795_v41, %v2073_v42 }
0x1dc2   :  { %v2149_v49 = vpack.c.bf16 %v2075_v47, %v2075_v47  ;;  %4222 = vmatmul.mubr.msk.f32.vlgmr.msra.gmra.mrb[32].mxu0 %vm707_vm1, %v2075_v47 }
0x1dc3   :  { %4499 = vmatpush3.bf16.msra.mxu0 %v5555_v43  ;;  %4240 = vmatprep.mubr.msk.f32.mxu0 %vm4989_vm2, %v4978_v0 }
0x1dc4   :  { %3941 = vmatmul.mubr.msk.bf16.vlgmr.msra.gmra.mrb[44].mxu1 %vm707_vm1, %v2149_v49  ;;  %4500 = vmatprep.subr.bf16.mxu0 %v4988_v31 }
0x1dc5   :  { %2304 = vmatpush1.bf16.msra.mxu1 %v5470_v62  ;;  %2335 = vmatprep.mubr.bf16.mxu1 %v4982_v21 }
0x1dc6   :  { %2305 = vmatprep.subr.bf16.mxu1 %v5472_v14 }
0x1dc7   :  { %4502 = vmatpush3.bf16.msra.mxu0 %v5561_v48 }
0x1dc8   :  { %4503 = vmatprep.subr.bf16.mxu0 %v4988_v31 }
0x1dc9   :  { %2306 = vmatpush1.bf16.msra.mxu1 %v5488_v8 }
0x1dca   :  { %2307 = vmatprep.subr.bf16.mxu1 %v5492_v20 }
0x1dcb   :  { %4505 = vmatpush3.bf16.msra.mxu0 %v5571_v39 }
0x1dcc   :  { %4506 = vmatprep.subr.bf16.mxu0 %v4988_v31 }
0x1dcd   :  { %2308 = vmatpush1.bf16.msra.mxu1 %v5507_v46 }
0x1dce   :  { %2309 = vmatprep.subr.bf16.mxu1 %v5510_v29 }
0x1dcf   :  { %4508 = vmatpush3.bf16.msra.mxu0 %v5581_v36 }
0x1dd0   :  { %4509 = vmatprep.subr.bf16.mxu0 %v4988_v31 }
0x1dd1   :  { %2310 = vmatpush1.bf16.msra.mxu1 %v5519_v24 }
0x1dd2   :  { %2453 = vmatprep.subr.bf16.mxu1 %v5451_v53 }
0x1e95   :  { %v5692_v50 = vpop.f32.mrb[32].mxu0 }
0x1e96   :  { %v4223_v51 = vpop.f32.mrb[33].mxu0 }
0x1e97   :  { %v2187_v40 = vpop.f32.mrb[44].mxu1 }
0x1e98   :  { %v2189_v52 = vpop.f32.mrb[45].mxu1  ;;  %v2194_v57 = vadd.f32 %v2187_v40, %v5542_v17 }
0x1e99   :  { %v2195_v37 = vadd.f32 %v2189_v52, %v5536_v9  ;;  %v2191_v54 = vpop.f32.mrb[46].mxu1 }
0x1e9a   :  { %v2192_v55 = vpop.f32.mrb[47].mxu1  ;;  %v3942_v58 = vmul.f32 -1.442695, %v2194_v57 }
0x1e9b   :  { %4796 = vtanh.f32 %v2195_v37  ;;  %v3943_v26 = vmul.f32 -1.442695, %v2195_v37 }
0x1e9c   :  { %4798 = vpow2.f32 %v3942_v58 }
0x1ea5   :  { %v4797_v56 = vpop.eup %4796 }
0x1ea6   :  { %2211 = vrot.lane.b32.xlu0 %v4797_v56, %s4983_s3  ;;  %v4799_v59 = vpop.eup %4798 }
0x1ea7   :  { %v2202_v60 = vadd.f32 1.0, %v4799_v59 }
0x1ea9   :  { %4800 = vrcp.f32 %v2202_v60 }
0x1eb3   :  { %v4801_v61 = vpop.eup %4800 }
0x1eb4   :  { %v2209_v7 = vmul.f32 %v4801_v61, %v2069_v30 }
0x1f18   :  { %v2212_v63 = vpop.permute.xlu0 %2211 }
0x1f19   :  { %v2214_v6 = vmul.f32 %v4801_v61, %v2212_v63 }
0x1f1b   :  { %2216 = vrot.lane.b32.xlu1 %v2214_v6, %s4983_s3 }
0x1f8d   :  { %v2217_v15 = vpop.permute.xlu1 %2216 }
0x1f8e   :  { %v2219_v22 = vadd.f32 %v2217_v15, %v2209_v7 }
0x1f90   :  { %4802 = vtanh.f32 %v2219_v22 }
0x1f91   :  { %4804 = vpow2.f32 %v3943_v26 }
0x1f9a   :  { %v4803_v27 = vpop.eup %4802 }
0x1f9b   :  { %2222 = vrot.lane.b32.xlu0 %v4803_v27, %s4983_s3  ;;  %v4805_v28 = vpop.eup %4804 }
0x1f9c   :  { %v2203_v19 = vadd.f32 1.0, %v4805_v28 }
0x1f9e   :  { %4806 = vrcp.f32 %v2203_v19 }
0x1fa8   :  { %v4807_v1 = vpop.eup %4806 }
0x200d   :  { %v2223_v25 = vpop.permute.xlu0 %2222 }
0x200e   :  { %v2225_v23 = vmul.f32 %v4807_v1, %v2223_v25 }
0x2010   :  { %v2299_v5 = vpack.c.bf16 %v2225_v23, %v2225_v23  ;;  %4241 = vmatmul.mubr.msk.f32.vlgmr.msra.gmra.mrb[34].mxu0 %vm707_vm1, %v2225_v23 }
0x2011   :  { %4511 = vmatpush3.bf16.msra.mxu0 %v5555_v43  ;;  %4259 = vmatprep.mubr.msk.f32.mxu0 %vm4989_vm2, %v4978_v0 }
0x2012   :  { %3945 = vmatmul.mubr.msk.bf16.vlgmr.msra.gmra.mrb[48].mxu1 %vm707_vm1, %v2299_v5  ;;  %4512 = vmatprep.subr.bf16.mxu0 %v4988_v31 }
0x2013   :  { %2454 = vmatpush1.bf16.msra.mxu1 %v5470_v62  ;;  %2485 = vmatprep.mubr.bf16.mxu1 %v4982_v21 }
0x2014   :  { %2455 = vmatprep.subr.bf16.mxu1 %v5472_v14 }
0x2015   :  { %4514 = vmatpush3.bf16.msra.mxu0 %v5561_v48 }
0x2016   :  { %4515 = vmatprep.subr.bf16.mxu0 %v4988_v31 }
0x2017   :  { %2456 = vmatpush1.bf16.msra.mxu1 %v5488_v8 }
0x2018   :  { %2457 = vmatprep.subr.bf16.mxu1 %v5492_v20 }
0x2019   :  { %4517 = vmatpush3.bf16.msra.mxu0 %v5571_v39 }
0x201a   :  { %4518 = vmatprep.subr.bf16.mxu0 %v4988_v31 }
0x201b   :  { %2458 = vmatpush1.bf16.msra.mxu1 %v5507_v46 }
0x201c   :  { %2459 = vmatprep.subr.bf16.mxu1 %v5510_v29 }
0x201d   :  { %4520 = vmatpush3.bf16.msra.mxu0 %v5581_v36 }
0x201e   :  { %4521 = vmatprep.subr.bf16.mxu0 %v4988_v31 }
0x201f   :  { %2460 = vmatpush1.bf16.msra.mxu1 %v5519_v24 }
0x2020   :  { %2603 = vmatprep.subr.bf16.mxu1 %v5451_v53 }
0x20e3   :  { %v5720_v2 = vpop.f32.mrb[34].mxu0 }
0x20e4   :  { %v4242_v3 = vpop.f32.mrb[35].mxu0 }
0x20e5   :  { %v2337_v10 = vpop.f32.mrb[48].mxu1 }
0x20e6   :  { %v2339_v11 = vpop.f32.mrb[49].mxu1  ;;  %v2344_v18 = vadd.f32 %v2337_v10, %v5542_v17 }
0x20e7   :  { %v2345_v12 = vadd.f32 %v2339_v11, %v5536_v9  ;;  %v2341_v13 = vpop.f32.mrb[50].mxu1 }
0x20e8   :  { %v2342_v16 = vpop.f32.mrb[51].mxu1  ;;  %v3946_v30 = vmul.f32 -1.442695, %v2344_v18 }
0x20e9   :  { %4808 = vtanh.f32 %v2345_v12  ;;  %v3947_v40 = vmul.f32 -1.442695, %v2345_v12 }
0x20ea   :  { %4810 = vpow2.f32 %v3946_v30 }
0x20f3   :  { %v4809_v44 = vpop.eup %4808 }
0x20f4   :  { %2361 = vrot.lane.b32.xlu1 %v4809_v44, %s4983_s3  ;;  %v4811_v32 = vpop.eup %4810 }
0x20f5   :  { %v2352_v34 = vadd.f32 1.0, %v4811_v32 }
0x20f7   :  { %4812 = vrcp.f32 %v2352_v34 }
0x2101   :  { %v4813_v35 = vpop.eup %4812 }
0x2102   :  { %v2359_v42 = vmul.f32 %v4813_v35, %v2219_v22 }
0x2166   :  { %v2362_v38 = vpop.permute.xlu1 %2361 }
0x2167   :  { %v2364_v41 = vmul.f32 %v4813_v35, %v2362_v38 }
0x2169   :  { %2366 = vrot.lane.b32.xlu0 %v2364_v41, %s4983_s3 }
0x21db   :  { %v2367_v47 = vpop.permute.xlu0 %2366 }
0x21dc   :  { %v2369_v49 = vadd.f32 %v2367_v47, %v2359_v42 }
0x21de   :  { %4814 = vtanh.f32 %v2369_v49 }
0x21df   :  { %4816 = vpow2.f32 %v3947_v40 }
0x21e8   :  { %v4815_v51 = vpop.eup %4814 }
0x21e9   :  { %2372 = vrot.lane.b32.xlu1 %v4815_v51, %s4983_s3  ;;  %v4817_v52 = vpop.eup %4816 }
0x21ea   :  { %v2353_v37 = vadd.f32 1.0, %v4817_v52 }
0x21ec   :  { %4818 = vrcp.f32 %v2353_v37 }
0x21f6   :  { %v4819_v54 = vpop.eup %4818 }
0x225b   :  { %v2373_v55 = vpop.permute.xlu1 %2372 }
0x225c   :  { %v2375_v56 = vmul.f32 %v4819_v54, %v2373_v55 }
0x225e   :  { %v2449_v57 = vpack.c.bf16 %v2375_v56, %v2375_v56  ;;  %4260 = vmatmul.mubr.msk.f32.vlgmr.msra.gmra.mrb[36].mxu0 %vm707_vm1, %v2375_v56 }
0x225f   :  { %4523 = vmatpush3.bf16.msra.mxu0 %v5555_v43  ;;  %4278 = vmatprep.mubr.msk.f32.mxu0 %vm4989_vm2, %v4978_v0 }
0x2260   :  { %3949 = vmatmul.mubr.msk.bf16.vlgmr.msra.gmra.mrb[52].mxu1 %vm707_vm1, %v2449_v57  ;;  %4524 = vmatprep.subr.bf16.mxu0 %v4988_v31 }
0x2261   :  { %2604 = vmatpush1.bf16.msra.mxu1 %v5470_v62  ;;  %2635 = vmatprep.mubr.bf16.mxu1 %v4982_v21 }
0x2262   :  { %2605 = vmatprep.subr.bf16.mxu1 %v5472_v14 }
0x2263   :  { %4526 = vmatpush3.bf16.msra.mxu0 %v5561_v48 }
0x2264   :  { %4527 = vmatprep.subr.bf16.mxu0 %v4988_v31 }
0x2265   :  { %2606 = vmatpush1.bf16.msra.mxu1 %v5488_v8 }
0x2266   :  { %2607 = vmatprep.subr.bf16.mxu1 %v5492_v20 }
0x2267   :  { %4529 = vmatpush3.bf16.msra.mxu0 %v5571_v39 }
0x2268   :  { %4530 = vmatprep.subr.bf16.mxu0 %v4988_v31 }
0x2269   :  { %2608 = vmatpush1.bf16.msra.mxu1 %v5507_v46 }
0x226a   :  { %2609 = vmatprep.subr.bf16.mxu1 %v5510_v29 }
0x226b   :  { %4532 = vmatpush3.bf16.msra.mxu0 %v5581_v36 }
0x226c   :  { %4533 = vmatprep.subr.bf16.mxu0 %v4988_v31 }
0x226d   :  { %2610 = vmatpush1.bf16.msra.mxu1 %v5519_v24 }
0x226e   :  { %2753 = vmatprep.subr.bf16.mxu1 %v5451_v53 }
0x2331   :  { %v5748_v58 = vpop.f32.mrb[36].mxu0 }
0x2332   :  { %v4261_v59 = vpop.f32.mrb[37].mxu0 }
0x2333   :  { %v2487_v60 = vpop.f32.mrb[52].mxu1 }
0x2334   :  { %v2489_v61 = vpop.f32.mrb[53].mxu1  ;;  %v2494_v22 = vadd.f32 %v2487_v60, %v5542_v17 }
0x2335   :  { %v2495_v63 = vadd.f32 %v2489_v61, %v5536_v9  ;;  %v2491_v6 = vpop.f32.mrb[54].mxu1 }
0x2336   :  { %v2492_v7 = vpop.f32.mrb[55].mxu1  ;;  %v3950_v27 = vmul.f32 -1.442695, %v2494_v22 }
0x2337   :  { %4820 = vtanh.f32 %v2495_v63  ;;  %v3951_v11 = vmul.f32 -1.442695, %v2495_v63 }
0x2338   :  { %4822 = vpow2.f32 %v3950_v27 }
0x2341   :  { %v4821_v15 = vpop.eup %4820 }
0x2342   :  { %2511 = vrot.lane.b32.xlu0 %v4821_v15, %s4983_s3  ;;  %v4823_v26 = vpop.eup %4822 }
0x2343   :  { %v2502_v28 = vadd.f32 1.0, %v4823_v26 }
0x2345   :  { %4824 = vrcp.f32 %v2502_v28 }
0x234f   :  { %v4825_v19 = vpop.eup %4824 }
0x2350   :  { %v2509_v23 = vmul.f32 %v4825_v19, %v2369_v49 }
0x23b4   :  { %v2512_v1 = vpop.permute.xlu0 %2511 }
0x23b5   :  { %v2514_v25 = vmul.f32 %v4825_v19, %v2512_v1 }
0x23b7   :  { %2516 = vrot.lane.b32.xlu1 %v2514_v25, %s4983_s3 }
0x2429   :  { %v2517_v5 = vpop.permute.xlu1 %2516 }
0x242a   :  { %v2519_v3 = vadd.f32 %v2517_v5, %v2509_v23 }
0x242c   :  { %4826 = vtanh.f32 %v2519_v3 }
0x242d   :  { %4828 = vpow2.f32 %v3951_v11 }
0x2436   :  { %v4827_v10 = vpop.eup %4826 }
0x2437   :  { %2522 = vrot.lane.b32.xlu0 %v4827_v10, %s4983_s3  ;;  %v4829_v12 = vpop.eup %4828 }
0x2438   :  { %v2503_v13 = vadd.f32 1.0, %v4829_v12 }
0x243a   :  { %4830 = vrcp.f32 %v2503_v13 }
0x2444   :  { %v4831_v16 = vpop.eup %4830 }
0x24a9   :  { %v2523_v44 = vpop.permute.xlu0 %2522 }
0x24aa   :  { %v2525_v18 = vmul.f32 %v4831_v16, %v2523_v44 }
0x24ac   :  { %v2599_v30 = vpack.c.bf16 %v2525_v18, %v2525_v18  ;;  %4279 = vmatmul.mubr.msk.f32.vlgmr.msra.gmra.mrb[38].mxu0 %vm707_vm1, %v2525_v18 }
0x24ad   :  { %4535 = vmatpush3.bf16.msra.mxu0 %v5555_v43  ;;  %4297 = vmatprep.mubr.msk.f32.mxu0 %vm4989_vm2, %v4978_v0 }
0x24ae   :  { %3953 = vmatmul.mubr.msk.bf16.vlgmr.msra.gmra.mrb[56].mxu1 %vm707_vm1, %v2599_v30  ;;  %4536 = vmatprep.subr.bf16.mxu0 %v4988_v31 }
0x24af   :  { %2754 = vmatpush1.bf16.msra.mxu1 %v5470_v62  ;;  %2785 = vmatprep.mubr.bf16.mxu1 %v4982_v21 }
0x24b0   :  { %2755 = vmatprep.subr.bf16.mxu1 %v5472_v14 }
0x24b1   :  { %4538 = vmatpush3.bf16.msra.mxu0 %v5561_v48 }
0x24b2   :  { %4539 = vmatprep.subr.bf16.mxu0 %v4988_v31 }
0x24b3   :  { %2756 = vmatpush1.bf16.msra.mxu1 %v5488_v8 }
0x24b4   :  { %2757 = vmatprep.subr.bf16.mxu1 %v5492_v20 }
0x24b5   :  { %4541 = vmatpush3.bf16.msra.mxu0 %v5571_v39 }
0x24b6   :  { %4542 = vmatprep.subr.bf16.mxu0 %v4988_v31 }
0x24b7   :  { %2758 = vmatpush1.bf16.msra.mxu1 %v5507_v46 }
0x24b8   :  { %2759 = vmatprep.subr.bf16.mxu1 %v5510_v29 }
0x24b9   :  { %4544 = vmatpush3.bf16.msra.mxu0 %v5581_v36 }
0x24ba   :  { %4545 = vmatprep.subr.bf16.mxu0 %v4988_v31 }
0x24bb   :  { %2760 = vmatpush1.bf16.msra.mxu1 %v5519_v24 }
0x24bc   :  { %2903 = vmatprep.subr.bf16.mxu1 %v5451_v53 }
0x257f   :  { %v5776_v32 = vpop.f32.mrb[38].mxu0 }
0x2580   :  { %v4280_v34 = vpop.f32.mrb[39].mxu0 }
0x2581   :  { %v2637_v35 = vpop.f32.mrb[56].mxu1 }
0x2582   :  { %v2639_v38 = vpop.f32.mrb[57].mxu1  ;;  %v2644_v51 = vadd.f32 %v2637_v35, %v5542_v17 }
0x2583   :  { %v2645_v41 = vadd.f32 %v2639_v38, %v5536_v9  ;;  %v2641_v42 = vpop.f32.mrb[58].mxu1 }
0x2584   :  { %v2642_v47 = vpop.f32.mrb[59].mxu1  ;;  %v3954_v40 = vmul.f32 -1.442695, %v2644_v51 }
0x2585   :  { %4832 = vtanh.f32 %v2645_v41  ;;  %v3955_v63 = vmul.f32 -1.442695, %v2645_v41 }
0x2586   :  { %4834 = vpow2.f32 %v3954_v40 }
0x258f   :  { %v4833_v49 = vpop.eup %4832 }
0x2590   :  { %2661 = vrot.lane.b32.xlu1 %v4833_v49, %s4983_s3  ;;  %v4835_v52 = vpop.eup %4834 }
0x2591   :  { %v2652_v37 = vadd.f32 1.0, %v4835_v52 }
0x2593   :  { %4836 = vrcp.f32 %v2652_v37 }
0x259d   :  { %v4837_v54 = vpop.eup %4836 }
0x259e   :  { %v2659_v57 = vmul.f32 %v4837_v54, %v2519_v3 }
0x2602   :  { %v2662_v55 = vpop.permute.xlu1 %2661 }
0x2603   :  { %v2664_v56 = vmul.f32 %v4837_v54, %v2662_v55 }
0x2605   :  { %2666 = vrot.lane.b32.xlu0 %v2664_v56, %s4983_s3 }
0x2677   :  { %v2667_v59 = vpop.permute.xlu0 %2666 }
0x2678   :  { %v2669_v60 = vadd.f32 %v2667_v59, %v2659_v57 }
0x267a   :  { %4838 = vtanh.f32 %v2669_v60 }
0x267b   :  { %4840 = vpow2.f32 %v3955_v63 }
0x2684   :  { %v4839_v61 = vpop.eup %4838 }
0x2685   :  { %2672 = vrot.lane.b32.xlu1 %v4839_v61, %s4983_s3  ;;  %v4841_v6 = vpop.eup %4840 }
0x2686   :  { %v2653_v7 = vadd.f32 1.0, %v4841_v6 }
0x2688   :  { %4842 = vrcp.f32 %v2653_v7 }
0x2692   :  { %v4843_v15 = vpop.eup %4842 }
0x26f7   :  { %v2673_v22 = vpop.permute.xlu1 %2672 }
0x26f8   :  { %v2675_v27 = vmul.f32 %v4843_v15, %v2673_v22 }
0x26fa   :  { %v2749_v26 = vpack.c.bf16 %v2675_v27, %v2675_v27  ;;  %4298 = vmatmul.mubr.msk.f32.vlgmr.msra.gmra.mrb[40].mxu0 %vm707_vm1, %v2675_v27 }
0x26fb   :  { %4547 = vmatpush3.bf16.msra.mxu0 %v5555_v43  ;;  %4316 = vmatprep.mubr.msk.f32.mxu0 %vm4989_vm2, %v4978_v0 }
0x26fc   :  { %3957 = vmatmul.mubr.msk.bf16.vlgmr.msra.gmra.mrb[60].mxu1 %vm707_vm1, %v2749_v26  ;;  %4548 = vmatprep.subr.bf16.mxu0 %v4988_v31 }
0x26fd   :  { %2904 = vmatpush1.bf16.msra.mxu1 %v5470_v62  ;;  %2935 = vmatprep.mubr.bf16.mxu1 %v4982_v21 }
0x26fe   :  { %2905 = vmatprep.subr.bf16.mxu1 %v5472_v14 }
0x26ff   :  { %4550 = vmatpush3.bf16.msra.mxu0 %v5561_v48 }
0x2700   :  { %4551 = vmatprep.subr.bf16.mxu0 %v4988_v31 }
0x2701   :  { %2906 = vmatpush1.bf16.msra.mxu1 %v5488_v8 }
0x2702   :  { %2907 = vmatprep.subr.bf16.mxu1 %v5492_v20 }
0x2703   :  { %4553 = vmatpush3.bf16.msra.mxu0 %v5571_v39 }
0x2704   :  { %4554 = vmatprep.subr.bf16.mxu0 %v4988_v31 }
0x2705   :  { %2908 = vmatpush1.bf16.msra.mxu1 %v5507_v46 }
0x2706   :  { %2909 = vmatprep.subr.bf16.mxu1 %v5510_v29 }
0x2707   :  { %4556 = vmatpush3.bf16.msra.mxu0 %v5581_v36 }
0x2708   :  { %4557 = vmatprep.subr.bf16.mxu0 %v4988_v31 }
0x2709   :  { %2910 = vmatpush1.bf16.msra.mxu1 %v5519_v24 }
0x270a   :  { %3053 = vmatprep.subr.bf16.mxu1 %v5451_v53 }
0x27cd   :  { %v5804_v28 = vpop.f32.mrb[40].mxu0 }
0x27ce   :  { %v4299_v19 = vpop.f32.mrb[41].mxu0 }
0x27cf   :  { %v2787_v1 = vpop.f32.mrb[60].mxu1 }
0x27d0   :  { %v2789_v25 = vpop.f32.mrb[61].mxu1  ;;  %v2794_v11 = vadd.f32 %v2787_v1, %v5542_v17 }
0x27d1   :  { %v2795_v23 = vadd.f32 %v2789_v25, %v5536_v9  ;;  %v2791_v5 = vpop.f32.mrb[62].mxu1 }
0x27d2   :  { %v2792_v3 = vpop.f32.mrb[63].mxu1  ;;  %v3958_v12 = vmul.f32 -1.442695, %v2794_v11 }
0x27d3   :  { %4844 = vtanh.f32 %v2795_v23  ;;  %v3959_v42 = vmul.f32 -1.442695, %v2795_v23 }
0x27d4   :  { %4846 = vpow2.f32 %v3958_v12 }
0x27dd   :  { %v4845_v10 = vpop.eup %4844 }
0x27de   :  { %2811 = vrot.lane.b32.xlu0 %v4845_v10, %s4983_s3  ;;  %v4847_v13 = vpop.eup %4846 }
0x27df   :  { %v2802_v16 = vadd.f32 1.0, %v4847_v13 }
0x27e1   :  { %4848 = vrcp.f32 %v2802_v16 }
0x27eb   :  { %v4849_v44 = vpop.eup %4848 }
0x27ec   :  { %v2809_v34 = vmul.f32 %v4849_v44, %v2669_v60 }
0x2850   :  { %v2812_v18 = vpop.permute.xlu0 %2811 }
0x2851   :  { %v2814_v30 = vmul.f32 %v4849_v44, %v2812_v18 }
0x2853   :  { %2816 = vrot.lane.b32.xlu1 %v2814_v30, %s4983_s3 }
0x28c5   :  { %v2817_v35 = vpop.permute.xlu1 %2816 }
0x28c6   :  { %v2819_v38 = vadd.f32 %v2817_v35, %v2809_v34 }
0x28c8   :  { %4850 = vtanh.f32 %v2819_v38 }
0x28c9   :  { %4852 = vpow2.f32 %v3959_v42 }
0x28d2   :  { %v4851_v41 = vpop.eup %4850 }
0x28d3   :  { %2822 = vrot.lane.b32.xlu0 %v4851_v41, %s4983_s3  ;;  %v4853_v47 = vpop.eup %4852 }
0x28d4   :  { %v2803_v49 = vadd.f32 1.0, %v4853_v47 }
0x28d6   :  { %4854 = vrcp.f32 %v2803_v49 }
0x28e0   :  { %v4855_v51 = vpop.eup %4854 }
0x2945   :  { %v2823_v40 = vpop.permute.xlu0 %2822 }
0x2946   :  { %v2825_v52 = vmul.f32 %v4855_v51, %v2823_v40 }
0x2948   :  { %v2899_v37 = vpack.c.bf16 %v2825_v52, %v2825_v52  ;;  %4317 = vmatmul.mubr.msk.f32.vlgmr.msra.gmra.mrb[42].mxu0 %vm707_vm1, %v2825_v52 }
0x2949   :  { %4559 = vmatpush3.bf16.msra.mxu0 %v5555_v43  ;;  %4335 = vmatprep.mubr.msk.f32.mxu0 %vm4989_vm2, %v4978_v0 }
0x294a   :  { %3961 = vmatmul.mubr.msk.bf16.vlgmr.msra.gmra.mrb[64].mxu1 %vm707_vm1, %v2899_v37  ;;  %4560 = vmatprep.subr.bf16.mxu0 %v4988_v31 }
0x294b   :  { %3054 = vmatpush1.bf16.msra.mxu1 %v5470_v62  ;;  %3085 = vmatprep.mubr.bf16.mxu1 %v4982_v21 }
0x294c   :  { %3055 = vmatprep.subr.bf16.mxu1 %v5472_v14 }
0x294d   :  { %4562 = vmatpush3.bf16.msra.mxu0 %v5561_v48 }
0x294e   :  { %4563 = vmatprep.subr.bf16.mxu0 %v4988_v31 }
0x294f   :  { %3056 = vmatpush1.bf16.msra.mxu1 %v5488_v8 }
0x2950   :  { %3057 = vmatprep.subr.bf16.mxu1 %v5492_v20 }
0x2951   :  { %4565 = vmatpush3.bf16.msra.mxu0 %v5571_v39 }
0x2952   :  { %4566 = vmatprep.subr.bf16.mxu0 %v4988_v31 }
0x2953   :  { %3058 = vmatpush1.bf16.msra.mxu1 %v5507_v46 }
0x2954   :  { %3059 = vmatprep.subr.bf16.mxu1 %v5510_v29 }
0x2955   :  { %4568 = vmatpush3.bf16.msra.mxu0 %v5581_v36 }
0x2956   :  { %4569 = vmatprep.subr.bf16.mxu0 %v4988_v31 }
0x2957   :  { %3060 = vmatpush1.bf16.msra.mxu1 %v5519_v24 }
0x2958   :  { %3203 = vmatprep.subr.bf16.mxu1 %v5451_v53 }
0x2a1b   :  { %v5832_v54 = vpop.f32.mrb[42].mxu0 }
0x2a1c   :  { %v4318_v55 = vpop.f32.mrb[43].mxu0 }
0x2a1d   :  { %v2937_v56 = vpop.f32.mrb[64].mxu1 }
0x2a1e   :  { %v2939_v57 = vpop.f32.mrb[65].mxu1  ;;  %v2944_v6 = vadd.f32 %v2937_v56, %v5542_v17 }
0x2a1f   :  { %v2945_v59 = vadd.f32 %v2939_v57, %v5536_v9  ;;  %v2941_v60 = vpop.f32.mrb[66].mxu1 }
0x2a20   :  { %v2942_v61 = vpop.f32.mrb[67].mxu1  ;;  %v3962_v7 = vmul.f32 -1.442695, %v2944_v6 }
0x2a21   :  { %4856 = vtanh.f32 %v2945_v59  ;;  %v3963_v3 = vmul.f32 -1.442695, %v2945_v59 }
0x2a22   :  { %4858 = vpow2.f32 %v3962_v7 }
0x2a2b   :  { %v4857_v63 = vpop.eup %4856 }
0x2a2c   :  { %2961 = vrot.lane.b32.xlu1 %v4857_v63, %s4983_s3  ;;  %v4859_v15 = vpop.eup %4858 }
0x2a2d   :  { %v2952_v22 = vadd.f32 1.0, %v4859_v15 }
0x2a2f   :  { %4860 = vrcp.f32 %v2952_v22 }
0x2a39   :  { %v4861_v27 = vpop.eup %4860 }
0x2a3a   :  { %v2959_v1 = vmul.f32 %v4861_v27, %v2819_v38 }
0x2a9e   :  { %v2962_v26 = vpop.permute.xlu1 %2961 }
0x2a9f   :  { %v2964_v19 = vmul.f32 %v4861_v27, %v2962_v26 }
0x2aa1   :  { %2966 = vrot.lane.b32.xlu0 %v2964_v19, %s4983_s3 }
0x2b13   :  { %v2967_v25 = vpop.permute.xlu0 %2966 }
0x2b14   :  { %v2969_v23 = vadd.f32 %v2967_v25, %v2959_v1 }
0x2b16   :  { %4862 = vtanh.f32 %v2969_v23 }
0x2b17   :  { %4864 = vpow2.f32 %v3963_v3 }
0x2b20   :  { %v4863_v5 = vpop.eup %4862 }
0x2b21   :  { %2972 = vrot.lane.b32.xlu1 %v4863_v5, %s4983_s3  ;;  %v4865_v10 = vpop.eup %4864 }
0x2b22   :  { %v2953_v11 = vadd.f32 1.0, %v4865_v10 }
0x2b24   :  { %4866 = vrcp.f32 %v2953_v11 }
0x2b2e   :  { %v4867_v12 = vpop.eup %4866 }
0x2b93   :  { %v2973_v13 = vpop.permute.xlu1 %2972 }
0x2b94   :  { %v2975_v16 = vmul.f32 %v4867_v12, %v2973_v13 }
0x2b96   :  { %v3049_v44 = vpack.c.bf16 %v2975_v16, %v2975_v16  ;;  %4336 = vmatmul.mubr.msk.f32.vlgmr.msra.gmra.mrb[44].mxu0 %vm707_vm1, %v2975_v16 }
0x2b97   :  { %4571 = vmatpush3.bf16.msra.mxu0 %v5555_v43  ;;  %4354 = vmatprep.mubr.msk.f32.mxu0 %vm4989_vm2, %v4978_v0 }
0x2b98   :  { %3965 = vmatmul.mubr.msk.bf16.vlgmr.msra.gmra.mrb[68].mxu1 %vm707_vm1, %v3049_v44  ;;  %4572 = vmatprep.subr.bf16.mxu0 %v4988_v31 }
0x2b99   :  { %3204 = vmatpush1.bf16.msra.mxu1 %v5470_v62  ;;  %3235 = vmatprep.mubr.bf16.mxu1 %v4982_v21 }
0x2b9a   :  { %3205 = vmatprep.subr.bf16.mxu1 %v5472_v14 }
0x2b9b   :  { %4574 = vmatpush3.bf16.msra.mxu0 %v5561_v48 }
0x2b9c   :  { %4575 = vmatprep.subr.bf16.mxu0 %v4988_v31 }
0x2b9d   :  { %3206 = vmatpush1.bf16.msra.mxu1 %v5488_v8 }
0x2b9e   :  { %3207 = vmatprep.subr.bf16.mxu1 %v5492_v20 }
0x2b9f   :  { %4577 = vmatpush3.bf16.msra.mxu0 %v5571_v39 }
0x2ba0   :  { %4578 = vmatprep.subr.bf16.mxu0 %v4988_v31 }
0x2ba1   :  { %3208 = vmatpush1.bf16.msra.mxu1 %v5507_v46 }
0x2ba2   :  { %3209 = vmatprep.subr.bf16.mxu1 %v5510_v29 }
0x2ba3   :  { %4580 = vmatpush3.bf16.msra.mxu0 %v5581_v36 }
0x2ba4   :  { %4581 = vmatprep.subr.bf16.mxu0 %v4988_v31 }
0x2ba5   :  { %3210 = vmatpush1.bf16.msra.mxu1 %v5519_v24 }
0x2ba6   :  { %3353 = vmatprep.subr.bf16.mxu1 %v5451_v53 }
0x2c69   :  { %v5860_v18 = vpop.f32.mrb[44].mxu0 }
0x2c6a   :  { %v4337_v30 = vpop.f32.mrb[45].mxu0 }
0x2c6b   :  { %v3087_v34 = vpop.f32.mrb[68].mxu1 }
0x2c6c   :  { %v3089_v35 = vpop.f32.mrb[69].mxu1  ;;  %v3094_v49 = vadd.f32 %v3087_v34, %v5542_v17 }
0x2c6d   :  { %v3095_v38 = vadd.f32 %v3089_v35, %v5536_v9  ;;  %v3091_v41 = vpop.f32.mrb[70].mxu1 }
0x2c6e   :  { %v3092_v42 = vpop.f32.mrb[71].mxu1  ;;  %v3966_v51 = vmul.f32 -1.442695, %v3094_v49 }
0x2c6f   :  { %4868 = vtanh.f32 %v3095_v38  ;;  %v3967_v63 = vmul.f32 -1.442695, %v3095_v38 }
0x2c70   :  { %4870 = vpow2.f32 %v3966_v51 }
0x2c79   :  { %v4869_v47 = vpop.eup %4868 }
0x2c7a   :  { %3111 = vrot.lane.b32.xlu0 %v4869_v47, %s4983_s3  ;;  %v4871_v40 = vpop.eup %4870 }
0x2c7b   :  { %v3102_v52 = vadd.f32 1.0, %v4871_v40 }
0x2c7d   :  { %4872 = vrcp.f32 %v3102_v52 }
0x2c87   :  { %v4873_v37 = vpop.eup %4872 }
0x2c88   :  { %v3109_v57 = vmul.f32 %v4873_v37, %v2969_v23 }
0x2cec   :  { %v3112_v55 = vpop.permute.xlu0 %3111 }
0x2ced   :  { %v3114_v56 = vmul.f32 %v4873_v37, %v3112_v55 }
0x2cef   :  { %3116 = vrot.lane.b32.xlu1 %v3114_v56, %s4983_s3 }
0x2d61   :  { %v3117_v59 = vpop.permute.xlu1 %3116 }
0x2d62   :  { %v3119_v60 = vadd.f32 %v3117_v59, %v3109_v57 }
0x2d64   :  { %4874 = vtanh.f32 %v3119_v60 }
0x2d65   :  { %4876 = vpow2.f32 %v3967_v63 }
0x2d6e   :  { %v4875_v61 = vpop.eup %4874 }
0x2d6f   :  { %3122 = vrot.lane.b32.xlu0 %v4875_v61, %s4983_s3  ;;  %v4877_v6 = vpop.eup %4876 }
0x2d70   :  { %v3103_v7 = vadd.f32 1.0, %v4877_v6 }
0x2d72   :  { %4878 = vrcp.f32 %v3103_v7 }
0x2d7c   :  { %v4879_v15 = vpop.eup %4878 }
0x2de1   :  { %v3123_v22 = vpop.permute.xlu0 %3122 }
0x2de2   :  { %v3125_v27 = vmul.f32 %v4879_v15, %v3123_v22 }
0x2de4   :  { %v3199_v26 = vpack.c.bf16 %v3125_v27, %v3125_v27  ;;  %4355 = vmatmul.mubr.msk.f32.vlgmr.msra.gmra.mrb[46].mxu0 %vm707_vm1, %v3125_v27 }
0x2de5   :  { %4583 = vmatpush3.bf16.msra.mxu0 %v5555_v43  ;;  %4373 = vmatprep.mubr.msk.f32.mxu0 %vm4989_vm2, %v4978_v0 }
0x2de6   :  { %3969 = vmatmul.mubr.msk.bf16.vlgmr.msra.gmra.mrb[72].mxu1 %vm707_vm1, %v3199_v26  ;;  %4584 = vmatprep.subr.bf16.mxu0 %v4988_v31 }
0x2de7   :  { %3354 = vmatpush1.bf16.msra.mxu1 %v5470_v62  ;;  %3385 = vmatprep.mubr.bf16.mxu1 %v4982_v21 }
0x2de8   :  { %3355 = vmatprep.subr.bf16.mxu1 %v5472_v14 }
0x2de9   :  { %4586 = vmatpush3.bf16.msra.mxu0 %v5561_v48 }
0x2dea   :  { %4587 = vmatprep.subr.bf16.mxu0 %v4988_v31 }
0x2deb   :  { %3356 = vmatpush1.bf16.msra.mxu1 %v5488_v8 }
0x2dec   :  { %3357 = vmatprep.subr.bf16.mxu1 %v5492_v20 }
0x2ded   :  { %4589 = vmatpush3.bf16.msra.mxu0 %v5571_v39 }
0x2dee   :  { %4590 = vmatprep.subr.bf16.mxu0 %v4988_v31 }
0x2def   :  { %3358 = vmatpush1.bf16.msra.mxu1 %v5507_v46 }
0x2df0   :  { %3359 = vmatprep.subr.bf16.mxu1 %v5510_v29 }
0x2df1   :  { %4592 = vmatpush3.bf16.msra.mxu0 %v5581_v36 }
0x2df2   :  { %4593 = vmatprep.subr.bf16.mxu0 %v4988_v31 }
0x2df3   :  { %3360 = vmatpush1.bf16.msra.mxu1 %v5519_v24 }
0x2df4   :  { %3503 = vmatprep.subr.bf16.mxu1 %v5451_v53 }
0x2eb7   :  { %v5888_v19 = vpop.f32.mrb[46].mxu0 }
0x2eb8   :  { %v4356_v1 = vpop.f32.mrb[47].mxu0 }
0x2eb9   :  { %v3237_v25 = vpop.f32.mrb[72].mxu1 }
0x2eba   :  { %v3239_v23 = vpop.f32.mrb[73].mxu1  ;;  %v3244_v12 = vadd.f32 %v3237_v25, %v5542_v17 }
0x2ebb   :  { %v3245_v5 = vadd.f32 %v3239_v23, %v5536_v9  ;;  %v3241_v3 = vpop.f32.mrb[74].mxu1 }
0x2ebc   :  { %v3242_v10 = vpop.f32.mrb[75].mxu1  ;;  %v3970_v13 = vmul.f32 -1.442695, %v3244_v12 }
0x2ebd   :  { %4880 = vtanh.f32 %v3245_v5  ;;  %v3971_v49 = vmul.f32 -1.442695, %v3245_v5 }
0x2ebe   :  { %4882 = vpow2.f32 %v3970_v13 }
0x2ec7   :  { %v4881_v11 = vpop.eup %4880 }
0x2ec8   :  { %3261 = vrot.lane.b32.xlu1 %v4881_v11, %s4983_s3  ;;  %v4883_v16 = vpop.eup %4882 }
0x2ec9   :  { %v3252_v44 = vadd.f32 1.0, %v4883_v16 }
0x2ecb   :  { %4884 = vrcp.f32 %v3252_v44 }
0x2ed5   :  { %v4885_v30 = vpop.eup %4884 }
0x2ed6   :  { %v3259_v38 = vmul.f32 %v4885_v30, %v3119_v60 }
0x2f3a   :  { %v3262_v34 = vpop.permute.xlu1 %3261 }
0x2f3b   :  { %v3264_v35 = vmul.f32 %v4885_v30, %v3262_v34 }
0x2f3d   :  { %3266 = vrot.lane.b32.xlu0 %v3264_v35, %s4983_s3 }
0x2faf   :  { %v3267_v41 = vpop.permute.xlu0 %3266 }
0x2fb0   :  { %v3269_v42 = vadd.f32 %v3267_v41, %v3259_v38 }
0x2fb2   :  { %4886 = vtanh.f32 %v3269_v42 }
0x2fb3   :  { %4888 = vpow2.f32 %v3971_v49 }
0x2fbc   :  { %v4887_v47 = vpop.eup %4886 }
0x2fbd   :  { %3272 = vrot.lane.b32.xlu1 %v4887_v47, %s4983_s3  ;;  %v4889_v51 = vpop.eup %4888 }
0x2fbe   :  { %v3253_v40 = vadd.f32 1.0, %v4889_v51 }
0x2fc0   :  { %4890 = vrcp.f32 %v3253_v40 }
0x2fca   :  { %v4891_v52 = vpop.eup %4890 }
0x302f   :  { %v3273_v37 = vpop.permute.xlu1 %3272 }
0x3030   :  { %v3275_v55 = vmul.f32 %v4891_v52, %v3273_v37 }
0x3032   :  { %v3349_v56 = vpack.c.bf16 %v3275_v55, %v3275_v55  ;;  %4374 = vmatmul.mubr.msk.f32.vlgmr.msra.gmra.mrb[48].mxu0 %vm707_vm1, %v3275_v55 }
0x3033   :  { %4595 = vmatpush3.bf16.msra.mxu0 %v5555_v43  ;;  %4392 = vmatprep.mubr.msk.f32.mxu0 %vm4989_vm2, %v4978_v0 }
0x3034   :  { %3973 = vmatmul.mubr.msk.bf16.vlgmr.msra.gmra.mrb[76].mxu1 %vm707_vm1, %v3349_v56  ;;  %4596 = vmatprep.subr.bf16.mxu0 %v4988_v31 }
0x3035   :  { %3504 = vmatpush1.bf16.msra.mxu1 %v5470_v62  ;;  %3535 = vmatprep.mubr.bf16.mxu1 %v4982_v21 }
0x3036   :  { %3505 = vmatprep.subr.bf16.mxu1 %v5472_v14 }
0x3037   :  { %4598 = vmatpush3.bf16.msra.mxu0 %v5561_v48 }
0x3038   :  { %4599 = vmatprep.subr.bf16.mxu0 %v4988_v31 }
0x3039   :  { %3506 = vmatpush1.bf16.msra.mxu1 %v5488_v8 }
0x303a   :  { %3507 = vmatprep.subr.bf16.mxu1 %v5492_v20 }
0x303b   :  { %4601 = vmatpush3.bf16.msra.mxu0 %v5571_v39 }
0x303c   :  { %4602 = vmatprep.subr.bf16.mxu0 %v4988_v31 }
0x303d   :  { %3508 = vmatpush1.bf16.msra.mxu1 %v5507_v46 }
0x303e   :  { %3509 = vmatprep.subr.bf16.mxu1 %v5510_v29 }
0x303f   :  { %4604 = vmatpush3.bf16.msra.mxu0 %v5581_v36 }
0x3040   :  { %4605 = vmatprep.subr.bf16.mxu0 %v4988_v31 }
0x3041   :  { %3510 = vmatpush1.bf16.msra.mxu1 %v5519_v24 }
0x3042   :  { %3653 = vmatprep.subr.bf16.mxu1 %v5451_v53 }
0x3105   :  { %v5916_v57 = vpop.f32.mrb[48].mxu0 }
0x3106   :  { %v4375_v59 = vpop.f32.mrb[49].mxu0 }
0x3107   :  { %v3387_v60 = vpop.f32.mrb[76].mxu1 }
0x3108   :  { %v3389_v61 = vpop.f32.mrb[77].mxu1  ;;  %v3394_v22 = vadd.f32 %v3387_v60, %v5542_v17 }
0x3109   :  { %v3395_v63 = vadd.f32 %v3389_v61, %v5536_v9  ;;  %v3391_v6 = vpop.f32.mrb[78].mxu1 }
0x310a   :  { %v3392_v7 = vpop.f32.mrb[79].mxu1  ;;  %v3974_v27 = vmul.f32 -1.442695, %v3394_v22 }
0x310b   :  { %4892 = vtanh.f32 %v3395_v63  ;;  %v3975_v12 = vmul.f32 -1.442695, %v3395_v63 }
0x310c   :  { %4894 = vpow2.f32 %v3974_v27 }
0x3115   :  { %v4893_v15 = vpop.eup %4892 }
0x3116   :  { %3411 = vrot.lane.b32.xlu0 %v4893_v15, %s4983_s3  ;;  %v4895_v26 = vpop.eup %4894 }
0x3117   :  { %v3402_v1 = vadd.f32 1.0, %v4895_v26 }
0x3119   :  { %4896 = vrcp.f32 %v3402_v1 }
0x3123   :  { %v4897_v53 = vpop.eup %4896 }
0x3124   :  { %v3409_v5 = vmul.f32 %v4897_v53, %v3269_v42 }
0x3188   :  { %v3412_v25 = vpop.permute.xlu0 %3411 }
0x3189   :  { %v3414_v23 = vmul.f32 %v4897_v53, %v3412_v25 }
0x318b   :  { %3416 = vrot.lane.b32.xlu1 %v3414_v23, %s4983_s3 }
0x31fd   :  { %v3417_v3 = vpop.permute.xlu1 %3416 }
0x31fe   :  { %v3419_v10 = vadd.f32 %v3417_v3, %v3409_v5 }
0x3200   :  { %4898 = vtanh.f32 %v3419_v10 }
0x3201   :  { %4900 = vpow2.f32 %v3975_v12 }
0x320a   :  { %v4899_v11 = vpop.eup %4898 }
0x320b   :  { %3422 = vrot.lane.b32.xlu0 %v4899_v11, %s4983_s3  ;;  %v4901_v13 = vpop.eup %4900 }
0x320c   :  { %v3403_v16 = vadd.f32 1.0, %v4901_v13 }
0x320e   :  { %4902 = vrcp.f32 %v3403_v16 }
0x3218   :  { %v4903_v44 = vpop.eup %4902 }
0x327d   :  { %v3423_v30 = vpop.permute.xlu0 %3422 }
0x327e   :  { %v3425_v34 = vmul.f32 %v4903_v44, %v3423_v30 }
0x3280   :  { %v3499_v35 = vpack.c.bf16 %v3425_v34, %v3425_v34  ;;  %4393 = vmatmul.mubr.msk.f32.vlgmr.msra.gmra.mrb[50].mxu0 %vm707_vm1, %v3425_v34 }
0x3281   :  { %4607 = vmatpush3.bf16.msra.mxu0 %v5555_v43  ;;  %4411 = vmatprep.mubr.msk.f32.mxu0 %vm4989_vm2, %v4978_v0 }
0x3282   :  { %3977 = vmatmul.mubr.msk.bf16.vlgmr.msra.gmra.mrb[80].mxu1 %vm707_vm1, %v3499_v35  ;;  %4608 = vmatprep.subr.bf16.mxu0 %v4988_v31 }
0x3283   :  { %3654 = vmatpush1.bf16.msra.mxu1 %v5470_v62  ;;  %3685 = vmatprep.mubr.bf16.mxu1 %v4982_v21 }
0x3284   :  { %3655 = vmatprep.subr.bf16.mxu1 %v5472_v14 }
0x3285   :  { %4610 = vmatpush3.bf16.msra.mxu0 %v5561_v48 }
0x3286   :  { %4611 = vmatprep.subr.bf16.mxu0 %v4988_v31 }
0x3287   :  { %3656 = vmatpush1.bf16.msra.mxu1 %v5488_v8 }
0x3288   :  { %3657 = vmatprep.subr.bf16.mxu1 %v5492_v20 }
0x3289   :  { %4613 = vmatpush3.bf16.msra.mxu0 %v5571_v39 }
0x328a   :  { %4614 = vmatprep.subr.bf16.mxu0 %v4988_v31 }
0x328b   :  { %3658 = vmatpush1.bf16.msra.mxu1 %v5507_v46 }
0x328c   :  { %3659 = vmatprep.subr.bf16.mxu1 %v5510_v29 }
0x328d   :  { %4616 = vmatpush3.bf16.msra.mxu0 %v5581_v36 }
0x328e   :  { %4617 = vmatprep.subr.bf16.mxu0 %v4988_v31 }
0x328f   :  { %3660 = vmatpush1.bf16.msra.mxu1 %v5519_v24 }
0x3353   :  { %v5943_v21 = vpop.f32.mrb[50].mxu0 }
0x3354   :  { %v4394_v62 = vpop.f32.mrb[51].mxu0 }
0x3355   :  { %v3537_v14 = vpop.f32.mrb[80].mxu1 }
0x3356   :  { %v3539_v8 = vpop.f32.mrb[81].mxu1  ;;  %v3544_v46 = vadd.f32 %v3537_v14, %v5542_v17 }
0x3357   :  { %v3545_v20 = vadd.f32 %v3539_v8, %v5536_v9  ;;  %v3541_v38 = vpop.f32.mrb[82].mxu1 }
0x3358   :  { %v3542_v41 = vpop.f32.mrb[83].mxu1  ;;  %v3978_v29 = vmul.f32 -1.442695, %v3544_v46 }
0x3359   :  { %4904 = vtanh.f32 %v3545_v20  ;;  %v3979_v59 = vmul.f32 -1.442695, %v3545_v20 }
0x335a   :  { %4906 = vpow2.f32 %v3978_v29 }
0x3363   :  { %v4905_v42 = vpop.eup %4904 }
0x3364   :  { %3561 = vrot.lane.b32.xlu1 %v4905_v42, %s4983_s3  ;;  %v4907_v47 = vpop.eup %4906 }
0x3365   :  { %v3552_v49 = vadd.f32 1.0, %v4907_v47 }
0x3367   :  { %4908 = vrcp.f32 %v3552_v49 }
0x3371   :  { %v4909_v24 = vpop.eup %4908 }
0x3372   :  { %v3559_v52 = vmul.f32 %v4909_v24, %v3419_v10  ;;  %v3927_v10 = vld [vmem:[#allocation4] ss:$0 sm:$0xff] }
0x3373   :  { %v2146_v11 = vadd.f32 %v3927_v10, %v5692_v50  ;;  %v2746_v12 = vadd.f32 %v3927_v10, %v5804_v28  ;;  %v3046_v13 = vadd.f32 %v3927_v10, %v5860_v18  ;;  %v1996_v28 = vadd.f32 %v3927_v10, %v5664_v45 }
0x3374   :  { %v2296_v18 = vadd.f32 %v3927_v10, %v5720_v2  ;;  %v2896_v34 = vadd.f32 %v3927_v10, %v5832_v54  ;;  %v3196_v35 = vadd.f32 %v3927_v10, %v5888_v19  ;;  %v3496_v45 = vadd.f32 %v3927_v10, %v5943_v21 }
0x3375   :  { %v1696_v29 = vadd.f32 %v3927_v10, %v5608_v4 }
0x33d6   :  { %v3562_v51 = vpop.permute.xlu1 %3561 }
0x33d7   :  { %v3564_v40 = vmul.f32 %v4909_v24, %v3562_v51 }
0x33d9   :  { %3566 = vrot.lane.b32.xlu0 %v3564_v40, %s4983_s3 }
0x344b   :  { %v3567_v37 = vpop.permute.xlu0 %3566 }
0x344c   :  { %v3569_v55 = vadd.f32 %v3567_v37, %v3559_v52 }
0x344e   :  { %4910 = vtanh.f32 %v3569_v55 }
0x344f   :  { %4912 = vpow2.f32 %v3979_v59 }
0x3458   :  { %v4911_v56 = vpop.eup %4910 }
0x3459   :  { %3572 = vrot.lane.b32.xlu1 %v4911_v56, %s4983_s3  ;;  %v4913_v60 = vpop.eup %4912 }
0x345a   :  { %v3553_v61 = vadd.f32 1.0, %v4913_v60 }
0x345c   :  { %4914 = vrcp.f32 %v3553_v61 }
0x3466   :  { %v4915_v63 = vpop.eup %4914 }
0x34cb   :  { %v3573_v6 = vpop.permute.xlu1 %3572 }
0x34cc   :  { %v3575_v7 = vmul.f32 %v4915_v63, %v3573_v6 }
0x34ce   :  { %v3649_v15 = vpack.c.bf16 %v3575_v7, %v3575_v7  ;;  %4412 = vmatmul.mubr.msk.f32.vlgmr.msra.gmra.mrb[52].mxu0 %vm707_vm1, %v3575_v7 }
0x34cf   :  { %4619 = vmatpush3.bf16.msra.mxu0 %v5555_v43  ;;  %4430 = vmatprep.mubr.msk.f32.mxu0 %vm4989_vm2, %v4978_v0 }
0x34d0   :  { %3981 = vmatmul.mubr.msk.bf16.vlgmr.msra.gmra.mrb[84].mxu1 %vm707_vm1, %v3649_v15  ;;  %4620 = vmatprep.subr.bf16.mxu0 %v4988_v31 }
0x34d3   :  { %4622 = vmatpush3.bf16.msra.mxu0 %v5561_v48 }
0x34d4   :  { %4623 = vmatprep.subr.bf16.mxu0 %v4988_v31 }
0x34d7   :  { %4625 = vmatpush3.bf16.msra.mxu0 %v5571_v39 }
0x34d8   :  { %4626 = vmatprep.subr.bf16.mxu0 %v4988_v31 }
0x34db   :  { %4628 = vmatpush3.bf16.msra.mxu0 %v5581_v36 }
0x35a1   :  { %v3645_v22 = vpop.f32.mrb[52].mxu0 }
0x35a2   :  { %v4413_v27 = vpop.f32.mrb[53].mxu0  ;;  %v3646_v16 = vadd.f32 %v3927_v10, %v3645_v22 }
0x35a3   :  { %v3687_v43 = vpop.f32.mrb[84].mxu1 }
0x35a4   :  { %v3689_v26 = vpop.f32.mrb[85].mxu1  ;;  %v3694_v48 = vadd.f32 %v3687_v43, %v5542_v17  ;;  %v2446_v17 = vadd.f32 %v3927_v10, %v5748_v58 }
0x35a5   :  { %v3695_v0 = vadd.f32 %v3689_v26, %v5536_v9  ;;  %v3691_v1 = vpop.f32.mrb[86].mxu1  ;;  %v1846_v9 = vadd.f32 %v3927_v10, %v5636_v33  ;;  %v3346_v33 = vadd.f32 %v3927_v10, %v5916_v57  ;;  %v2596_v57 = vadd.f32 %v3927_v10, %v5776_v32 }
0x35a6   :  { %v3692_v53 = vpop.f32.mrb[87].mxu1  ;;  %v3982_v23 = vmul.f32 -1.442695, %v3694_v48 }
0x35a7   :  { %4916 = vtanh.f32 %v3695_v0  ;;  %v3983_v62 = vmul.f32 -1.442695, %v3695_v0 }
0x35a8   :  { %4918 = vpow2.f32 %v3982_v23 }
0x35b1   :  { %v4917_v25 = vpop.eup %4916 }
0x35b2   :  { %3711 = vrot.lane.b32.xlu0 %v4917_v25, %s4983_s3  ;;  %v4919_v39 = vpop.eup %4918 }
0x35b3   :  { %v3702_v31 = vadd.f32 1.0, %v4919_v39 }
0x35b5   :  { %4920 = vrcp.f32 %v3702_v31 }
0x35bf   :  { %v4921_v36 = vpop.eup %4920 }
0x35c0   :  { %v3709_v50 = vmul.f32 %v4921_v36, %v3569_v55 }
0x3624   :  { %v3712_v5 = vpop.permute.xlu0 %3711 }
0x3625   :  { %v3714_v3 = vmul.f32 %v4921_v36, %v3712_v5 }
0x3627   :  { %3716 = vrot.lane.b32.xlu1 %v3714_v3, %s4983_s3 }
0x362b   :  { %3800 = vrot.lane.b32.xlu1 %v1846_v9, %s4990_s9 }
0x362f   :  { %3808 = vrot.lane.b32.xlu1 %v2146_v11, %s4991_s19 }
0x3633   :  { %3816 = vrot.lane.b32.xlu1 %v2446_v17, %s4992_s4 }
0x3637   :  { %3824 = vrot.lane.b32.xlu1 %v2746_v12, %s4993_s22 }
0x363b   :  { %3832 = vrot.lane.b32.xlu1 %v3046_v13, %s4987_s1  ;;  %s4995_s1 = smov 32  }
0x363f   :  { %3840 = vrot.lane.b32.xlu1 %v3346_v33, %s4985_s10  ;;  %s4996_s10 = smov 48  }
0x3643   :  { %3848 = vrot.lane.b32.xlu1 %v3646_v16, %s4986_s28 }
0x3699   :  { %v3717_v44 = vpop.permute.xlu1 %3716 }
0x369a   :  { %v3719_v58 = vadd.f32 %v3717_v44, %v3709_v50 }
0x369c   :  { %4922 = vtanh.f32 %v3719_v58 }
0x369d   :  { %4924 = vpow2.f32 %v3983_v62  ;;  %v3801_v19 = vpop.permute.xlu1 %3800 }
0x369e   :  { %v3855_v49 = vsel %vm83_vm0, %v1696_v29, %v3801_v19 }
0x36a1   :  { %v3809_v21 = vpop.permute.xlu1 %3808 }
0x36a5   :  { %v3817_v47 = vpop.permute.xlu1 %3816 }
0x36a6   :  { %v4923_v30 = vpop.eup %4922 }
0x36a7   :  { %3722 = vrot.lane.b32.xlu0 %v4923_v30, %s4983_s3  ;;  %v4925_v2 = vpop.eup %4924 }
0x36a8   :  { %v3703_v14 = vadd.f32 1.0, %v4925_v2 }
0x36a9   :  { %v3825_v52 = vpop.permute.xlu1 %3824 }
0x36aa   :  { %4926 = vrcp.f32 %v3703_v14 }
0x36ab   :  { %3804 = vrot.lane.b32.xlu0 %v1996_v28, %s4994_s23 }
0x36ad   :  { %v3833_v60 = vpop.permute.xlu1 %3832 }
0x36af   :  { %3812 = vrot.lane.b32.xlu0 %v2296_v18, %s4995_s1 }
0x36b1   :  { %v3841_v7 = vpop.permute.xlu1 %3840 }
0x36b3   :  { %3820 = vrot.lane.b32.xlu0 %v2596_v57, %s4996_s10 }
0x36b4   :  { %v4927_v32 = vpop.eup %4926 }
0x36b5   :  { %v3849_v26 = vpop.permute.xlu1 %3848 }
0x36b7   :  { %3828 = vrot.lane.b32.xlu0 %v2896_v34, %s4983_s3 }
0x36bb   :  { %3836 = vrot.lane.b32.xlu0 %v3196_v35, %s4980_s21 }
0x36bf   :  { %3844 = vrot.lane.b32.xlu0 %v3496_v45, %s4981_s0 }
0x3719   :  { %v3723_v8 = vpop.permute.xlu0 %3722 }
0x371a   :  { %v3725_v20 = vmul.f32 %v4927_v32, %v3723_v8 }
0x371c   :  { %4431 = vmatmul.mubr.msk.f32.vlgmr.msra.gmra.mrb[54].mxu0 %vm707_vm1, %v3725_v20 }
0x371d   :  { %v3805_v42 = vpop.permute.xlu0 %3804 }
0x371e   :  { %v3856_v51 = vsel %vm1439_vm4, %v3855_v49, %v3805_v42 }
0x371f   :  { %v3858_v40 = vsel %vm3857_vm5, %v3856_v51, %v3809_v21 }
0x3721   :  { %v3813_v46 = vpop.permute.xlu0 %3812 }
0x3722   :  { %v3859_v37 = vsel %vm1411_vm3, %v3858_v40, %v3813_v46 }
0x3723   :  { %v3861_v56 = vsel %vm3860_vm6, %v3859_v37, %v3817_v47 }
0x3725   :  { %v3821_v24 = vpop.permute.xlu0 %3820 }
0x3726   :  { %v3863_v59 = vsel %vm3862_vm7, %v3861_v56, %v3821_v24 }
0x3727   :  { %v3865_v61 = vsel %vm3864_vm8, %v3863_v59, %v3825_v52 }
0x3729   :  { %v3829_v55 = vpop.permute.xlu0 %3828 }
0x372a   :  { %v3866_v63 = vsel %vm707_vm1, %v3865_v61, %v3829_v55 }
0x372b   :  { %v3868_v6 = vsel %vm3867_vm9, %v3866_v63, %v3833_v60 }
0x372d   :  { %v3837_v4 = vpop.permute.xlu0 %3836 }
0x372e   :  { %v3870_v15 = vsel %vm3869_vm10, %v3868_v6, %v3837_v4 }
0x372f   :  { %v3872_v27 = vsel %vm3871_vm11, %v3870_v15, %v3841_v7 }
0x3731   :  { %v3845_v22 = vpop.permute.xlu0 %3844 }
0x3732   :  { %v3874_v43 = vsel %vm3873_vm12, %v3872_v27, %v3845_v22 }
0x3733   :  { %v3876_v0 = vsel %vm3875_vm13, %v3874_v43, %v3849_v26 }
0x37ef   :  { %v3795_v54 = vpop.f32.mrb[54].mxu0 }
0x37f0   :  { %v3796_v38 = vadd.f32 %v3927_v10, %v3795_v54  ;;  %v4432_v41 = vpop.f32.mrb[55].mxu0 }
0x37f2   :  { %3852 = vrot.lane.b32.xlu0 %v3796_v38, %s4979_s20 }
0x3864   :  { %v3853_v1 = vpop.permute.xlu0 %3852 }
0x3865   :  { %v3878_v53 = vsel %vm3877_vm14, %v3876_v0, %v3853_v1 }
0x3866   :  { %3880 = vst.msk [vmem:[%s6006_s12] sm:$0xff] %vm3879_vm15, %v3878_v53 }
0x3867   :  { %3889 = vsyncpa [#allocation3], 1 }
0x3868   :  { %3890 = vsyncpa [#allocation5], 1 }

</bundles_post_ra>
